<compile_context>
chip_gen: v7x
topology: tpu7x:2x2x1
jax: 0.10.0
libtpu: 0.0.40
codegen_flags: <defaults>
</compile_context>

<pallas_src>
import jax
import jax.numpy as jnp
from jax import lax
from jax.experimental import pallas as pl
from jax.experimental.pallas import tpu as pltpu

T = 70        # sequence length (hard-coded by input.view(70, 400, -1))
B = 400       # batch
BP = 512      # batch padded to a multiple of 128 lanes
D_IN = 42     # encoder input features
H = 10        # LSTM hidden size (encoder and decoder)
D_OUT = 8     # decoder Linear output features
G = 16        # padded per-gate width (8-sublane-aligned gate slices)
HP = G        # padded hidden size carried in-kernel
U = 14        # encoder timesteps per grid step (streamed gx chunk)

assert T % U == 0 and U % 2 == 0 and T % 2 == 0


def seq2seq_kernel(gx_ref,                 # (U, 4G, BP) bf16: streamed encoder input gates (+bias)
                   h0_ref, c0_ref,         # (HP, BP) f32
                   whhe_ref,               # (4G, HP) bf16 encoder recurrent weights
                   wihd_ref, whhd_ref,     # (4G, HP) bf16 decoder input / recurrent weights
                   bd_ref,                 # (4G, BP) f32 decoder bias, pre-broadcast
                   wout_ref, bout_ref,     # (D_OUT, HP) f32, (D_OUT, 1) f32
                   out_ref, hn_ref, cn_ref,   # (D_OUT, BP), (HP, BP), (HP, BP) f32
                   gxd_ref,                # scratch (T, 4G, BP) bf16: precomputed decoder gates
                   h_sc, c_sc):            # scratch (HP, BP) f32: carried LSTM state
    tc = pl.program_id(0)
    nt = pl.num_programs(0)

    def sigmoid(x):
        # single-EUP-op sigmoid (tanh form), mathematically exact
        return 0.5 * (jnp.tanh(0.5 * x) + 1.0)

    def gates_to_state(gates, c):
        # gate blocks are 16 rows each -> 8-sublane-aligned static slices
        i = sigmoid(gates[0 * G:1 * G, :])
        f = sigmoid(gates[1 * G:2 * G, :])
        g = jnp.tanh(gates[2 * G:3 * G, :])
        o = sigmoid(gates[3 * G:4 * G, :])
        c_new = f * c + i * g
        h_new = o * jnp.tanh(c_new)
        return h_new, c_new

    @pl.when(tc == 0)
    def _():
        h_sc[...] = h0_ref[...]
        c_sc[...] = c0_ref[...]

    # hoisted loads (VMEM-resident, tiny)
    whhe = whhe_ref[...]
    wihd = wihd_ref[...]
    bd = bd_ref[...]

    # ----------------------- encoder LSTM (this chunk) -----------------------
    # input projection already folded into gx_ref; serial work = h @ W_hh only.
    def enc_step(u, h, c):
        gates = gx_ref[u].astype(jnp.float32) + jnp.dot(
            whhe, h.astype(jnp.bfloat16), preferred_element_type=jnp.float32)
        h_new, c_new = gates_to_state(gates, c)
        # precompute the DECODER input-projection gates off the critical path
        gxd = jnp.dot(wihd, h_new.astype(jnp.bfloat16),
                      preferred_element_type=jnp.float32) + bd
        gxd_ref[tc * U + u] = gxd.astype(jnp.bfloat16)
        return h_new, c_new

    def enc_body(k, carry):
        h, c = carry
        h, c = enc_step(2 * k, h, c)
        h, c = enc_step(2 * k + 1, h, c)
        return h, c

    h_e, c_e = lax.fori_loop(0, U // 2, enc_body, (h_sc[...], c_sc[...]))
    h_sc[...] = h_e
    c_sc[...] = c_e

    # ----------------------- decoder LSTM (last grid step only) --------------
    @pl.when(tc == nt - 1)
    def _():
        whhd = whhd_ref[...]

        def dec_step(t, h, c):
            gates = gxd_ref[t].astype(jnp.float32) + jnp.dot(
                whhd, h.astype(jnp.bfloat16), preferred_element_type=jnp.float32)
            return gates_to_state(gates, c)

        # peel t = 0: the Linear head is applied only to decoder output[0]
        h_d, c_d = dec_step(0, h_sc[...], c_sc[...])
        out_ref[...] = (jnp.dot(wout_ref[...], h_d,
                                preferred_element_type=jnp.float32)
                        + bout_ref[...])

        # t = 1 .. T-2 in pairs, then a final peeled step at t = T-1
        def dec_body(k, carry):
            h, c = carry
            h, c = dec_step(2 * k + 1, h, c)
            h, c = dec_step(2 * k + 2, h, c)
            return h, c

        h_d, c_d = lax.fori_loop(0, (T - 2) // 2, dec_body, (h_d, c_d))
        h_d, c_d = dec_step(T - 1, h_d, c_d)

        hn_ref[...] = h_d
        cn_ref[...] = c_d


# --------------------- weight re-layout helpers ---------------------
def _pack_gate_rows(w):
    """(in_dim, 4H) [i,f,g,o] columns -> feature-major (4G, in_dim), gate rows padded."""
    wt = w.T.reshape(4, H, -1)                       # (4, H, in)
    wt = jnp.pad(wt, ((0, 0), (0, G - H), (0, 0)))   # (4, G, in)
    return wt.reshape(4 * G, -1)


def _pack_gate_vec(b):
    """(1, 4H) -> (4G,) with zero-padded gate blocks."""
    bt = b.reshape(4, H)
    bt = jnp.pad(bt, ((0, 0), (0, G - H)))
    return bt.reshape(4 * G)


def seq2seq_forward(x, hidden_in, p):
    """Mirrors Seq2Seq.forward. Returns (output (B, D_OUT), (h_n, c_n) each (1, B, H))."""
    h0, c0 = hidden_in
    x = x.reshape(T, B, -1)            # mirrors input.view(70, 400, -1)
    h0 = h0.reshape(B, H)
    c0 = c0.reshape(B, H)

    # ---- pack weights: padded, feature-major, gate-aligned; recurrent weights bf16 ----
    w_ih_e = _pack_gate_rows(p["w_ih_e"])                                   # (4G, D_IN) f32
    w_hh_e = jnp.pad(_pack_gate_rows(p["w_hh_e"]),
                     ((0, 0), (0, G - H))).astype(jnp.bfloat16)             # (4G, HP)
    w_ih_d = jnp.pad(_pack_gate_rows(p["w_ih_d"]),
                     ((0, 0), (0, G - H))).astype(jnp.bfloat16)             # (4G, HP)
    w_hh_d = jnp.pad(_pack_gate_rows(p["w_hh_d"]),
                     ((0, 0), (0, G - H))).astype(jnp.bfloat16)             # (4G, HP)
    b_e = _pack_gate_vec(p["b_e"])                                          # (4G,)
    b_d = jnp.broadcast_to(_pack_gate_vec(p["b_d"])[:, None],
                           (4 * G, BP)).astype(jnp.float32)                 # (4G, BP)
    w_out = jnp.pad(p["w_out"].T, ((0, 0), (0, G - H)))                     # (D_OUT, HP)
    b_out = p["b_out"].reshape(D_OUT, 1)                                    # (D_OUT, 1)

    # ---- hoisted encoder input projection: ONE big matmul, bias folded, bf16 ----
    xp = jnp.pad(x, ((0, 0), (0, BP - B), (0, 0)))                          # (T, BP, D_IN)
    gx = (jnp.einsum('tbd,gd->tgb', xp, w_ih_e)
          + b_e[None, :, None]).astype(jnp.bfloat16)                        # (T, 4G, BP)

    # ---- feature-major states, zero-padded hidden rows / batch lanes ----
    h0_fm = jnp.pad(h0.T, ((0, G - H), (0, BP - B)))                        # (HP, BP)
    c0_fm = jnp.pad(c0.T, ((0, G - H), (0, BP - B)))                        # (HP, BP)

    const = lambda t: (0, 0)
    grid_spec = pltpu.PrefetchScalarGridSpec(
        num_scalar_prefetch=0,
        grid=(T // U,),
        in_specs=[
            pl.BlockSpec((U, 4 * G, BP), lambda t: (t, 0, 0)),   # gx: streamed
            pl.BlockSpec((HP, BP), const),                       # h0
            pl.BlockSpec((HP, BP), const),                       # c0
            pl.BlockSpec((4 * G, HP), const),                    # W_hh_e
            pl.BlockSpec((4 * G, HP), const),                    # W_ih_d
            pl.BlockSpec((4 * G, HP), const),                    # W_hh_d
            pl.BlockSpec((4 * G, BP), const),                    # b_d
            pl.BlockSpec((D_OUT, HP), const),                    # W_out
            pl.BlockSpec((D_OUT, 1), const),                     # b_out
        ],
        out_specs=[
            pl.BlockSpec((D_OUT, BP), const),
            pl.BlockSpec((HP, BP), const),
            pl.BlockSpec((HP, BP), const),
        ],
        scratch_shapes=[
            pltpu.VMEM((T, 4 * G, BP), jnp.bfloat16),   # precomputed decoder gates
            pltpu.VMEM((HP, BP), jnp.float32),          # carried h
            pltpu.VMEM((HP, BP), jnp.float32),          # carried c
        ],
    )

    out_k, hn_k, cn_k = pl.pallas_call(
        seq2seq_kernel,
        out_shape=(jax.ShapeDtypeStruct((D_OUT, BP), jnp.float32),
                   jax.ShapeDtypeStruct((HP, BP), jnp.float32),
                   jax.ShapeDtypeStruct((HP, BP), jnp.float32)),
        grid_spec=grid_spec,
        compiler_params=pltpu.CompilerParams(
            dimension_semantics=("arbitrary",),
            vmem_limit_bytes=32 * 1024 * 1024),
    )(gx, h0_fm, c0_fm, w_hh_e, w_ih_d, w_hh_d, b_d, w_out, b_out)

    out = out_k[:, :B].T                # (B, D_OUT)
    hn = hn_k[:H, :B].T                 # (B, H)
    cn = cn_k[:H, :B].T
    return out, (hn[None], cn[None])


# ---------------------------- parameters ----------------------------
def init_params(key):
    ks = jax.random.split(key, 10)
    k_lstm = 1.0 / (H ** 0.5)   # PyTorch LSTM default init bound
    k_lin = 1.0 / (H ** 0.5)    # PyTorch Linear default init bound (in_features = H)

    def u(k, shape, bound):
        return jax.random.uniform(k, shape, jnp.float32, -bound, bound)

    return {
        # encoder LSTM (42 -> 10), weights transposed vs PyTorch (4H, D)
        "w_ih_e": u(ks[0], (D_IN, 4 * H), k_lstm),
        "w_hh_e": u(ks[1], (H, 4 * H), k_lstm),
        "b_e":    u(ks[2], (1, 4 * H), k_lstm) + u(ks[3], (1, 4 * H), k_lstm),
        # decoder LSTM (10 -> 10)
        "w_ih_d": u(ks[4], (H, 4 * H), k_lstm),
        "w_hh_d": u(ks[5], (H, 4 * H), k_lstm),
        "b_d":    u(ks[6], (1, 4 * H), k_lstm) + u(ks[7], (1, 4 * H), k_lstm),
        # decoder Linear (10 -> 8)
        "w_out":  u(ks[8], (H, D_OUT), k_lin),
        "b_out":  u(ks[9], (1, D_OUT), k_lin),
    }


# ------------------------ pure-JAX reference ------------------------
def _lstm_ref(xs, h0, c0, w_ih, w_hh, b):
    def step(carry, x_t):
        h, c = carry
        gates = x_t @ w_ih + h @ w_hh + b
        i, f, g, o = jnp.split(gates, 4, axis=-1)
        c = jax.nn.sigmoid(f) * c + jax.nn.sigmoid(i) * jnp.tanh(g)
        h = jax.nn.sigmoid(o) * jnp.tanh(c)
        return (h, c), h
    (hn, cn), ys = lax.scan(step, (h0, c0), xs)
    return ys, hn, cn


def seq2seq_ref(x, hidden_in, p):
    h0, c0 = hidden_in
    x = x.reshape(T, B, -1)
    h0 = h0.reshape(B, H)
    c0 = c0.reshape(B, H)
    ys1, h1, c1 = _lstm_ref(x, h0, c0, p["w_ih_e"], p["w_hh_e"], p["b_e"])
    ys2, h2, c2 = _lstm_ref(ys1, h1, c1, p["w_ih_d"], p["w_hh_d"], p["b_d"])
    out = ys2[0] @ p["w_out"] + p["b_out"]
    return out, (h2[None], c2[None])


if __name__ == "__main__":
    key = jax.random.PRNGKey(0)
    kx, kh, kc, kp = jax.random.split(key, 4)

    x = jax.random.normal(kx, (T, B, D_IN), jnp.float32)          # views to (70, 400, 42)
    h0 = 0.1 * jax.random.normal(kh, (1, B, H), jnp.float32)
    c0 = 0.1 * jax.random.normal(kc, (1, B, H), jnp.float32)
    params = init_params(kp)

    fwd = jax.jit(seq2seq_forward)
    out, (hn, cn) = fwd(x, (h0, c0), params)
    jax.block_until_ready((out, hn, cn))

    out_r, (hn_r, cn_r) = seq2seq_ref(x, (h0, c0), params)
    assert out.shape == (B, D_OUT) and hn.shape == (1, B, H) and cn.shape == (1, B, H)
    assert jnp.allclose(out, out_r, atol=5e-2, rtol=5e-2)
    assert jnp.allclose(hn, hn_r, atol=5e-2, rtol=5e-2)
    assert jnp.allclose(cn, cn_r, atol=5e-2, rtol=5e-2)

    print("KERNEL_OK")
</pallas_src>

<mosaic_0001>
module attributes {stable_mosaic.version = 11 : i64} {
  func.func @seq2seq_kernel(%arg0: i32, %arg1: memref<14x64x512xbf16, #tpu.memory_space<vmem>>, %arg2: memref<16x512xf32, #tpu.memory_space<vmem>>, %arg3: memref<16x512xf32, #tpu.memory_space<vmem>>, %arg4: memref<64x16xbf16, #tpu.memory_space<vmem>>, %arg5: memref<64x16xbf16, #tpu.memory_space<vmem>>, %arg6: memref<64x16xbf16, #tpu.memory_space<vmem>>, %arg7: memref<64x512xf32, #tpu.memory_space<vmem>>, %arg8: memref<8x16xf32, #tpu.memory_space<vmem>>, %arg9: memref<8x1xf32, #tpu.memory_space<vmem>>, %arg10: memref<8x512xf32, #tpu.memory_space<vmem>>, %arg11: memref<16x512xf32, #tpu.memory_space<vmem>>, %arg12: memref<16x512xf32, #tpu.memory_space<vmem>>, %arg13: memref<70x64x512xbf16, #tpu.memory_space<vmem>>, %arg14: memref<16x512xf32, #tpu.memory_space<vmem>>, %arg15: memref<16x512xf32, #tpu.memory_space<vmem>>) attributes {dimension_semantics = [#tpu.dimension_semantics<arbitrary>], iteration_bounds = array<i64: 5>, scalar_prefetch = 0 : i64, scratch_operands = 3 : i64, tpu.core_type = #tpu.core_type<tc>, window_params = [{transform_indices = @transform_0, window_bounds = array<i64: 14, 64, 512>}, {pipeline_mode = #tpu.pipeline_mode<synchronous>, transform_indices = @transform_1, window_bounds = array<i64: 16, 512>}, {pipeline_mode = #tpu.pipeline_mode<synchronous>, transform_indices = @transform_2, window_bounds = array<i64: 16, 512>}, {pipeline_mode = #tpu.pipeline_mode<synchronous>, transform_indices = @transform_3, window_bounds = array<i64: 64, 16>}, {pipeline_mode = #tpu.pipeline_mode<synchronous>, transform_indices = @transform_4, window_bounds = array<i64: 64, 16>}, {pipeline_mode = #tpu.pipeline_mode<synchronous>, transform_indices = @transform_5, window_bounds = array<i64: 64, 16>}, {pipeline_mode = #tpu.pipeline_mode<synchronous>, transform_indices = @transform_6, window_bounds = array<i64: 64, 512>}, {pipeline_mode = #tpu.pipeline_mode<synchronous>, transform_indices = @transform_7, window_bounds = array<i64: 8, 16>}, {pipeline_mode = #tpu.pipeline_mode<synchronous>, transform_indices = @transform_8, window_bounds = array<i64: 8, 1>}, {pipeline_mode = #tpu.pipeline_mode<synchronous>, transform_indices = @transform_9, window_bounds = array<i64: 8, 512>}, {pipeline_mode = #tpu.pipeline_mode<synchronous>, transform_indices = @transform_10, window_bounds = array<i64: 16, 512>}, {pipeline_mode = #tpu.pipeline_mode<synchronous>, transform_indices = @transform_11, window_bounds = array<i64: 16, 512>}]} {
    %c0_i32 = arith.constant 0 : i32
    %0 = arith.cmpi eq, %arg0, %c0_i32 : i32
    %1 = arith.extui %0 : i1 to i32
    %c0_i32_0 = arith.constant 0 : i32
    %2 = arith.cmpi ne, %1, %c0_i32_0 : i32
    scf.if %2 {
      %c0_17 = arith.constant 0 : index
      %c0_18 = arith.constant 0 : index
      %15 = vector.load %arg2[%c0_17, %c0_18] : memref<16x512xf32, #tpu.memory_space<vmem>>, vector<16x512xf32>
      %c0_19 = arith.constant 0 : index
      %c0_20 = arith.constant 0 : index
      %16 = vector.load %arg14[%c0_19, %c0_20] : memref<16x512xf32, #tpu.memory_space<vmem>>, vector<16x512xf32>
      tpu.vector_store %arg14[%c0_19, %c0_20], %15 {strides = array<i32>} : memref<16x512xf32, #tpu.memory_space<vmem>>, vector<16x512xf32>,
      %c0_21 = arith.constant 0 : index
      %c0_22 = arith.constant 0 : index
      %17 = vector.load %arg3[%c0_21, %c0_22] : memref<16x512xf32, #tpu.memory_space<vmem>>, vector<16x512xf32>
      %c0_23 = arith.constant 0 : index
      %c0_24 = arith.constant 0 : index
      %18 = vector.load %arg15[%c0_23, %c0_24] : memref<16x512xf32, #tpu.memory_space<vmem>>, vector<16x512xf32>
      tpu.vector_store %arg15[%c0_23, %c0_24], %17 {strides = array<i32>} : memref<16x512xf32, #tpu.memory_space<vmem>>, vector<16x512xf32>,
    } else {
    }
    %c0 = arith.constant 0 : index
    %c0_1 = arith.constant 0 : index
    %3 = vector.load %arg4[%c0, %c0_1] : memref<64x16xbf16, #tpu.memory_space<vmem>>, vector<64x16xbf16>
    %c0_2 = arith.constant 0 : index
    %c0_3 = arith.constant 0 : index
    %4 = vector.load %arg5[%c0_2, %c0_3] : memref<64x16xbf16, #tpu.memory_space<vmem>>, vector<64x16xbf16>
    %c0_4 = arith.constant 0 : index
    %c0_5 = arith.constant 0 : index
    %5 = vector.load %arg7[%c0_4, %c0_5] : memref<64x512xf32, #tpu.memory_space<vmem>>, vector<64x512xf32>
    %c0_6 = arith.constant 0 : index
    %c0_7 = arith.constant 0 : index
    %6 = vector.load %arg14[%c0_6, %c0_7] : memref<16x512xf32, #tpu.memory_space<vmem>>, vector<16x512xf32>
    %c0_8 = arith.constant 0 : index
    %c0_9 = arith.constant 0 : index
    %7 = vector.load %arg15[%c0_8, %c0_9] : memref<16x512xf32, #tpu.memory_space<vmem>>, vector<16x512xf32>
    %c0_i32_10 = arith.constant 0 : i32
    %c7_i32 = arith.constant 7 : i32
    %8 = arith.addi %c0_i32_10, %c7_i32 : i32
    %c1_i32 = arith.constant 1 : i32
    %9:2 = scf.for %arg16 = %c0_i32_10 to %8 step %c1_i32 iter_args(%arg17 = %6, %arg18 = %7) -> (vector<16x512xf32>, vector<16x512xf32>)  : i32 {
      %c2_i32 = arith.constant 2 : i32
      %15 = arith.muli %c2_i32, %arg16 : i32
      %16 = arith.index_cast %15 : i32 to index
      %c0_17 = arith.constant 0 : index
      %c0_18 = arith.constant 0 : index
      %17 = vector.load %arg1[%16, %c0_17, %c0_18] : memref<14x64x512xbf16, #tpu.memory_space<vmem>>, vector<1x64x512xbf16>
      %18 = vector.shape_cast %17 : vector<1x64x512xbf16> to vector<64x512xbf16>
      %19 = arith.extf %18 : vector<64x512xbf16> to vector<64x512xf32>
      %20 = arith.truncf %arg17 : vector<16x512xf32> to vector<16x512xbf16>
      %cst = arith.constant dense<0.000000e+00> : vector<64x512xf32>
      %21 = tpu.matmul %3, %20, %cst {dimension_numbers = #tpu.dot_dimension_numbers<[1], [0], [0], [1], [0, 0, 1, 1], [], []>} : vector<64x16xbf16>, vector<16x512xbf16>, vector<64x512xf32> -> vector<64x512xf32>
      %22 = arith.addf %19, %21 : vector<64x512xf32>
      %23 = vector.extract_strided_slice %22 {offsets = [0, 0], sizes = [16, 512], strides = [1, 1]} : vector<64x512xf32> to vector<16x512xf32>
      %cst_19 = arith.constant 5.000000e-01 : f32
      %24 = vector.broadcast %cst_19 : f32 to vector<16x512xf32>
      %25 = arith.mulf %24, %23 : vector<16x512xf32>
      %26 = math.tanh %25 : vector<16x512xf32>
      %cst_20 = arith.constant 1.000000e+00 : f32
      %27 = vector.broadcast %cst_20 : f32 to vector<16x512xf32>
      %28 = arith.addf %26, %27 : vector<16x512xf32>
      %cst_21 = arith.constant 5.000000e-01 : f32
      %29 = vector.broadcast %cst_21 : f32 to vector<16x512xf32>
      %30 = arith.mulf %29, %28 : vector<16x512xf32>
      %31 = vector.extract_strided_slice %22 {offsets = [16, 0], sizes = [16, 512], strides = [1, 1]} : vector<64x512xf32> to vector<16x512xf32>
      %cst_22 = arith.constant 5.000000e-01 : f32
      %32 = vector.broadcast %cst_22 : f32 to vector<16x512xf32>
      %33 = arith.mulf %32, %31 : vector<16x512xf32>
      %34 = math.tanh %33 : vector<16x512xf32>
      %cst_23 = arith.constant 1.000000e+00 : f32
      %35 = vector.broadcast %cst_23 : f32 to vector<16x512xf32>
      %36 = arith.addf %34, %35 : vector<16x512xf32>
      %cst_24 = arith.constant 5.000000e-01 : f32
      %37 = vector.broadcast %cst_24 : f32 to vector<16x512xf32>
      %38 = arith.mulf %37, %36 : vector<16x512xf32>
      %39 = vector.extract_strided_slice %22 {offsets = [32, 0], sizes = [16, 512], strides = [1, 1]} : vector<64x512xf32> to vector<16x512xf32>
      %40 = math.tanh %39 : vector<16x512xf32>
      %41 = vector.extract_strided_slice %22 {offsets = [48, 0], sizes = [16, 512], strides = [1, 1]} : vector<64x512xf32> to vector<16x512xf32>
      %cst_25 = arith.constant 5.000000e-01 : f32
      %42 = vector.broadcast %cst_25 : f32 to vector<16x512xf32>
      %43 = arith.mulf %42, %41 : vector<16x512xf32>
      %44 = math.tanh %43 : vector<16x512xf32>
      %cst_26 = arith.constant 1.000000e+00 : f32
      %45 = vector.broadcast %cst_26 : f32 to vector<16x512xf32>
      %46 = arith.addf %44, %45 : vector<16x512xf32>
      %cst_27 = arith.constant 5.000000e-01 : f32
      %47 = vector.broadcast %cst_27 : f32 to vector<16x512xf32>
      %48 = arith.mulf %47, %46 : vector<16x512xf32>
      %49 = arith.mulf %38, %arg18 : vector<16x512xf32>
      %50 = arith.mulf %30, %40 : vector<16x512xf32>
      %51 = arith.addf %49, %50 : vector<16x512xf32>
      %52 = math.tanh %51 : vector<16x512xf32>
      %53 = arith.mulf %48, %52 : vector<16x512xf32>
      %54 = arith.truncf %53 : vector<16x512xf32> to vector<16x512xbf16>
      %cst_28 = arith.constant dense<0.000000e+00> : vector<64x512xf32>
      %55 = tpu.matmul %4, %54, %cst_28 {dimension_numbers = #tpu.dot_dimension_numbers<[1], [0], [0], [1], [0, 0, 1, 1], [], []>} : vector<64x16xbf16>, vector<16x512xbf16>, vector<64x512xf32> -> vector<64x512xf32>
      %56 = arith.addf %55, %5 : vector<64x512xf32>
      %57 = arith.truncf %56 : vector<64x512xf32> to vector<64x512xbf16>
      %c14_i32 = arith.constant 14 : i32
      %58 = arith.muli %arg0, %c14_i32 : i32
      %59 = arith.addi %58, %15 : i32
      %60 = arith.index_cast %59 : i32 to index
      %c0_29 = arith.constant 0 : index
      %c0_30 = arith.constant 0 : index
      %61 = vector.load %arg13[%60, %c0_29, %c0_30] : memref<70x64x512xbf16, #tpu.memory_space<vmem>>, vector<1x64x512xbf16>
      %62 = vector.shape_cast %61 : vector<1x64x512xbf16> to vector<64x512xbf16>
      %63 = vector.shape_cast %57 : vector<64x512xbf16> to vector<1x64x512xbf16>
      tpu.vector_store %arg13[%60, %c0_29, %c0_30], %63 {strides = array<i32>} : memref<70x64x512xbf16, #tpu.memory_space<vmem>>, vector<1x64x512xbf16>,
      %c2_i32_31 = arith.constant 2 : i32
      %64 = arith.muli %c2_i32_31, %arg16 : i32
      %c1_i32_32 = arith.constant 1 : i32
      %65 = arith.addi %64, %c1_i32_32 : i32
      %66 = arith.index_cast %65 : i32 to index
      %c0_33 = arith.constant 0 : index
      %c0_34 = arith.constant 0 : index
      %67 = vector.load %arg1[%66, %c0_33, %c0_34] : memref<14x64x512xbf16, #tpu.memory_space<vmem>>, vector<1x64x512xbf16>
      %68 = vector.shape_cast %67 : vector<1x64x512xbf16> to vector<64x512xbf16>
      %69 = arith.extf %68 : vector<64x512xbf16> to vector<64x512xf32>
      %70 = arith.truncf %53 : vector<16x512xf32> to vector<16x512xbf16>
      %cst_35 = arith.constant dense<0.000000e+00> : vector<64x512xf32>
      %71 = tpu.matmul %3, %70, %cst_35 {dimension_numbers = #tpu.dot_dimension_numbers<[1], [0], [0], [1], [0, 0, 1, 1], [], []>} : vector<64x16xbf16>, vector<16x512xbf16>, vector<64x512xf32> -> vector<64x512xf32>
      %72 = arith.addf %69, %71 : vector<64x512xf32>
      %73 = vector.extract_strided_slice %72 {offsets = [0, 0], sizes = [16, 512], strides = [1, 1]} : vector<64x512xf32> to vector<16x512xf32>
      %cst_36 = arith.constant 5.000000e-01 : f32
      %74 = vector.broadcast %cst_36 : f32 to vector<16x512xf32>
      %75 = arith.mulf %74, %73 : vector<16x512xf32>
      %76 = math.tanh %75 : vector<16x512xf32>
      %cst_37 = arith.constant 1.000000e+00 : f32
      %77 = vector.broadcast %cst_37 : f32 to vector<16x512xf32>
      %78 = arith.addf %76, %77 : vector<16x512xf32>
      %cst_38 = arith.constant 5.000000e-01 : f32
      %79 = vector.broadcast %cst_38 : f32 to vector<16x512xf32>
      %80 = arith.mulf %79, %78 : vector<16x512xf32>
      %81 = vector.extract_strided_slice %72 {offsets = [16, 0], sizes = [16, 512], strides = [1, 1]} : vector<64x512xf32> to vector<16x512xf32>
      %cst_39 = arith.constant 5.000000e-01 : f32
      %82 = vector.broadcast %cst_39 : f32 to vector<16x512xf32>
      %83 = arith.mulf %82, %81 : vector<16x512xf32>
      %84 = math.tanh %83 : vector<16x512xf32>
      %cst_40 = arith.constant 1.000000e+00 : f32
      %85 = vector.broadcast %cst_40 : f32 to vector<16x512xf32>
      %86 = arith.addf %84, %85 : vector<16x512xf32>
      %cst_41 = arith.constant 5.000000e-01 : f32
      %87 = vector.broadcast %cst_41 : f32 to vector<16x512xf32>
      %88 = arith.mulf %87, %86 : vector<16x512xf32>
      %89 = vector.extract_strided_slice %72 {offsets = [32, 0], sizes = [16, 512], strides = [1, 1]} : vector<64x512xf32> to vector<16x512xf32>
      %90 = math.tanh %89 : vector<16x512xf32>
      %91 = vector.extract_strided_slice %72 {offsets = [48, 0], sizes = [16, 512], strides = [1, 1]} : vector<64x512xf32> to vector<16x512xf32>
      %cst_42 = arith.constant 5.000000e-01 : f32
      %92 = vector.broadcast %cst_42 : f32 to vector<16x512xf32>
      %93 = arith.mulf %92, %91 : vector<16x512xf32>
      %94 = math.tanh %93 : vector<16x512xf32>
      %cst_43 = arith.constant 1.000000e+00 : f32
      %95 = vector.broadcast %cst_43 : f32 to vector<16x512xf32>
      %96 = arith.addf %94, %95 : vector<16x512xf32>
      %cst_44 = arith.constant 5.000000e-01 : f32
      %97 = vector.broadcast %cst_44 : f32 to vector<16x512xf32>
      %98 = arith.mulf %97, %96 : vector<16x512xf32>
      %99 = arith.mulf %88, %51 : vector<16x512xf32>
      %100 = arith.mulf %80, %90 : vector<16x512xf32>
      %101 = arith.addf %99, %100 : vector<16x512xf32>
      %102 = math.tanh %101 : vector<16x512xf32>
      %103 = arith.mulf %98, %102 : vector<16x512xf32>
      %104 = arith.truncf %103 : vector<16x512xf32> to vector<16x512xbf16>
      %cst_45 = arith.constant dense<0.000000e+00> : vector<64x512xf32>
      %105 = tpu.matmul %4, %104, %cst_45 {dimension_numbers = #tpu.dot_dimension_numbers<[1], [0], [0], [1], [0, 0, 1, 1], [], []>} : vector<64x16xbf16>, vector<16x512xbf16>, vector<64x512xf32> -> vector<64x512xf32>
      %106 = arith.addf %105, %5 : vector<64x512xf32>
      %107 = arith.truncf %106 : vector<64x512xf32> to vector<64x512xbf16>
      %c14_i32_46 = arith.constant 14 : i32
      %108 = arith.muli %arg0, %c14_i32_46 : i32
      %109 = arith.addi %108, %65 : i32
      %110 = arith.index_cast %109 : i32 to index
      %c0_47 = arith.constant 0 : index
      %c0_48 = arith.constant 0 : index
      %111 = vector.load %arg13[%110, %c0_47, %c0_48] : memref<70x64x512xbf16, #tpu.memory_space<vmem>>, vector<1x64x512xbf16>
      %112 = vector.shape_cast %111 : vector<1x64x512xbf16> to vector<64x512xbf16>
      %113 = vector.shape_cast %107 : vector<64x512xbf16> to vector<1x64x512xbf16>
      tpu.vector_store %arg13[%110, %c0_47, %c0_48], %113 {strides = array<i32>} : memref<70x64x512xbf16, #tpu.memory_space<vmem>>, vector<1x64x512xbf16>,
      scf.yield %103, %101 : vector<16x512xf32>, vector<16x512xf32>
    }
    %c7_i32_11 = arith.constant 7 : i32
    %c0_12 = arith.constant 0 : index
    %c0_13 = arith.constant 0 : index
    %10 = vector.load %arg14[%c0_12, %c0_13] : memref<16x512xf32, #tpu.memory_space<vmem>>, vector<16x512xf32>
    tpu.vector_store %arg14[%c0_12, %c0_13], %9#0 {strides = array<i32>} : memref<16x512xf32, #tpu.memory_space<vmem>>, vector<16x512xf32>,
    %c0_14 = arith.constant 0 : index
    %c0_15 = arith.constant 0 : index
    %11 = vector.load %arg15[%c0_14, %c0_15] : memref<16x512xf32, #tpu.memory_space<vmem>>, vector<16x512xf32>
    tpu.vector_store %arg15[%c0_14, %c0_15], %9#1 {strides = array<i32>} : memref<16x512xf32, #tpu.memory_space<vmem>>, vector<16x512xf32>,
    %c4_i32 = arith.constant 4 : i32
    %12 = arith.cmpi eq, %arg0, %c4_i32 : i32
    %13 = arith.extui %12 : i1 to i32
    %c0_i32_16 = arith.constant 0 : i32
    %14 = arith.cmpi ne, %13, %c0_i32_16 : i32
    scf.if %14 {
      %c0_17 = arith.constant 0 : index
      %c0_18 = arith.constant 0 : index
      %15 = vector.load %arg6[%c0_17, %c0_18] : memref<64x16xbf16, #tpu.memory_space<vmem>>, vector<64x16xbf16>
      %c0_19 = arith.constant 0 : index
      %c0_20 = arith.constant 0 : index
      %16 = vector.load %arg14[%c0_19, %c0_20] : memref<16x512xf32, #tpu.memory_space<vmem>>, vector<16x512xf32>
      %c0_21 = arith.constant 0 : index
      %c0_22 = arith.constant 0 : index
      %17 = vector.load %arg15[%c0_21, %c0_22] : memref<16x512xf32, #tpu.memory_space<vmem>>, vector<16x512xf32>
      %c0_23 = arith.constant 0 : index
      %c0_24 = arith.constant 0 : index
      %c0_25 = arith.constant 0 : index
      %18 = vector.load %arg13[%c0_23, %c0_24, %c0_25] : memref<70x64x512xbf16, #tpu.memory_space<vmem>>, vector<1x64x512xbf16>
      %19 = vector.shape_cast %18 : vector<1x64x512xbf16> to vector<64x512xbf16>
      %20 = arith.extf %19 : vector<64x512xbf16> to vector<64x512xf32>
      %21 = arith.truncf %16 : vector<16x512xf32> to vector<16x512xbf16>
      %cst = arith.constant dense<0.000000e+00> : vector<64x512xf32>
      %22 = tpu.matmul %15, %21, %cst {dimension_numbers = #tpu.dot_dimension_numbers<[1], [0], [0], [1], [0, 0, 1, 1], [], []>} : vector<64x16xbf16>, vector<16x512xbf16>, vector<64x512xf32> -> vector<64x512xf32>
      %23 = arith.addf %20, %22 : vector<64x512xf32>
      %24 = vector.extract_strided_slice %23 {offsets = [0, 0], sizes = [16, 512], strides = [1, 1]} : vector<64x512xf32> to vector<16x512xf32>
      %cst_26 = arith.constant 5.000000e-01 : f32
      %25 = vector.broadcast %cst_26 : f32 to vector<16x512xf32>
      %26 = arith.mulf %25, %24 : vector<16x512xf32>
      %27 = math.tanh %26 : vector<16x512xf32>
      %cst_27 = arith.constant 1.000000e+00 : f32
      %28 = vector.broadcast %cst_27 : f32 to vector<16x512xf32>
      %29 = arith.addf %27, %28 : vector<16x512xf32>
      %cst_28 = arith.constant 5.000000e-01 : f32
      %30 = vector.broadcast %cst_28 : f32 to vector<16x512xf32>
      %31 = arith.mulf %30, %29 : vector<16x512xf32>
      %32 = vector.extract_strided_slice %23 {offsets = [16, 0], sizes = [16, 512], strides = [1, 1]} : vector<64x512xf32> to vector<16x512xf32>
      %cst_29 = arith.constant 5.000000e-01 : f32
      %33 = vector.broadcast %cst_29 : f32 to vector<16x512xf32>
      %34 = arith.mulf %33, %32 : vector<16x512xf32>
      %35 = math.tanh %34 : vector<16x512xf32>
      %cst_30 = arith.constant 1.000000e+00 : f32
      %36 = vector.broadcast %cst_30 : f32 to vector<16x512xf32>
      %37 = arith.addf %35, %36 : vector<16x512xf32>
      %cst_31 = arith.constant 5.000000e-01 : f32
      %38 = vector.broadcast %cst_31 : f32 to vector<16x512xf32>
      %39 = arith.mulf %38, %37 : vector<16x512xf32>
      %40 = vector.extract_strided_slice %23 {offsets = [32, 0], sizes = [16, 512], strides = [1, 1]} : vector<64x512xf32> to vector<16x512xf32>
      %41 = math.tanh %40 : vector<16x512xf32>
      %42 = vector.extract_strided_slice %23 {offsets = [48, 0], sizes = [16, 512], strides = [1, 1]} : vector<64x512xf32> to vector<16x512xf32>
      %cst_32 = arith.constant 5.000000e-01 : f32
      %43 = vector.broadcast %cst_32 : f32 to vector<16x512xf32>
      %44 = arith.mulf %43, %42 : vector<16x512xf32>
      %45 = math.tanh %44 : vector<16x512xf32>
      %cst_33 = arith.constant 1.000000e+00 : f32
      %46 = vector.broadcast %cst_33 : f32 to vector<16x512xf32>
      %47 = arith.addf %45, %46 : vector<16x512xf32>
      %cst_34 = arith.constant 5.000000e-01 : f32
      %48 = vector.broadcast %cst_34 : f32 to vector<16x512xf32>
      %49 = arith.mulf %48, %47 : vector<16x512xf32>
      %50 = arith.mulf %39, %17 : vector<16x512xf32>
      %51 = arith.mulf %31, %41 : vector<16x512xf32>
      %52 = arith.addf %50, %51 : vector<16x512xf32>
      %53 = math.tanh %52 : vector<16x512xf32>
      %54 = arith.mulf %49, %53 : vector<16x512xf32>
      %c0_35 = arith.constant 0 : index
      %c0_36 = arith.constant 0 : index
      %55 = vector.load %arg8[%c0_35, %c0_36] : memref<8x16xf32, #tpu.memory_space<vmem>>, vector<8x16xf32>
      %cst_37 = arith.constant dense<0.000000e+00> : vector<8x512xf32>
      %56 = tpu.matmul %55, %54, %cst_37 {dimension_numbers = #tpu.dot_dimension_numbers<[1], [0], [0], [1], [0, 0, 1, 1], [], []>} : vector<8x16xf32>, vector<16x512xf32>, vector<8x512xf32> -> vector<8x512xf32>
      %c0_38 = arith.constant 0 : index
      %c0_39 = arith.constant 0 : index
      %57 = vector.load %arg9[%c0_38, %c0_39] : memref<8x1xf32, #tpu.memory_space<vmem>>, vector<8x1xf32>
      %58 = vector.broadcast %57 : vector<8x1xf32> to vector<8x512xf32>
      %59 = arith.addf %56, %58 : vector<8x512xf32>
      %c0_40 = arith.constant 0 : index
      %c0_41 = arith.constant 0 : index
      %60 = vector.load %arg10[%c0_40, %c0_41] : memref<8x512xf32, #tpu.memory_space<vmem>>, vector<8x512xf32>
      tpu.vector_store %arg10[%c0_40, %c0_41], %59 {strides = array<i32>} : memref<8x512xf32, #tpu.memory_space<vmem>>, vector<8x512xf32>,
      %c0_i32_42 = arith.constant 0 : i32
      %c34_i32 = arith.constant 34 : i32
      %61 = arith.addi %c0_i32_42, %c34_i32 : i32
      %c1_i32_43 = arith.constant 1 : i32
      %62:2 = scf.for %arg16 = %c0_i32_42 to %61 step %c1_i32_43 iter_args(%arg17 = %54, %arg18 = %52) -> (vector<16x512xf32>, vector<16x512xf32>)  : i32 {
        %c2_i32 = arith.constant 2 : i32
        %102 = arith.muli %c2_i32, %arg16 : i32
        %c1_i32_61 = arith.constant 1 : i32
        %103 = arith.addi %102, %c1_i32_61 : i32
        %104 = arith.index_cast %103 : i32 to index
        %c0_62 = arith.constant 0 : index
        %c0_63 = arith.constant 0 : index
        %105 = vector.load %arg13[%104, %c0_62, %c0_63] : memref<70x64x512xbf16, #tpu.memory_space<vmem>>, vector<1x64x512xbf16>
        %106 = vector.shape_cast %105 : vector<1x64x512xbf16> to vector<64x512xbf16>
        %107 = arith.extf %106 : vector<64x512xbf16> to vector<64x512xf32>
        %108 = arith.truncf %arg17 : vector<16x512xf32> to vector<16x512xbf16>
        %cst_64 = arith.constant dense<0.000000e+00> : vector<64x512xf32>
        %109 = tpu.matmul %15, %108, %cst_64 {dimension_numbers = #tpu.dot_dimension_numbers<[1], [0], [0], [1], [0, 0, 1, 1], [], []>} : vector<64x16xbf16>, vector<16x512xbf16>, vector<64x512xf32> -> vector<64x512xf32>
        %110 = arith.addf %107, %109 : vector<64x512xf32>
        %111 = vector.extract_strided_slice %110 {offsets = [0, 0], sizes = [16, 512], strides = [1, 1]} : vector<64x512xf32> to vector<16x512xf32>
        %cst_65 = arith.constant 5.000000e-01 : f32
        %112 = vector.broadcast %cst_65 : f32 to vector<16x512xf32>
        %113 = arith.mulf %112, %111 : vector<16x512xf32>
        %114 = math.tanh %113 : vector<16x512xf32>
        %cst_66 = arith.constant 1.000000e+00 : f32
        %115 = vector.broadcast %cst_66 : f32 to vector<16x512xf32>
        %116 = arith.addf %114, %115 : vector<16x512xf32>
        %cst_67 = arith.constant 5.000000e-01 : f32
        %117 = vector.broadcast %cst_67 : f32 to vector<16x512xf32>
        %118 = arith.mulf %117, %116 : vector<16x512xf32>
        %119 = vector.extract_strided_slice %110 {offsets = [16, 0], sizes = [16, 512], strides = [1, 1]} : vector<64x512xf32> to vector<16x512xf32>
        %cst_68 = arith.constant 5.000000e-01 : f32
        %120 = vector.broadcast %cst_68 : f32 to vector<16x512xf32>
        %121 = arith.mulf %120, %119 : vector<16x512xf32>
        %122 = math.tanh %121 : vector<16x512xf32>
        %cst_69 = arith.constant 1.000000e+00 : f32
        %123 = vector.broadcast %cst_69 : f32 to vector<16x512xf32>
        %124 = arith.addf %122, %123 : vector<16x512xf32>
        %cst_70 = arith.constant 5.000000e-01 : f32
        %125 = vector.broadcast %cst_70 : f32 to vector<16x512xf32>
        %126 = arith.mulf %125, %124 : vector<16x512xf32>
        %127 = vector.extract_strided_slice %110 {offsets = [32, 0], sizes = [16, 512], strides = [1, 1]} : vector<64x512xf32> to vector<16x512xf32>
        %128 = math.tanh %127 : vector<16x512xf32>
        %129 = vector.extract_strided_slice %110 {offsets = [48, 0], sizes = [16, 512], strides = [1, 1]} : vector<64x512xf32> to vector<16x512xf32>
        %cst_71 = arith.constant 5.000000e-01 : f32
        %130 = vector.broadcast %cst_71 : f32 to vector<16x512xf32>
        %131 = arith.mulf %130, %129 : vector<16x512xf32>
        %132 = math.tanh %131 : vector<16x512xf32>
        %cst_72 = arith.constant 1.000000e+00 : f32
        %133 = vector.broadcast %cst_72 : f32 to vector<16x512xf32>
        %134 = arith.addf %132, %133 : vector<16x512xf32>
        %cst_73 = arith.constant 5.000000e-01 : f32
        %135 = vector.broadcast %cst_73 : f32 to vector<16x512xf32>
        %136 = arith.mulf %135, %134 : vector<16x512xf32>
        %137 = arith.mulf %126, %arg18 : vector<16x512xf32>
        %138 = arith.mulf %118, %128 : vector<16x512xf32>
        %139 = arith.addf %137, %138 : vector<16x512xf32>
        %140 = math.tanh %139 : vector<16x512xf32>
        %141 = arith.mulf %136, %140 : vector<16x512xf32>
        %c2_i32_74 = arith.constant 2 : i32
        %142 = arith.muli %c2_i32_74, %arg16 : i32
        %c2_i32_75 = arith.constant 2 : i32
        %143 = arith.addi %142, %c2_i32_75 : i32
        %144 = arith.index_cast %143 : i32 to index
        %c0_76 = arith.constant 0 : index
        %c0_77 = arith.constant 0 : index
        %145 = vector.load %arg13[%144, %c0_76, %c0_77] : memref<70x64x512xbf16, #tpu.memory_space<vmem>>, vector<1x64x512xbf16>
        %146 = vector.shape_cast %145 : vector<1x64x512xbf16> to vector<64x512xbf16>
        %147 = arith.extf %146 : vector<64x512xbf16> to vector<64x512xf32>
        %148 = arith.truncf %141 : vector<16x512xf32> to vector<16x512xbf16>
        %cst_78 = arith.constant dense<0.000000e+00> : vector<64x512xf32>
        %149 = tpu.matmul %15, %148, %cst_78 {dimension_numbers = #tpu.dot_dimension_numbers<[1], [0], [0], [1], [0, 0, 1, 1], [], []>} : vector<64x16xbf16>, vector<16x512xbf16>, vector<64x512xf32> -> vector<64x512xf32>
        %150 = arith.addf %147, %149 : vector<64x512xf32>
        %151 = vector.extract_strided_slice %150 {offsets = [0, 0], sizes = [16, 512], strides = [1, 1]} : vector<64x512xf32> to vector<16x512xf32>
        %cst_79 = arith.constant 5.000000e-01 : f32
        %152 = vector.broadcast %cst_79 : f32 to vector<16x512xf32>
        %153 = arith.mulf %152, %151 : vector<16x512xf32>
        %154 = math.tanh %153 : vector<16x512xf32>
        %cst_80 = arith.constant 1.000000e+00 : f32
        %155 = vector.broadcast %cst_80 : f32 to vector<16x512xf32>
        %156 = arith.addf %154, %155 : vector<16x512xf32>
        %cst_81 = arith.constant 5.000000e-01 : f32
        %157 = vector.broadcast %cst_81 : f32 to vector<16x512xf32>
        %158 = arith.mulf %157, %156 : vector<16x512xf32>
        %159 = vector.extract_strided_slice %150 {offsets = [16, 0], sizes = [16, 512], strides = [1, 1]} : vector<64x512xf32> to vector<16x512xf32>
        %cst_82 = arith.constant 5.000000e-01 : f32
        %160 = vector.broadcast %cst_82 : f32 to vector<16x512xf32>
        %161 = arith.mulf %160, %159 : vector<16x512xf32>
        %162 = math.tanh %161 : vector<16x512xf32>
        %cst_83 = arith.constant 1.000000e+00 : f32
        %163 = vector.broadcast %cst_83 : f32 to vector<16x512xf32>
        %164 = arith.addf %162, %163 : vector<16x512xf32>
        %cst_84 = arith.constant 5.000000e-01 : f32
        %165 = vector.broadcast %cst_84 : f32 to vector<16x512xf32>
        %166 = arith.mulf %165, %164 : vector<16x512xf32>
        %167 = vector.extract_strided_slice %150 {offsets = [32, 0], sizes = [16, 512], strides = [1, 1]} : vector<64x512xf32> to vector<16x512xf32>
        %168 = math.tanh %167 : vector<16x512xf32>
        %169 = vector.extract_strided_slice %150 {offsets = [48, 0], sizes = [16, 512], strides = [1, 1]} : vector<64x512xf32> to vector<16x512xf32>
        %cst_85 = arith.constant 5.000000e-01 : f32
        %170 = vector.broadcast %cst_85 : f32 to vector<16x512xf32>
        %171 = arith.mulf %170, %169 : vector<16x512xf32>
        %172 = math.tanh %171 : vector<16x512xf32>
        %cst_86 = arith.constant 1.000000e+00 : f32
        %173 = vector.broadcast %cst_86 : f32 to vector<16x512xf32>
        %174 = arith.addf %172, %173 : vector<16x512xf32>
        %cst_87 = arith.constant 5.000000e-01 : f32
        %175 = vector.broadcast %cst_87 : f32 to vector<16x512xf32>
        %176 = arith.mulf %175, %174 : vector<16x512xf32>
        %177 = arith.mulf %166, %139 : vector<16x512xf32>
        %178 = arith.mulf %158, %168 : vector<16x512xf32>
        %179 = arith.addf %177, %178 : vector<16x512xf32>
        %180 = math.tanh %179 : vector<16x512xf32>
        %181 = arith.mulf %176, %180 : vector<16x512xf32>
        scf.yield %181, %179 : vector<16x512xf32>, vector<16x512xf32>
      }
      %c34_i32_44 = arith.constant 34 : i32
      %c69 = arith.constant 69 : index
      %c0_45 = arith.constant 0 : index
      %c0_46 = arith.constant 0 : index
      %63 = vector.load %arg13[%c69, %c0_45, %c0_46] : memref<70x64x512xbf16, #tpu.memory_space<vmem>>, vector<1x64x512xbf16>
      %64 = vector.shape_cast %63 : vector<1x64x512xbf16> to vector<64x512xbf16>
      %65 = arith.extf %64 : vector<64x512xbf16> to vector<64x512xf32>
      %66 = arith.truncf %62#0 : vector<16x512xf32> to vector<16x512xbf16>
      %cst_47 = arith.constant dense<0.000000e+00> : vector<64x512xf32>
      %67 = tpu.matmul %15, %66, %cst_47 {dimension_numbers = #tpu.dot_dimension_numbers<[1], [0], [0], [1], [0, 0, 1, 1], [], []>} : vector<64x16xbf16>, vector<16x512xbf16>, vector<64x512xf32> -> vector<64x512xf32>
      %68 = arith.addf %65, %67 : vector<64x512xf32>
      %69 = vector.extract_strided_slice %68 {offsets = [0, 0], sizes = [16, 512], strides = [1, 1]} : vector<64x512xf32> to vector<16x512xf32>
      %cst_48 = arith.constant 5.000000e-01 : f32
      %70 = vector.broadcast %cst_48 : f32 to vector<16x512xf32>
      %71 = arith.mulf %70, %69 : vector<16x512xf32>
      %72 = math.tanh %71 : vector<16x512xf32>
      %cst_49 = arith.constant 1.000000e+00 : f32
      %73 = vector.broadcast %cst_49 : f32 to vector<16x512xf32>
      %74 = arith.addf %72, %73 : vector<16x512xf32>
      %cst_50 = arith.constant 5.000000e-01 : f32
      %75 = vector.broadcast %cst_50 : f32 to vector<16x512xf32>
      %76 = arith.mulf %75, %74 : vector<16x512xf32>
      %77 = vector.extract_strided_slice %68 {offsets = [16, 0], sizes = [16, 512], strides = [1, 1]} : vector<64x512xf32> to vector<16x512xf32>
      %cst_51 = arith.constant 5.000000e-01 : f32
      %78 = vector.broadcast %cst_51 : f32 to vector<16x512xf32>
      %79 = arith.mulf %78, %77 : vector<16x512xf32>
      %80 = math.tanh %79 : vector<16x512xf32>
      %cst_52 = arith.constant 1.000000e+00 : f32
      %81 = vector.broadcast %cst_52 : f32 to vector<16x512xf32>
      %82 = arith.addf %80, %81 : vector<16x512xf32>
      %cst_53 = arith.constant 5.000000e-01 : f32
      %83 = vector.broadcast %cst_53 : f32 to vector<16x512xf32>
      %84 = arith.mulf %83, %82 : vector<16x512xf32>
      %85 = vector.extract_strided_slice %68 {offsets = [32, 0], sizes = [16, 512], strides = [1, 1]} : vector<64x512xf32> to vector<16x512xf32>
      %86 = math.tanh %85 : vector<16x512xf32>
      %87 = vector.extract_strided_slice %68 {offsets = [48, 0], sizes = [16, 512], strides = [1, 1]} : vector<64x512xf32> to vector<16x512xf32>
      %cst_54 = arith.constant 5.000000e-01 : f32
      %88 = vector.broadcast %cst_54 : f32 to vector<16x512xf32>
      %89 = arith.mulf %88, %87 : vector<16x512xf32>
      %90 = math.tanh %89 : vector<16x512xf32>
      %cst_55 = arith.constant 1.000000e+00 : f32
      %91 = vector.broadcast %cst_55 : f32 to vector<16x512xf32>
      %92 = arith.addf %90, %91 : vector<16x512xf32>
      %cst_56 = arith.constant 5.000000e-01 : f32
      %93 = vector.broadcast %cst_56 : f32 to vector<16x512xf32>
      %94 = arith.mulf %93, %92 : vector<16x512xf32>
      %95 = arith.mulf %84, %62#1 : vector<16x512xf32>
      %96 = arith.mulf %76, %86 : vector<16x512xf32>
      %97 = arith.addf %95, %96 : vector<16x512xf32>
      %98 = math.tanh %97 : vector<16x512xf32>
      %99 = arith.mulf %94, %98 : vector<16x512xf32>
      %c0_57 = arith.constant 0 : index
      %c0_58 = arith.constant 0 : index
      %100 = vector.load %arg11[%c0_57, %c0_58] : memref<16x512xf32, #tpu.memory_space<vmem>>, vector<16x512xf32>
      tpu.vector_store %arg11[%c0_57, %c0_58], %99 {strides = array<i32>} : memref<16x512xf32, #tpu.memory_space<vmem>>, vector<16x512xf32>,
      %c0_59 = arith.constant 0 : index
      %c0_60 = arith.constant 0 : index
      %101 = vector.load %arg12[%c0_59, %c0_60] : memref<16x512xf32, #tpu.memory_space<vmem>>, vector<16x512xf32>
      tpu.vector_store %arg12[%c0_59, %c0_60], %97 {strides = array<i32>} : memref<16x512xf32, #tpu.memory_space<vmem>>, vector<16x512xf32>,
    } else {
    }
    return
  }
  func.func @transform_0(%arg0: i32) -> (i32, i32, i32) {
    %c0_i32 = arith.constant 0 : i32
    %c0_i32_0 = arith.constant 0 : i32
    %c0_i32_1 = arith.constant 0 : i32
    return %arg0, %c0_i32, %c0_i32_0 : i32, i32, i32
  }
  func.func @transform_1(%arg0: i32) -> (i32, i32) {
    %c0_i32 = arith.constant 0 : i32
    %c0_i32_0 = arith.constant 0 : i32
    %c0_i32_1 = arith.constant 0 : i32
    return %c0_i32, %c0_i32_0 : i32, i32
  }
  func.func @transform_2(%arg0: i32) -> (i32, i32) {
    %c0_i32 = arith.constant 0 : i32
    %c0_i32_0 = arith.constant 0 : i32
    %c0_i32_1 = arith.constant 0 : i32
    return %c0_i32, %c0_i32_0 : i32, i32
  }
  func.func @transform_3(%arg0: i32) -> (i32, i32) {
    %c0_i32 = arith.constant 0 : i32
    %c0_i32_0 = arith.constant 0 : i32
    %c0_i32_1 = arith.constant 0 : i32
    return %c0_i32, %c0_i32_0 : i32, i32
  }
  func.func @transform_4(%arg0: i32) -> (i32, i32) {
    %c0_i32 = arith.constant 0 : i32
    %c0_i32_0 = arith.constant 0 : i32
    %c0_i32_1 = arith.constant 0 : i32
    return %c0_i32, %c0_i32_0 : i32, i32
  }
  func.func @transform_5(%arg0: i32) -> (i32, i32) {
    %c0_i32 = arith.constant 0 : i32
    %c0_i32_0 = arith.constant 0 : i32
    %c0_i32_1 = arith.constant 0 : i32
    return %c0_i32, %c0_i32_0 : i32, i32
  }
  func.func @transform_6(%arg0: i32) -> (i32, i32) {
    %c0_i32 = arith.constant 0 : i32
    %c0_i32_0 = arith.constant 0 : i32
    %c0_i32_1 = arith.constant 0 : i32
    return %c0_i32, %c0_i32_0 : i32, i32
  }
  func.func @transform_7(%arg0: i32) -> (i32, i32) {
    %c0_i32 = arith.constant 0 : i32
    %c0_i32_0 = arith.constant 0 : i32
    %c0_i32_1 = arith.constant 0 : i32
    return %c0_i32, %c0_i32_0 : i32, i32
  }
  func.func @transform_8(%arg0: i32) -> (i32, i32) {
    %c0_i32 = arith.constant 0 : i32
    %c0_i32_0 = arith.constant 0 : i32
    %c0_i32_1 = arith.constant 0 : i32
    return %c0_i32, %c0_i32_0 : i32, i32
  }
  func.func @transform_9(%arg0: i32) -> (i32, i32) {
    %c0_i32 = arith.constant 0 : i32
    %c0_i32_0 = arith.constant 0 : i32
    %c0_i32_1 = arith.constant 0 : i32
    return %c0_i32, %c0_i32_0 : i32, i32
  }
  func.func @transform_10(%arg0: i32) -> (i32, i32) {
    %c0_i32 = arith.constant 0 : i32
    %c0_i32_0 = arith.constant 0 : i32
    %c0_i32_1 = arith.constant 0 : i32
    return %c0_i32, %c0_i32_0 : i32, i32
  }
  func.func @transform_11(%arg0: i32) -> (i32, i32) {
    %c0_i32 = arith.constant 0 : i32
    %c0_i32_0 = arith.constant 0 : i32
    %c0_i32_1 = arith.constant 0 : i32
    return %c0_i32, %c0_i32_0 : i32, i32
  }
}

</mosaic_0001>

<bundles_post_ra>
// kernel: seq2seq_forward.1
= control target key start
LH: loop header
LB: loop body
LE: loop exit
PB: predicated region body
PF: predicated region fallthrough
CT: control target
= control target key end

     0   :  { %s4926_s17 = smov 0   ;;  %s6810_s0 = inlined_call_operand.vmem [shape: bf16[70,64,512], index: 0, kind: input, shape index: {}]   ;;  %s6811_s1 = inlined_call_operand.vmem [shape: f32[16,512], index: 1, kind: input, shape index: {}]   ;;  %s6812_s2 = inlined_call_operand.vmem [shape: f32[16,512], index: 2, kind: input, shape index: {}]   ;;  %s6813_s3 = inlined_call_operand.vmem [shape: bf16[64,16], index: 3, kind: input, shape index: {}]   ;;  %s6814_s4 = inlined_call_operand.vmem [shape: bf16[64,16], index: 4, kind: input, shape index: {}]   ;;  %s6815_s5 = inlined_call_operand.vmem [shape: bf16[64,16], index: 5, kind: input, shape index: {}]   ;;  %s6816_s6 = inlined_call_operand.vmem [shape: f32[64,512], index: 6, kind: input, shape index: {}]   ;;  %s6817_s7 = inlined_call_operand.vmem [shape: f32[8,16], index: 7, kind: input, shape index: {}]   ;;  %s6818_s8 = inlined_call_operand.vmem [shape: f32[8,1], index: 8, kind: input, shape index: {}]   ;;  %s6819_s9 = inlined_call_operand.vmem [shape: f32[8,512], index: 9, kind: output, shape index: {0}]   ;;  %s6820_s10 = inlined_call_operand.vmem [shape: f32[16,512], index: 10, kind: output, shape index: {1}]   ;;  %s6821_s11 = inlined_call_operand.vmem [shape: f32[16,512], index: 11, kind: output, shape index: {2}]  }
   0x1 LB: > { %s4932_s18 = sadd.s32 4294967295, %s4724_s17   ;;  %p3636_p0 = scmp.ge.s32.totalorder %s4724_s17, 1  ;;  %s4724_s17 = sphi %s4926_s17, %s22_s17  }
   0x2   : > { %p329_p1 = scmp.lt.s32.totalorder %s4724_s17, 6 }
   0x4   : > { %p330_p2 = pnand %p3636_p0, %p329_p1 }
   0x6   : > { %333 = sbr.rel (%p330_p2) target bundleno = 2260 (0x8d4), region = 56 }
   0xd   : > { %s4937_s19 = smul.u32 14, %s4932_s18  ;;  %p3639_p4 = scmp.ne.s32.totalorder %s4932_s18, 0 }
   0xe   : > { %v377_v0 = vld [vmem:[%s6811_s1] sm:$0xff] (!%p3639_p4)  ;;  %v378_v1 = vld [vmem:[%s6811_s1 + $0x8] sm:$0xff] (!%p3639_p4)  ;;  %v379_v2 = vld [vmem:[%s6811_s1 + $0x10] sm:$0xff] (!%p3639_p4) }
   0xf   : > { %p366_p3 = scmp.lt.s32.totalorder %s4937_s19, 69  ;;  %376 = sbr.rel (%p3639_p4) target bundleno = 24 (0x18), region = 60  ;;  %385 = vst [vmem:[#allocation3] sm:$0xff] (!%p3639_p4), %v377_v0  ;;  %386 = vst [vmem:[#allocation3 + $0x8] sm:$0xff] (!%p3639_p4), %v378_v1  ;;  %v380_v3 = vld [vmem:[%s6811_s1 + $0x18] sm:$0xff] (!%p3639_p4)  ;;  %v381_v4 = vld [vmem:[%s6811_s1 + $0x20] sm:$0xff] (!%p3639_p4) }
  0x10   : > { %387 = vst [vmem:[#allocation3 + $0x10] sm:$0xff] (!%p3639_p4), %v379_v2  ;;  %v382_v5 = vld [vmem:[%s6811_s1 + $0x28] sm:$0xff] (!%p3639_p4)  ;;  %388 = vst [vmem:[#allocation3 + $0x18] sm:$0xff] (!%p3639_p4), %v380_v3  ;;  %v383_v6 = vld [vmem:[%s6811_s1 + $0x30] sm:$0xff] (!%p3639_p4) }
  0x11   : > { %s367_s20 = scalar_select %p366_p3, %s4937_s19, 69 }
  0x12   : > { %389 = vst [vmem:[#allocation3 + $0x20] sm:$0xff] (!%p3639_p4), %v381_v4  ;;  %390 = vst [vmem:[#allocation3 + $0x28] sm:$0xff] (!%p3639_p4), %v382_v5  ;;  %v384_v7 = vld [vmem:[%s6811_s1 + $0x38] sm:$0xff] (!%p3639_p4)  ;;  %v393_v8 = vld [vmem:[%s6812_s2] sm:$0xff] (!%p3639_p4) }
  0x13   : > { %s3798_s21 = sshll.u32 %s367_s20, 7  ;;  %391 = vst [vmem:[#allocation3 + $0x30] sm:$0xff] (!%p3639_p4), %v383_v6  ;;  %392 = vst [vmem:[#allocation3 + $0x38] sm:$0xff] (!%p3639_p4), %v384_v7  ;;  %v394_v9 = vld [vmem:[%s6812_s2 + $0x8] sm:$0xff] (!%p3639_p4)  ;;  %v395_v10 = vld [vmem:[%s6812_s2 + $0x10] sm:$0xff] (!%p3639_p4) }
  0x14   : > { %s4944_s24 = scalar_lea.vmem %s6810_s0, %s3798_s21  ;;  %401 = vst [vmem:[#allocation4] sm:$0xff] (!%p3639_p4), %v393_v8  ;;  %v396_v11 = vld [vmem:[%s6812_s2 + $0x18] sm:$0xff] (!%p3639_p4)  ;;  %402 = vst [vmem:[#allocation4 + $0x8] sm:$0xff] (!%p3639_p4), %v394_v9  ;;  %v397_v12 = vld [vmem:[%s6812_s2 + $0x20] sm:$0xff] (!%p3639_p4) }
  0x15   : > { %403 = vst [vmem:[#allocation4 + $0x10] sm:$0xff] (!%p3639_p4), %v395_v10  ;;  %404 = vst [vmem:[#allocation4 + $0x18] sm:$0xff] (!%p3639_p4), %v396_v11  ;;  %v398_v13 = vld [vmem:[%s6812_s2 + $0x28] sm:$0xff] (!%p3639_p4)  ;;  %v399_v14 = vld [vmem:[%s6812_s2 + $0x30] sm:$0xff] (!%p3639_p4) }
  0x16   : > { %405 = vst [vmem:[#allocation4 + $0x20] sm:$0xff] %v397_v12  ;;  %406 = vst [vmem:[#allocation4 + $0x28] sm:$0xff] %v398_v13  ;;  %v400_v15 = vld [vmem:[%s6812_s2 + $0x38] sm:$0xff] }
  0x17   : > { %407 = vst [vmem:[#allocation4 + $0x30] sm:$0xff] %v399_v14  ;;  %408 = vst [vmem:[#allocation4 + $0x38] sm:$0xff] %v400_v15 }
  0x18 PF: > { %v4998_v16 = vld [vmem:[%s6813_s3] sm:$0xf]  ;;  %v5003_v17 = vld [vmem:[%s6813_s3 + $0x4] sm:$0xf]  ;;  %v5008_v18 = vld [vmem:[%s6813_s3 + $0x8] sm:$0xf] }
  0x19   : > { %6855 = vst [vmem:[#allocation5_spill] sm:$0xff] %v4998_v16  ;;  %6856 = vst [vmem:[#allocation6_spill] sm:$0xff] %v5003_v17  ;;  %v5013_v19 = vld [vmem:[%s6813_s3 + $0xc] sm:$0xf]  ;;  %v5018_v20 = vld [vmem:[%s6813_s3 + $0x10] sm:$0xf] }
  0x1a   : > { %6857 = vst [vmem:[#allocation7_spill] sm:$0xff] %v5008_v18  ;;  %6858 = vst [vmem:[#allocation8_spill] sm:$0xff] %v5013_v19  ;;  %v5023_v21 = vld [vmem:[%s6813_s3 + $0x14] sm:$0xf]  ;;  %v5028_v22 = vld [vmem:[%s6813_s3 + $0x18] sm:$0xf] }
  0x1b   : > { %6859 = vst [vmem:[#allocation9_spill] sm:$0xff] %v5018_v20  ;;  %6860 = vst [vmem:[#allocation10_spill] sm:$0xff] %v5023_v21  ;;  %v5033_v23 = vld [vmem:[%s6813_s3 + $0x1c] sm:$0xf]  ;;  %v5038_v24 = vld [vmem:[%s6814_s4] sm:$0xf] }
  0x1c   : > { %6861 = vst [vmem:[#allocation11_spill] sm:$0xff] %v5028_v22  ;;  %6862 = vst [vmem:[#allocation12_spill] sm:$0xff] %v5033_v23  ;;  %v5043_v25 = vld [vmem:[%s6814_s4 + $0x4] sm:$0xf]  ;;  %v5048_v26 = vld [vmem:[%s6814_s4 + $0x8] sm:$0xf] }
  0x1d   : > { %6863 = vst [vmem:[#allocation13_spill] sm:$0xff] %v5038_v24  ;;  %6864 = vst [vmem:[#allocation14_spill] sm:$0xff] %v5043_v25  ;;  %v5053_v27 = vld [vmem:[%s6814_s4 + $0xc] sm:$0xf]  ;;  %v5058_v28 = vld [vmem:[%s6814_s4 + $0x10] sm:$0xf] }
  0x1e   : > { %6865 = vst [vmem:[#allocation15_spill] sm:$0xff] %v5048_v26  ;;  %6866 = vst [vmem:[#allocation16_spill] sm:$0xff] %v5053_v27  ;;  %v5063_v29 = vld [vmem:[%s6814_s4 + $0x14] sm:$0xf]  ;;  %v5068_v30 = vld [vmem:[%s6814_s4 + $0x18] sm:$0xf] }
  0x1f   : > { %6867 = vst [vmem:[#allocation17_spill] sm:$0xff] %v5058_v28  ;;  %6868 = vst [vmem:[#allocation18_spill] sm:$0xff] %v5063_v29  ;;  %v5073_v31 = vld [vmem:[%s6814_s4 + $0x1c] sm:$0xf]  ;;  %v5078_v32 = vld [vmem:[%s6816_s6] sm:$0xff]  ;;  %s5267_s14 = smov 0  }
  0x20   : > { %6869 = vst [vmem:[#allocation19_spill] sm:$0xff] %v5068_v30  ;;  %6870 = vst [vmem:[#allocation20_spill] sm:$0xff] %v5073_v31  ;;  %v5083_v33 = vld [vmem:[%s6816_s6 + $0x8] sm:$0xff]  ;;  %v5088_v34 = vld [vmem:[%s6816_s6 + $0x10] sm:$0xff] }
  0x21   : > { %6871 = vst [vmem:[#allocation21_spill] sm:$0xff] %v5083_v33  ;;  %6872 = vst [vmem:[#allocation22_spill] sm:$0xff] %v5088_v34  ;;  %v5093_v35 = vld [vmem:[%s6816_s6 + $0x18] sm:$0xff]  ;;  %v5098_v36 = vld [vmem:[%s6816_s6 + $0x20] sm:$0xff] }
  0x22   : > { %6873 = vst [vmem:[#allocation23_spill] sm:$0xff] %v5093_v35  ;;  %6874 = vst [vmem:[#allocation24_spill] sm:$0xff] %v5098_v36  ;;  %v5103_v37 = vld [vmem:[%s6816_s6 + $0x28] sm:$0xff]  ;;  %v5108_v38 = vld [vmem:[%s6816_s6 + $0x30] sm:$0xff] }
  0x23   : > { %6875 = vst [vmem:[#allocation25_spill] sm:$0xff] %v5103_v37  ;;  %6876 = vst [vmem:[#allocation26_spill] sm:$0xff] %v5108_v38  ;;  %v5113_v39 = vld [vmem:[%s6816_s6 + $0x38] sm:$0xff]  ;;  %v5118_v40 = vld [vmem:[%s6816_s6 + $0x40] sm:$0xff] }
  0x24   : > { %6877 = vst [vmem:[#allocation27_spill] sm:$0xff] %v5113_v39  ;;  %6878 = vst [vmem:[#allocation28_spill] sm:$0xff] %v5118_v40  ;;  %v5123_v41 = vld [vmem:[%s6816_s6 + $0x48] sm:$0xff]  ;;  %v5128_v42 = vld [vmem:[%s6816_s6 + $0x50] sm:$0xff] }
  0x25   : > { %6879 = vst [vmem:[#allocation29_spill] sm:$0xff] %v5123_v41  ;;  %6880 = vst [vmem:[#allocation30_spill] sm:$0xff] %v5128_v42  ;;  %v5133_v43 = vld [vmem:[%s6816_s6 + $0x58] sm:$0xff]  ;;  %v5138_v44 = vld [vmem:[%s6816_s6 + $0x60] sm:$0xff] }
  0x26   : > { %6881 = vst [vmem:[#allocation31_spill] sm:$0xff] %v5133_v43  ;;  %6882 = vst [vmem:[#allocation32_spill] sm:$0xff] %v5138_v44  ;;  %v5143_v45 = vld [vmem:[%s6816_s6 + $0x68] sm:$0xff]  ;;  %v5148_v46 = vld [vmem:[%s6816_s6 + $0x70] sm:$0xff] }
  0x27   : > { %6883 = vst [vmem:[#allocation33_spill] sm:$0xff] %v5143_v45  ;;  %6884 = vst [vmem:[#allocation34_spill] sm:$0xff] %v5148_v46  ;;  %v5153_v47 = vld [vmem:[%s6816_s6 + $0x78] sm:$0xff]  ;;  %v5158_v48 = vld [vmem:[%s6816_s6 + $0x80] sm:$0xff] }
  0x28   : > { %6885 = vst [vmem:[#allocation35_spill] sm:$0xff] %v5153_v47  ;;  %6886 = vst [vmem:[#allocation36_spill] sm:$0xff] %v5158_v48  ;;  %v5163_v49 = vld [vmem:[%s6816_s6 + $0x88] sm:$0xff]  ;;  %v5168_v50 = vld [vmem:[%s6816_s6 + $0x90] sm:$0xff] }
  0x29   : > { %6887 = vst [vmem:[#allocation37_spill] sm:$0xff] %v5163_v49  ;;  %6888 = vst [vmem:[#allocation38_spill] sm:$0xff] %v5168_v50  ;;  %v5173_v51 = vld [vmem:[%s6816_s6 + $0x98] sm:$0xff]  ;;  %v5178_v52 = vld [vmem:[%s6816_s6 + $0xa0] sm:$0xff] }
  0x2a   : > { %6889 = vst [vmem:[#allocation39_spill] sm:$0xff] %v5173_v51  ;;  %6890 = vst [vmem:[#allocation40_spill] sm:$0xff] %v5178_v52  ;;  %v5183_v53 = vld [vmem:[%s6816_s6 + $0xa8] sm:$0xff]  ;;  %v5188_v54 = vld [vmem:[%s6816_s6 + $0xb0] sm:$0xff] }
  0x2b   : > { %6891 = vst [vmem:[#allocation41_spill] sm:$0xff] %v5183_v53  ;;  %6892 = vst [vmem:[#allocation42_spill] sm:$0xff] %v5188_v54  ;;  %v5193_v55 = vld [vmem:[%s6816_s6 + $0xb8] sm:$0xff]  ;;  %v5198_v56 = vld [vmem:[%s6816_s6 + $0xc0] sm:$0xff] }
  0x2c   : > { %6893 = vst [vmem:[#allocation43_spill] sm:$0xff] %v5193_v55  ;;  %6894 = vst [vmem:[#allocation44_spill] sm:$0xff] %v5198_v56  ;;  %v5203_v57 = vld [vmem:[%s6816_s6 + $0xc8] sm:$0xff]  ;;  %v5208_v58 = vld [vmem:[%s6816_s6 + $0xd0] sm:$0xff] }
  0x2d   : > { %6895 = vst [vmem:[#allocation45_spill] sm:$0xff] %v5203_v57  ;;  %6896 = vst [vmem:[#allocation46_spill] sm:$0xff] %v5208_v58  ;;  %v5213_v59 = vld [vmem:[%s6816_s6 + $0xd8] sm:$0xff]  ;;  %v5218_v60 = vld [vmem:[%s6816_s6 + $0xe0] sm:$0xff] }
  0x2e   : > { %6897 = vst [vmem:[#allocation47_spill] sm:$0xff] %v5213_v59  ;;  %6898 = vst [vmem:[#allocation48_spill] sm:$0xff] %v5218_v60  ;;  %v5223_v61 = vld [vmem:[%s6816_s6 + $0xe8] sm:$0xff]  ;;  %v5228_v62 = vld [vmem:[%s6816_s6 + $0xf0] sm:$0xff] }
  0x2f   : > { %6899 = vst [vmem:[#allocation49_spill] sm:$0xff] %v5223_v61  ;;  %6900 = vst [vmem:[#allocation50_spill] sm:$0xff] %v5228_v62  ;;  %v5233_v63 = vld [vmem:[%s6816_s6 + $0xf8] sm:$0xff]  ;;  %v457_v0 = vld [vmem:[#allocation3] sm:$0xff]  }
  0x30   : > { %6901 = vst [vmem:[#allocation51_spill] sm:$0xff] %v5233_v63  ;;  %v458_v1 = vld [vmem:[#allocation3 + $0x8] sm:$0xff]   ;;  %v459_v2 = vld [vmem:[#allocation3 + $0x10] sm:$0xff]   ;;  %v460_v3 = vld [vmem:[#allocation3 + $0x18] sm:$0xff]  }
  0x31   : > { %v461_v4 = vld [vmem:[#allocation3 + $0x20] sm:$0xff]   ;;  %v462_v5 = vld [vmem:[#allocation3 + $0x28] sm:$0xff]   ;;  %v463_v6 = vld [vmem:[#allocation3 + $0x30] sm:$0xff]  }
  0x32   : > { %v464_v7 = vld [vmem:[#allocation3 + $0x38] sm:$0xff]   ;;  %v465_v8 = vld [vmem:[#allocation4] sm:$0xff]   ;;  %v466_v9 = vld [vmem:[#allocation4 + $0x8] sm:$0xff]  }
  0x33   : > { %v467_v10 = vld [vmem:[#allocation4 + $0x10] sm:$0xff]   ;;  %v468_v11 = vld [vmem:[#allocation4 + $0x18] sm:$0xff]   ;;  %v469_v12 = vld [vmem:[#allocation4 + $0x20] sm:$0xff]  }
  0x34   : > { %v470_v13 = vld [vmem:[#allocation4 + $0x28] sm:$0xff]   ;;  %v471_v14 = vld [vmem:[#allocation4 + $0x30] sm:$0xff]   ;;  %v472_v15 = vld [vmem:[#allocation4 + $0x38] sm:$0xff]  }
  0x35 LB: >> { %v548_v63 = vpack.c.bf16 %v4768_v5, %v4784_v1  ;;  %v550_v59 = vpack.c.bf16 %v4760_v7, %v4776_v3  ;;  %v547_v61 = vpack.c.bf16 %v4772_v4, %v4788_v0  ;;  %v549_v62 = vpack.c.bf16 %v4764_v6, %v4780_v2  ;;  %v6902_v17 = vld [vmem:[#allocation6_spill] sm:$0xff]  ;;  %v6903_v16 = vld [vmem:[#allocation5_spill] sm:$0xff]  ;;  %v6904_v19 = vld [vmem:[#allocation8_spill] sm:$0xff]  ;;  %s3800_s15 = sshll.u32 %s4792_s14, 8  ;;  %s3640_s20 = sshll.u32 %s4792_s14, 1  ;;  %s4792_s14 = sphi %s5267_s14, %s478_s14   ;;  %v4788_v0 = vphi %v457_v0, %v7037_v0   ;;  %v4784_v1 = vphi %v458_v1, %v7036_v1   ;;  %v4780_v2 = vphi %v459_v2, %v7035_v2   ;;  %v4776_v3 = vphi %v460_v3, %v7034_v3   ;;  %v4772_v4 = vphi %v461_v4, %v7033_v4   ;;  %v4768_v5 = vphi %v462_v5, %v7032_v5   ;;  %v4764_v6 = vphi %v463_v6, %v7031_v6   ;;  %v4760_v7 = vphi %v464_v7, %v7030_v7   ;;  %v4756_v8 = vphi %v465_v8, %v7029_v8   ;;  %v4752_v9 = vphi %v466_v9, %v7028_v9   ;;  %v4748_v10 = vphi %v467_v10, %v7027_v10   ;;  %v4744_v11 = vphi %v468_v11, %v7026_v11   ;;  %v4740_v12 = vphi %v469_v12, %v7025_v12   ;;  %v4736_v13 = vphi %v470_v13, %v7024_v13   ;;  %v4732_v14 = vphi %v471_v14, %v7023_v14   ;;  %v4728_v15 = vphi %v472_v15, %v7022_v15  }
  0x36   : >> { %v6828_v57 = vmov 0   ;;  %v5308_v58 = vcombine.low %v6903_v16, %v6902_v17  ;;  %vm571_vm0 = vcmask 130048   ;;  %v6905_v18 = vld [vmem:[#allocation7_spill] sm:$0xff]  ;;  %v6906_v21 = vld [vmem:[#allocation10_spill] sm:$0xff]  ;;  %v6907_v20 = vld [vmem:[#allocation9_spill] sm:$0xff]  ;;  %s5348_s16 = scalar_lea.vmem %s4944_s24, %s3800_s15  ;;  %s1105_s21 = sadd.s32 %s3640_s20, %s4937_s19 }
  0x37   : >> { %584 = vmatprep.subr.bf16.mxu0 %v548_v63  ;;  %657 = vmatprep.subr.bf16.mxu1 %v550_v59  ;;  %v5318_v59 = vcombine.low %v6905_v18, %v6904_v19  ;;  %v6908_v23 = vld [vmem:[#allocation12_spill] sm:$0xff]  ;;  %v6909_v22 = vld [vmem:[#allocation11_spill] sm:$0xff]  ;;  %v499_v63 = vld [vmem:[%s5348_s16] sm:$0xff]  ;;  %s3801_s22 = sshll.u32 %s1105_s21, 7  ;;  %s478_s14 = sadd.s32 1, %s4792_s14  }
  0x38   : >> { %616 = vmatprep.mubr.bf16.mxu0 %v6828_v57  ;;  %689 = vmatprep.mubr.bf16.mxu1 %v6828_v57  ;;  %v500_v0 = vld [vmem:[%s5348_s16 + $0x8] sm:$0xff]  ;;  %v501_v1 = vld [vmem:[%s5348_s16 + $0x10] sm:$0xff]  ;;  %v502_v2 = vld [vmem:[%s5348_s16 + $0x18] sm:$0xff]  ;;  %v515_v4 = vunpack.c.l.bf16 %v499_v63  ;;  %s5576_s23 = scalar_lea.vmem [#allocation2], %s3801_s22  ;;  %p5860_p5 = scmp.ge.s32.totalorder %s478_s14, 7  }
  0x39   : >> { %585 = vmatpush1.bf16.msra.mxu0 %v547_v61  ;;  %658 = vmatpush1.bf16.msra.mxu1 %v549_v62  ;;  %v5328_v61 = vcombine.low %v6907_v20, %v6906_v21  ;;  %v5338_v62 = vcombine.low %v6909_v22, %v6908_v23  ;;  %v5355_v3 = vld [vmem:[%s5348_s16 + $0x20] sm:$0xff]  ;;  %v5358_v5 = vld [vmem:[%s5348_s16 + $0x28] sm:$0xff]  ;;  %v5361_v6 = vld [vmem:[%s5348_s16 + $0x30] sm:$0xff]  ;;  %v517_v7 = vunpack.c.l.bf16 %v500_v0  ;;  %v518_v16 = vunpack.c.h.bf16 %v500_v0  ;;  %p3721_p6 = scmp.ne.s32.totalorder (%p5860_p5), %s4932_s18, 4 }
  0x3a   : >> { %v519_v17 = vunpack.c.l.bf16 %v501_v1  ;;  %v5364_v18 = vld [vmem:[%s5348_s16 + $0x38] sm:$0xff]  ;;  %v521_v19 = vunpack.c.l.bf16 %v502_v2  ;;  %v520_v20 = vunpack.c.h.bf16 %v501_v1  ;;  %v522_v21 = vunpack.c.h.bf16 %v502_v2  ;;  %v5368_v23 = vld [vmem:[%s5348_s16 + $0x40] sm:$0xff]  ;;  %v5371_v60 = vld [vmem:[%s5348_s16 + $0x48] sm:$0xff] }
  0x3b   : >> { %v523_v22 = vunpack.c.l.bf16 %v5355_v3  ;;  %v525_v56 = vunpack.c.l.bf16 %v5358_v5  ;;  %v524_v55 = vunpack.c.h.bf16 %v5355_v3  ;;  %v526_v51 = vunpack.c.h.bf16 %v5358_v5  ;;  %v5378_v0 = vld [vmem:[%s5348_s16 + $0x50] sm:$0xff]  ;;  %v5381_v53 = vld [vmem:[%s5348_s16 + $0x58] sm:$0xff]  ;;  %v5395_v40 = vld [vmem:[%s5348_s16 + $0x60] sm:$0xff] }
  0x3c   : >> { %3647 = vmatmul.mubr.msk.bf16.vlgmr.msra.gmra.mrb[0].mxu0 %vm571_vm0, %v5308_v58  ;;  %3651 = vmatmul.mubr.msk.bf16.vlgmr.msra.gmra.mrb[0].mxu1 %vm571_vm0, %v5308_v58  ;;  %v5398_v47 = vld [vmem:[%s5348_s16 + $0x68] sm:$0xff]  ;;  %v6928_v24 = vld [vmem:[#allocation13_spill] sm:$0xff]  ;;  %v6930_v27 = vld [vmem:[#allocation16_spill] sm:$0xff] }
  0x3d   : >> { %626 = vmatprep.mubr.bf16.mxu0 %v6828_v57  ;;  %699 = vmatprep.mubr.bf16.mxu1 %v6828_v57  ;;  %v6927_v25 = vld [vmem:[#allocation14_spill] sm:$0xff]  ;;  %v6931_v26 = vld [vmem:[#allocation15_spill] sm:$0xff]  ;;  %v6933_v28 = vld [vmem:[#allocation17_spill] sm:$0xff] }
  0x3e   : >> { %v6932_v29 = vld [vmem:[#allocation18_spill] sm:$0xff]  ;;  %v6934_v31 = vld [vmem:[#allocation20_spill] sm:$0xff]  ;;  %v6935_v30 = vld [vmem:[#allocation19_spill] sm:$0xff] }
  0x44   : >> { %3648 = vmatmul.mubr.msk.bf16.gmra.mrb[4].mxu0 %vm571_vm0, %v5318_v59  ;;  %3652 = vmatmul.mubr.msk.bf16.gmra.mrb[4].mxu1 %vm571_vm0, %v5318_v59 }
  0x45   : >> { %636 = vmatprep.mubr.bf16.mxu0 %v6828_v57  ;;  %709 = vmatprep.mubr.bf16.mxu1 %v6828_v57 }
  0x4c   : >> { %3649 = vmatmul.mubr.msk.bf16.gmra.mrb[8].mxu0 %vm571_vm0, %v5328_v61  ;;  %3653 = vmatmul.mubr.msk.bf16.gmra.mrb[8].mxu1 %vm571_vm0, %v5328_v61 }
  0x4d   : >> { %646 = vmatprep.mubr.bf16.mxu0 %v6828_v57  ;;  %719 = vmatprep.mubr.bf16.mxu1 %v6828_v57 }
  0x54   : >> { %3650 = vmatmul.mubr.msk.bf16.gmra.mrb[12].mxu0 %vm571_vm0, %v5338_v62  ;;  %3654 = vmatmul.mubr.msk.bf16.gmra.mrb[12].mxu1 %vm571_vm0, %v5338_v62 }
  0x55   : >> { %974 = vmatprep.mubr.bf16.mxu0 %v6828_v57  ;;  %1047 = vmatprep.mubr.bf16.mxu1 %v6828_v57  ;;  %v516_v57 = vunpack.c.h.bf16 %v499_v63  ;;  %v527_v63 = vunpack.c.l.bf16 %v5361_v6 }
 0x10f   : >> { %v618_v52 = vpop.f32.mrb[0].mxu0  ;;  %v691_v43 = vpop.f32.mrb[0].mxu1 }
 0x110   : >> { %v730_v1 = vadd.f32 %v618_v52, %v515_v4  ;;  %v620_v2 = vpop.f32.mrb[1].mxu0  ;;  %v732_v45 = vadd.f32 %v691_v43, %v517_v7  ;;  %v693_v46 = vpop.f32.mrb[1].mxu1 }
 0x111   : >> { %v731_v50 = vadd.f32 %v620_v2, %v516_v57  ;;  %v622_v41 = vpop.f32.mrb[2].mxu0  ;;  %v733_v42 = vadd.f32 %v693_v46, %v518_v16  ;;  %v695_v44 = vpop.f32.mrb[2].mxu1  ;;  %v539_v16 = vunpack.c.l.bf16 %v5395_v40 }
 0x112   : >> { %v762_v3 = vmul.f32 0.5, %v730_v1  ;;  %v734_v5 = vadd.f32 %v622_v41, %v519_v17  ;;  %v624_v48 = vpop.f32.mrb[3].mxu0  ;;  %v764_v52 = vmul.f32 0.5, %v732_v45  ;;  %v736_v39 = vadd.f32 %v695_v44, %v521_v19  ;;  %v697_v54 = vpop.f32.mrb[3].mxu1 }
 0x113   : >> { %v763_v4 = vmul.f32 0.5, %v731_v50  ;;  %v735_v35 = vadd.f32 %v624_v48, %v520_v20  ;;  %v765_v49 = vmul.f32 0.5, %v733_v42  ;;  %v737_v57 = vadd.f32 %v697_v54, %v522_v21 }
 0x114   : >> { %4097 = vtanh.f32 %v762_v3  ;;  %v766_v43 = vmul.f32 0.5, %v734_v5  ;;  %v768_v7 = vmul.f32 0.5, %v736_v39  ;;  %v541_v17 = vunpack.c.l.bf16 %v5398_v47 }
 0x115   : >> { %4099 = vtanh.f32 %v764_v52  ;;  %v767_v41 = vmul.f32 0.5, %v735_v35  ;;  %v769_v46 = vmul.f32 0.5, %v737_v57  ;;  %v6911_v57 = vunpack.c.h.bf16 %v5361_v6 }
 0x116   : >> { %4101 = vtanh.f32 %v763_v4 }
 0x117   : >> { %4103 = vtanh.f32 %v765_v49  ;;  %v628_v1 = vpop.f32.mrb[4].mxu0  ;;  %v701_v42 = vpop.f32.mrb[4].mxu1 }
 0x118   : >> { %4105 = vtanh.f32 %v766_v43  ;;  %v738_v20 = vadd.f32 %v628_v1, %v523_v22  ;;  %v630_v44 = vpop.f32.mrb[5].mxu0  ;;  %v740_v21 = vadd.f32 %v701_v42, %v525_v56  ;;  %v703_v48 = vpop.f32.mrb[5].mxu1  ;;  %v6910_v22 = vunpack.c.l.bf16 %v5364_v18  ;;  %v5414_v42 = vld [vmem:[%s5348_s16 + $0x78] sm:$0xff] }
 0x119   : >> { %4107 = vtanh.f32 %v768_v7  ;;  %v739_v39 = vadd.f32 %v630_v44, %v524_v55  ;;  %v632_v50 = vpop.f32.mrb[6].mxu0  ;;  %v741_v35 = vadd.f32 %v703_v48, %v526_v51  ;;  %v705_v2 = vpop.f32.mrb[6].mxu1 }
 0x11a   : >> { %4109 = vtanh.f32 %v767_v41  ;;  %v794_v54 = vmul.f32 0.5, %v738_v20  ;;  %v742_v49 = vadd.f32 %v632_v50, %v527_v63  ;;  %v634_v3 = vpop.f32.mrb[7].mxu0  ;;  %v796_v5 = vmul.f32 0.5, %v740_v21  ;;  %v707_v43 = vpop.f32.mrb[7].mxu1  ;;  %v5409_v41 = vld [vmem:[%s5348_s16 + $0x70] sm:$0xff] }
 0x11b   : >> { %4111 = vtanh.f32 %v769_v46  ;;  %v795_v52 = vmul.f32 0.5, %v739_v39  ;;  %v744_v4 = vadd.f32 %v705_v2, %v6910_v22  ;;  %v797_v56 = vmul.f32 0.5, %v741_v35 }
 0x11c   : >> { %4113 = vtanh.f32 %v794_v54  ;;  %v798_v55 = vmul.f32 0.5, %v742_v49  ;;  %v743_v7 = vadd.f32 %v634_v3, %v6911_v57  ;;  %v6912_v63 = vunpack.c.h.bf16 %v5364_v18 }
 0x11d   : >> { %4115 = vtanh.f32 %v796_v5  ;;  %v800_v51 = vmul.f32 0.5, %v744_v4  ;;  %v6913_v35 = vunpack.c.l.bf16 %v5368_v23 }
 0x11e   : >> { %v745_v46 = vadd.f32 %v707_v43, %v6912_v63  ;;  %v4098_v1 = vpop.eup %4097  ;;  %4117 = vtanh.f32 %v795_v52  ;;  %v799_v20 = vmul.f32 0.5, %v743_v7  ;;  %v6914_v52 = vunpack.c.l.bf16 %v5371_v60 }
 0x11f   : >> { %v4100_v44 = vpop.eup %4099  ;;  %4119 = vtanh.f32 %v797_v56  ;;  %v638_v39 = vpop.f32.mrb[8].mxu0  ;;  %v778_v50 = vadd.f32 1.0, %v4098_v1 }
 0x120   : >> { %v801_v21 = vmul.f32 0.5, %v745_v46  ;;  %v4102_v6 = vpop.eup %4101  ;;  %v780_v54 = vadd.f32 1.0, %v4100_v44  ;;  %4121 = vtanh.f32 %v798_v55  ;;  %v746_v49 = vadd.f32 %v638_v39, %v6913_v35  ;;  %v711_v18 = vpop.f32.mrb[8].mxu1 }
 0x121   : >> { %v640_v2 = vpop.f32.mrb[9].mxu0  ;;  %v4104_v3 = vpop.eup %4103  ;;  %v779_v5 = vadd.f32 1.0, %v4102_v6  ;;  %4123 = vtanh.f32 %v800_v51  ;;  %v748_v22 = vadd.f32 %v711_v18, %v6914_v52  ;;  %v6915_v55 = vunpack.c.h.bf16 %v5368_v23 }
 0x122   : >> { %v713_v4 = vpop.f32.mrb[9].mxu1  ;;  %v642_v43 = vpop.f32.mrb[10].mxu0  ;;  %v781_v7 = vadd.f32 1.0, %v4104_v3  ;;  %4125 = vtanh.f32 %v799_v20  ;;  %v6916_v51 = vunpack.c.h.bf16 %v5371_v60  ;;  %v5428_v48 = vmul.f32 0.5, %v778_v50 }
 0x123   : >> { %v4106_v57 = vpop.eup %4105  ;;  %v747_v63 = vadd.f32 %v640_v2, %v6915_v55  ;;  %v715_v46 = vpop.f32.mrb[10].mxu1  ;;  %4127 = vtanh.f32 %v801_v21  ;;  %v5430_v20 = vmul.f32 0.5, %v780_v54  ;;  %v6917_v23 = vunpack.c.l.bf16 %v5378_v0 }
 0x124   : >> { %v644_v1 = vpop.f32.mrb[11].mxu0  ;;  %v4108_v39 = vpop.eup %4107  ;;  %v782_v6 = vadd.f32 1.0, %v4106_v57  ;;  %v749_v35 = vadd.f32 %v713_v4, %v6916_v51  ;;  %4129 = vtanh.f32 %v746_v49  ;;  %v5434_v55 = vmul.f32 0.5, %v779_v5 }
 0x125   : >> { %v717_v18 = vpop.f32.mrb[11].mxu1  ;;  %v4110_v56 = vpop.eup %4109  ;;  %v750_v2 = vadd.f32 %v642_v43, %v6917_v23  ;;  %v5436_v57 = vmul.f32 0.5, %v781_v7  ;;  %4131 = vtanh.f32 %v748_v22  ;;  %v6918_v60 = vunpack.c.l.bf16 %v5381_v53 }
 0x126   : >> { %v4112_v3 = vpop.eup %4111  ;;  %v5440_v51 = vmul.f32 0.5, %v782_v6  ;;  %v784_v50 = vadd.f32 1.0, %v4108_v39  ;;  %4133 = vtanh.f32 %v747_v63  ;;  %v6919_v54 = vunpack.c.h.bf16 %v5378_v0 }
 0x127   : >> { %v752_v21 = vadd.f32 %v715_v46, %v6918_v60  ;;  %v4114_v4 = vpop.eup %4113  ;;  %v783_v44 = vadd.f32 1.0, %v4110_v56  ;;  %4135 = vtanh.f32 %v749_v35  ;;  %v6920_v5 = vunpack.c.h.bf16 %v5381_v53  ;;  %v648_v23 = vpop.f32.mrb[12].mxu0 }
 0x128   : >> { %v751_v49 = vadd.f32 %v644_v1, %v6919_v54  ;;  %v4116_v52 = vpop.eup %4115  ;;  %v810_v43 = vadd.f32 1.0, %v4114_v4  ;;  %v785_v19 = vadd.f32 1.0, %v4112_v3  ;;  %4137 = vtanh.f32 %v750_v2  ;;  %v721_v39 = vpop.f32.mrb[12].mxu1 }
 0x129   : >> { %v753_v7 = vadd.f32 %v717_v18, %v6920_v5  ;;  %v4118_v22 = vpop.eup %4117  ;;  %v812_v45 = vadd.f32 1.0, %v4116_v52  ;;  %v754_v46 = vadd.f32 %v648_v23, %v539_v16  ;;  %v650_v63 = vpop.f32.mrb[13].mxu0  ;;  %4139 = vtanh.f32 %v752_v21 }
 0x12a   : >> { %v4120_v6 = vpop.eup %4119  ;;  %v818_v0 = vmul.f32 0.5, %v810_v43  ;;  %v811_v1 = vadd.f32 1.0, %v4118_v22  ;;  %v756_v56 = vadd.f32 %v721_v39, %v541_v17  ;;  %v723_v35 = vpop.f32.mrb[13].mxu1  ;;  %v792_v60 = vmul.f32 0.5, %v784_v50 }
 0x12b   : >> { %v652_v53 = vpop.f32.mrb[14].mxu0  ;;  %v4122_v18 = vpop.eup %4121  ;;  %v820_v4 = vmul.f32 0.5, %v812_v45  ;;  %v813_v3 = vadd.f32 1.0, %v4120_v6  ;;  %4141 = vtanh.f32 %v751_v49  ;;  %v834_v43 = vmul.f32 0.5, %v754_v46 }
 0x12c   : >> { %v725_v52 = vpop.f32.mrb[14].mxu1  ;;  %v5450_v2 = vpop.f32.mrb[15].mxu0  ;;  %v819_v54 = vmul.f32 0.5, %v811_v1  ;;  %v814_v5 = vadd.f32 1.0, %v4122_v18  ;;  %4143 = vtanh.f32 %v753_v7  ;;  %v791_v22 = vmul.f32 0.5, %v783_v44 }
 0x12d   : >> { %v4124_v16 = vpop.eup %4123  ;;  %v727_v23 = vpop.f32.mrb[15].mxu1  ;;  %v793_v37 = vmul.f32 0.5, %v785_v19  ;;  %v821_v17 = vmul.f32 0.5, %v813_v3  ;;  %v866_v50 = vmul.f32 %v4756_v8, %v818_v0  ;;  %v836_v49 = vmul.f32 0.5, %v756_v56 }
 0x12e   : >> { %v4126_v21 = vpop.eup %4125  ;;  %v816_v39 = vadd.f32 1.0, %v4124_v16  ;;  %v822_v45 = vmul.f32 0.5, %v814_v5  ;;  %v868_v34 = vmul.f32 %v4748_v10, %v820_v4  ;;  %v6921_v7 = vunpack.c.h.bf16 %v5395_v40 }
 0x12f   : >> { %v4128_v38 = vpop.eup %4127  ;;  %v815_v6 = vadd.f32 1.0, %v4126_v21  ;;  %v867_v44 = vmul.f32 %v4752_v9, %v819_v54  ;;  %4145 = vtanh.f32 %v834_v43  ;;  %v869_v8 = vmul.f32 %v4744_v11, %v821_v17 }
 0x130   : >> { %v4130_v33 = vpop.eup %4129  ;;  %v824_v36 = vmul.f32 0.5, %v816_v39  ;;  %v817_v1 = vadd.f32 1.0, %v4128_v38  ;;  %v755_v46 = vadd.f32 %v650_v63, %v6921_v7  ;;  %v870_v0 = vmul.f32 %v4740_v12, %v822_v45 }
 0x131   : >> { %v4132_v18 = vpop.eup %4131  ;;  %v823_v19 = vmul.f32 0.5, %v815_v6  ;;  %v874_v3 = vmul.f32 %v4130_v33, %v5428_v48  ;;  %4147 = vtanh.f32 %v836_v49 }
 0x132   : >> { %v4134_v16 = vpop.eup %4133  ;;  %v876_v56 = vmul.f32 %v4132_v18, %v5430_v20  ;;  %v835_v10 = vmul.f32 0.5, %v755_v46  ;;  %v872_v38 = vmul.f32 %v4732_v14, %v824_v36  ;;  %v825_v48 = vmul.f32 0.5, %v817_v1 }
 0x133   : >> { %v4136_v4 = vpop.eup %4135  ;;  %v5462_v40 = vadd.f32 %v874_v3, %v866_v50  ;;  %v875_v63 = vmul.f32 %v4134_v16, %v5434_v55  ;;  %v871_v33 = vmul.f32 %v4736_v13, %v823_v19  ;;  %v6922_v36 = vunpack.c.h.bf16 %v5398_v47 }
 0x134   : >> { %v4138_v9 = vpop.eup %4137  ;;  %v5466_v54 = vadd.f32 %v876_v56, %v868_v34  ;;  %v877_v11 = vmul.f32 %v4136_v4, %v5436_v57  ;;  %4149 = vtanh.f32 %v835_v10  ;;  %v6923_v34 = vunpack.c.l.bf16 %v5409_v41 }
 0x135   : >> { %v4140_v12 = vpop.eup %4139  ;;  %v5469_v5 = vadd.f32 %v875_v63, %v867_v44  ;;  %v878_v20 = vmul.f32 %v4138_v9, %v5440_v51  ;;  %v757_v14 = vadd.f32 %v723_v35, %v6922_v36  ;;  %4151 = vtanh.f32 %v5462_v40 }
 0x136   : >> { %v4142_v43 = vpop.eup %4141  ;;  %v5475_v55 = vadd.f32 %v877_v11, %v869_v8  ;;  %v880_v13 = vmul.f32 %v4140_v12, %v792_v60  ;;  %v758_v21 = vadd.f32 %v652_v53, %v6923_v34  ;;  %4153 = vtanh.f32 %v5466_v54 }
 0x137   : >> { %v4144_v17 = vpop.eup %4143  ;;  %v5480_v57 = vadd.f32 %v878_v20, %v870_v0  ;;  %v879_v39 = vmul.f32 %v4142_v43, %v791_v22  ;;  %v6924_v51 = vunpack.c.l.bf16 %v5414_v42  ;;  %v873_v47 = vmul.f32 %v4728_v15, %v825_v48 }
 0x138   : >> { %4155 = vtanh.f32 %v5469_v5  ;;  %v5486_v35 = vadd.f32 %v880_v13, %v872_v38  ;;  %v881_v45 = vmul.f32 %v4144_v17, %v793_v37  ;;  %v837_v53 = vmul.f32 0.5, %v757_v14 }
 0x139   : >> { %v760_v50 = vadd.f32 %v725_v52, %v6924_v51  ;;  %4157 = vtanh.f32 %v5475_v55  ;;  %v5489_v60 = vadd.f32 %v879_v39, %v871_v33  ;;  %v838_v49 = vmul.f32 0.5, %v758_v21  ;;  %v4146_v7 = vpop.eup %4145 }
 0x13a   : >> { %v5491_v6 = vadd.f32 %v881_v45, %v873_v47  ;;  %v6925_v22 = vunpack.c.h.bf16 %v5409_v41  ;;  %v6926_v52 = vunpack.c.h.bf16 %v5414_v42  ;;  %4159 = vtanh.f32 %v5480_v57 }
 0x13b   : >> { %v840_v46 = vmul.f32 0.5, %v760_v50  ;;  %4161 = vtanh.f32 %v5486_v35  ;;  %v4148_v18 = vpop.eup %4147  ;;  %v850_v16 = vadd.f32 1.0, %v4146_v7 }
 0x13c   : >> { %v759_v1 = vadd.f32 %v5450_v2, %v6925_v22  ;;  %v761_v15 = vadd.f32 %v727_v23, %v6926_v52  ;;  %4163 = vtanh.f32 %v837_v53  ;;  %v852_v0 = vadd.f32 1.0, %v4148_v18 }
 0x13d   : >> { %4165 = vtanh.f32 %v838_v49  ;;  %v858_v9 = vmul.f32 0.5, %v850_v16 }
 0x13e   : >> { %v839_v37 = vmul.f32 0.5, %v759_v1  ;;  %v841_v44 = vmul.f32 0.5, %v761_v15  ;;  %v4150_v19 = vpop.eup %4149  ;;  %4167 = vtanh.f32 %v840_v46  ;;  %v860_v11 = vmul.f32 0.5, %v852_v0 }
 0x13f   : >> { %v4152_v3 = vpop.eup %4151  ;;  %v851_v10 = vadd.f32 1.0, %v4150_v19  ;;  %v6929_v19 = vmov 0  }
 0x140   : >> { %4169 = vtanh.f32 %v839_v37  ;;  %v4154_v41 = vpop.eup %4153  ;;  %v898_v51 = vmul.f32 %v4152_v3, %v858_v9  ;;  %v5514_v3 = vcombine.low %v6931_v26, %v6930_v27 }
 0x141   : >> { %4171 = vtanh.f32 %v841_v44  ;;  %v859_v36 = vmul.f32 0.5, %v851_v10  ;;  %v900_v45 = vmul.f32 %v4154_v41, %v860_v11  ;;  %v5504_v44 = vcombine.low %v6928_v24, %v6927_v25  ;;  %v6941_v11 = vld [vmem:[#allocation25_spill] sm:$0xff] }
 0x142   : >> { %v4156_v2 = vpop.eup %4155  ;;  %4173 = vtanh.f32 %v5489_v60  ;;  %v5524_v41 = vcombine.low %v6933_v28, %v6932_v29  ;;  %v5629_v29 = vld [vmem:[%s5348_s16 + $0xb8] sm:$0xff] }
 0x143   : >> { %v4158_v42 = vpop.eup %4157  ;;  %4175 = vtanh.f32 %v5491_v6  ;;  %v899_v22 = vmul.f32 %v4156_v2, %v859_v36  ;;  %v5534_v2 = vcombine.low %v6935_v30, %v6934_v31  ;;  %v3673_v31 = vld [vmem:[%s5348_s16 + $0x90] sm:$0xff] }
 0x144   : >> { %v4160_v23 = vpop.eup %4159 }
 0x145   : >> { %v4162_v8 = vpop.eup %4161 }
 0x146   : >> { %v4164_v56 = vpop.eup %4163 }
 0x147   : >> { %v4166_v4 = vpop.eup %4165  ;;  %v853_v38 = vadd.f32 1.0, %v4164_v56 }
 0x148   : >> { %v4168_v63 = vpop.eup %4167  ;;  %v854_v33 = vadd.f32 1.0, %v4166_v4 }
 0x149   : >> { %v856_v12 = vadd.f32 1.0, %v4168_v63  ;;  %v861_v34 = vmul.f32 0.5, %v853_v38  ;;  %v6938_v38 = vld [vmem:[#allocation22_spill] sm:$0xff]  ;;  %v6939_v63 = vld [vmem:[#allocation21_spill] sm:$0xff] }
 0x14a   : >> { %v4170_v48 = vpop.eup %4169  ;;  %v862_v14 = vmul.f32 0.5, %v854_v33  ;;  %v6940_v33 = vld [vmem:[#allocation26_spill] sm:$0xff] }
 0x14b   : >> { %v4172_v20 = vpop.eup %4171  ;;  %v855_v43 = vadd.f32 1.0, %v4170_v48  ;;  %v864_v21 = vmul.f32 0.5, %v856_v12  ;;  %v901_v15 = vmul.f32 %v4158_v42, %v861_v34 }
 0x14c   : >> { %v4174_v13 = vpop.eup %4173  ;;  %v857_v17 = vadd.f32 1.0, %v4172_v20  ;;  %v902_v50 = vmul.f32 %v4160_v23, %v862_v14  ;;  %v6942_v20 = vmov %v6941_v11  ;;  %v6943_v14 = vld [vmem:[#allocation23_spill] sm:$0xff] }
 0x14d   : >> { %v4176_v39 = vpop.eup %4175  ;;  %v863_v47 = vmul.f32 0.5, %v855_v43  ;;  %v904_v53 = vmul.f32 %v4162_v8, %v864_v21  ;;  %v6936_v8 = vld [vmem:[#allocation24_spill] sm:$0xff]  ;;  %v6944_v43 = vmov %v6943_v14  ;;  %v6945_v21 = vld [vmem:[#allocation27_spill] sm:$0xff] }
 0x14e   : >> { %v865_v49 = vmul.f32 0.5, %v857_v17  ;;  %v906_v52 = vpack.c.bf16 %v902_v50, %v898_v51  ;;  %v6937_v56 = vmov %v6936_v8 }
 0x14f   : >> { %v903_v1 = vmul.f32 %v4174_v13, %v863_v47  ;;  %v908_v46 = vpack.c.bf16 %v904_v53, %v900_v45 }
 0x150   : >> { %v905_v7 = vmul.f32 %v4176_v39, %v865_v49 }
 0x151   : >> { %v907_v37 = vpack.c.bf16 %v903_v1, %v899_v22  ;;  %v6946_v1 = vld [vmem:[#allocation28_spill] sm:$0xff] }
 0x152   : >> { %v909_v18 = vpack.c.bf16 %v905_v7, %v901_v15  ;;  %v6948_v7 = vld [vmem:[#allocation32_spill] sm:$0xff] }
 0x153   : >> { %942 = vmatprep.subr.bf16.mxu0 %v907_v37 }
 0x154   : >> { %1015 = vmatprep.subr.bf16.mxu1 %v909_v18  ;;  %943 = vmatpush1.bf16.msra.mxu0 %v906_v52 }
 0x155   : >> { %1016 = vmatpush1.bf16.msra.mxu1 %v908_v46  ;;  %1177 = vmatprep.subr.bf16.mxu0 %v907_v37 }
 0x156   : >> { %1250 = vmatprep.subr.bf16.mxu1 %v909_v18 }
 0x157   : >> { %3659 = vmatmul.mubr.msk.bf16.vlgmr.msra.gmra.mrb[16].mxu0 %vm571_vm0, %v5504_v44 }
 0x158   : >> { %3663 = vmatmul.mubr.msk.bf16.vlgmr.msra.gmra.mrb[16].mxu1 %vm571_vm0, %v5504_v44  ;;  %1178 = vmatpush1.bf16.msra.mxu0 %v906_v52  ;;  %v6947_v52 = vmov %v6946_v1 }
 0x159   : >> { %1251 = vmatpush1.bf16.msra.mxu1 %v908_v46  ;;  %984 = vmatprep.mubr.bf16.mxu0 %v6929_v19 }
 0x15a   : >> { %1057 = vmatprep.mubr.bf16.mxu1 %v6929_v19 }
 0x15f   : >> { %3660 = vmatmul.mubr.msk.bf16.gmra.mrb[20].mxu0 %vm571_vm0, %v5514_v3 }
 0x160   : >> { %3664 = vmatmul.mubr.msk.bf16.gmra.mrb[20].mxu1 %vm571_vm0, %v5514_v3  ;;  %994 = vmatprep.mubr.bf16.mxu0 %v6929_v19 }
 0x161   : >> { %1067 = vmatprep.mubr.bf16.mxu1 %v6929_v19 }
 0x167   : >> { %3661 = vmatmul.mubr.msk.bf16.gmra.mrb[24].mxu0 %vm571_vm0, %v5524_v41 }
 0x168   : >> { %3665 = vmatmul.mubr.msk.bf16.gmra.mrb[24].mxu1 %vm571_vm0, %v5524_v41  ;;  %1004 = vmatprep.mubr.bf16.mxu0 %v6929_v19 }
 0x169   : >> { %1077 = vmatprep.mubr.bf16.mxu1 %v6929_v19 }
 0x16f   : >> { %3662 = vmatmul.mubr.msk.bf16.gmra.mrb[28].mxu0 %vm571_vm0, %v5534_v2 }
 0x170   : >> { %3666 = vmatmul.mubr.msk.bf16.gmra.mrb[28].mxu1 %vm571_vm0, %v5534_v2  ;;  %1209 = vmatprep.mubr.bf16.mxu0 %v6929_v19 }
 0x171   : >> { %1282 = vmatprep.mubr.bf16.mxu1 %v6929_v19 }
 0x177   : >> { %3687 = vmatmul.mubr.msk.bf16.vlgmr.msra.gmra.mrb[32].mxu0 %vm571_vm0, %v5308_v58 }
 0x178   : >> { %3691 = vmatmul.mubr.msk.bf16.vlgmr.msra.gmra.mrb[32].mxu1 %vm571_vm0, %v5308_v58  ;;  %1219 = vmatprep.mubr.bf16.mxu0 %v6929_v19 }
 0x179   : >> { %1292 = vmatprep.mubr.bf16.mxu1 %v6929_v19 }
 0x17f   : >> { %3688 = vmatmul.mubr.msk.bf16.gmra.mrb[36].mxu0 %vm571_vm0, %v5318_v59 }
 0x180   : >> { %3692 = vmatmul.mubr.msk.bf16.gmra.mrb[36].mxu1 %vm571_vm0, %v5318_v59  ;;  %1229 = vmatprep.mubr.bf16.mxu0 %v6929_v19 }
 0x181   : >> { %1302 = vmatprep.mubr.bf16.mxu1 %v6929_v19 }
 0x187   : >> { %3689 = vmatmul.mubr.msk.bf16.gmra.mrb[40].mxu0 %vm571_vm0, %v5328_v61 }
 0x188   : >> { %3693 = vmatmul.mubr.msk.bf16.gmra.mrb[40].mxu1 %vm571_vm0, %v5328_v61  ;;  %1239 = vmatprep.mubr.bf16.mxu0 %v6929_v19 }
 0x189   : >> { %1312 = vmatprep.mubr.bf16.mxu1 %v6929_v19 }
 0x18f   : >> { %3690 = vmatmul.mubr.msk.bf16.gmra.mrb[44].mxu0 %vm571_vm0, %v5338_v62 }
 0x190   : >> { %3694 = vmatmul.mubr.msk.bf16.gmra.mrb[44].mxu1 %vm571_vm0, %v5338_v62  ;;  %1535 = vmatprep.mubr.bf16.mxu0 %v6929_v19 }
 0x191   : >> { %1608 = vmatprep.mubr.bf16.mxu1 %v6929_v19 }
 0x22a   : >> { %v976_v58 = vpop.f32.mrb[16].mxu0 }
 0x22b   : >> { %v1049_v59 = vpop.f32.mrb[16].mxu1  ;;  %v978_v42 = vpop.f32.mrb[17].mxu0  ;;  %v977_v16 = vadd.f32 %v976_v58, %v5078_v32 }
 0x22c   : >> { %v1051_v61 = vpop.f32.mrb[17].mxu1  ;;  %v980_v23 = vpop.f32.mrb[18].mxu0  ;;  %v1050_v62 = vadd.f32 %v1049_v59, %v6938_v38  ;;  %v979_v9 = vadd.f32 %v978_v42, %v6939_v63  ;;  %v6949_v59 = vld [vmem:[#allocation30_spill] sm:$0xff] }
 0x22d   : >> { %v981_v0 = vadd.f32 %v980_v23, %v6936_v8  ;;  %v1053_v10 = vpop.f32.mrb[18].mxu1  ;;  %v982_v4 = vpop.f32.mrb[19].mxu0  ;;  %v1052_v13 = vadd.f32 %v1051_v61, %v6943_v14  ;;  %v6950_v61 = vld [vmem:[#allocation29_spill] sm:$0xff] }
 0x22e   : >> { %v1054_v48 = vadd.f32 %v1053_v10, %v6940_v33  ;;  %v983_v12 = vadd.f32 %v982_v4, %v6941_v11  ;;  %v1055_v36 = vpop.f32.mrb[19].mxu1 }
 0x22f   : >> { %v1088_v34 = vpack.c.bf16 %v981_v0, %v977_v16  ;;  %v1056_v17 = vadd.f32 %v1055_v36, %v6945_v21  ;;  %v6951_v16 = vld [vmem:[#allocation34_spill] sm:$0xff]  ;;  %v6952_v0 = vld [vmem:[#allocation33_spill] sm:$0xff]  ;;  %v6954_v36 = vld [vmem:[#allocation35_spill] sm:$0xff] }
 0x230   : >> { %v1090_v39 = vpack.c.bf16 %v1054_v48, %v1050_v62  ;;  %v1089_v51 = vpack.c.bf16 %v983_v12, %v979_v9  ;;  %v6953_v9 = vld [vmem:[#allocation31_spill] sm:$0xff] }
 0x231   : >> { %1109 = vst [vmem:[%s5576_s23] sm:$0xff] %v1088_v34  ;;  %v1091_v50 = vpack.c.bf16 %v1056_v17, %v1052_v13 }
 0x232   : >> { %1111 = vst [vmem:[%s5576_s23 + $0x10] sm:$0xff] %v1090_v39  ;;  %1110 = vst [vmem:[%s5576_s23 + $0x8] sm:$0xff] %v1089_v51  ;;  %v986_v47 = vpop.f32.mrb[20].mxu0 }
 0x233   : >> { %1112 = vst [vmem:[%s5576_s23 + $0x18] sm:$0xff] %v1091_v50  ;;  %v1059_v45 = vpop.f32.mrb[20].mxu1  ;;  %v988_v53 = vpop.f32.mrb[21].mxu0  ;;  %v987_v15 = vadd.f32 %v986_v47, %v6946_v1  ;;  %v6956_v1 = vld [vmem:[#allocation40_spill] sm:$0xff] }
 0x234   : >> { %v1061_v49 = vpop.f32.mrb[21].mxu1  ;;  %v990_v22 = vpop.f32.mrb[22].mxu0  ;;  %v1060_v42 = vadd.f32 %v1059_v45, %v6949_v59  ;;  %v989_v23 = vadd.f32 %v988_v53, %v6950_v61  ;;  %v6955_v53 = vld [vmem:[#allocation36_spill] sm:$0xff] }
 0x235   : >> { %v991_v37 = vadd.f32 %v990_v22, %v6948_v7  ;;  %v1063_v18 = vpop.f32.mrb[22].mxu1  ;;  %v992_v58 = vpop.f32.mrb[23].mxu0  ;;  %v1062_v11 = vadd.f32 %v1061_v49, %v6953_v9 }
 0x236   : >> { %v1064_v8 = vadd.f32 %v1063_v18, %v6951_v16  ;;  %v993_v10 = vadd.f32 %v992_v58, %v6952_v0  ;;  %v1065_v4 = vpop.f32.mrb[23].mxu1 }
 0x237   : >> { %v1092_v12 = vpack.c.bf16 %v991_v37, %v987_v15  ;;  %v1066_v14 = vadd.f32 %v1065_v4, %v6954_v36  ;;  %v6957_v37 = vld [vmem:[#allocation38_spill] sm:$0xff] }
 0x238   : >> { %v1094_v13 = vpack.c.bf16 %v1064_v8, %v1060_v42  ;;  %v1093_v34 = vpack.c.bf16 %v993_v10, %v989_v23  ;;  %v6958_v42 = vld [vmem:[#allocation37_spill] sm:$0xff]  ;;  %v6959_v8 = vld [vmem:[#allocation42_spill] sm:$0xff] }
 0x239   : >> { %1113 = vst [vmem:[%s5576_s23 + $0x20] sm:$0xff] %v1092_v12  ;;  %v1095_v17 = vpack.c.bf16 %v1066_v14, %v1062_v11  ;;  %v6960_v10 = vld [vmem:[#allocation41_spill] sm:$0xff]  ;;  %v6961_v11 = vld [vmem:[#allocation39_spill] sm:$0xff] }
 0x23a   : >> { %1115 = vst [vmem:[%s5576_s23 + $0x30] sm:$0xff] %v1094_v13  ;;  %1114 = vst [vmem:[%s5576_s23 + $0x28] sm:$0xff] %v1093_v34  ;;  %v996_v39 = vpop.f32.mrb[24].mxu0  ;;  %v6962_v13 = vld [vmem:[#allocation43_spill] sm:$0xff]  ;;  %v5646_v34 = vld [vmem:[%s5348_s16 + $0xc8] sm:$0xff] }
 0x23b   : >> { %1116 = vst [vmem:[%s5576_s23 + $0x38] sm:$0xff] %v1095_v17  ;;  %v1069_v51 = vpop.f32.mrb[24].mxu1  ;;  %v998_v50 = vpop.f32.mrb[25].mxu0  ;;  %v997_v22 = vadd.f32 %v996_v39, %v6955_v53  ;;  %v1160_v17 = vunpack.c.h.bf16 %v5629_v29 }
 0x23c   : >> { %v1071_v47 = vpop.f32.mrb[25].mxu1  ;;  %v1000_v45 = vpop.f32.mrb[26].mxu0  ;;  %v1070_v58 = vadd.f32 %v1069_v51, %v6957_v37  ;;  %v999_v23 = vadd.f32 %v998_v50, %v6958_v42  ;;  %v1163_v37 = vunpack.c.l.bf16 %v5646_v34 }
 0x23d   : >> { %v1001_v49 = vadd.f32 %v1000_v45, %v6956_v1  ;;  %v1073_v15 = vpop.f32.mrb[26].mxu1  ;;  %v1002_v7 = vpop.f32.mrb[27].mxu0  ;;  %v1072_v12 = vadd.f32 %v1071_v47, %v6961_v11  ;;  %v6963_v47 = vld [vmem:[#allocation44_spill] sm:$0xff]  ;;  %v6966_v11 = vld [vmem:[#allocation45_spill] sm:$0xff] }
 0x23e   : >> { %v1074_v0 = vadd.f32 %v1073_v15, %v6959_v8  ;;  %v1003_v4 = vadd.f32 %v1002_v7, %v6960_v10  ;;  %v1075_v9 = vpop.f32.mrb[27].mxu1  ;;  %v3671_v10 = vld [vmem:[%s5348_s16 + $0x80] sm:$0xff] }
 0x23f   : >> { %v1096_v14 = vpack.c.bf16 %v1001_v49, %v997_v22  ;;  %v1076_v25 = vadd.f32 %v1075_v9, %v6962_v13  ;;  %v6964_v49 = vld [vmem:[#allocation48_spill] sm:$0xff]  ;;  %v6968_v13 = vld [vmem:[#allocation49_spill] sm:$0xff] }
 0x240   : >> { %v1098_v45 = vpack.c.bf16 %v1074_v0, %v1070_v58  ;;  %v1097_v1 = vpack.c.bf16 %v1003_v4, %v999_v23  ;;  %v6965_v4 = vld [vmem:[#allocation46_spill] sm:$0xff] }
 0x241   : >> { %1117 = vst [vmem:[%s5576_s23 + $0x40] sm:$0xff] %v1096_v14  ;;  %v1099_v26 = vpack.c.bf16 %v1076_v25, %v1072_v12  ;;  %v3672_v25 = vld [vmem:[%s5348_s16 + $0x88] sm:$0xff] }
 0x242   : >> { %1119 = vst [vmem:[%s5576_s23 + $0x50] sm:$0xff] %v1098_v45  ;;  %1118 = vst [vmem:[%s5576_s23 + $0x48] sm:$0xff] %v1097_v1  ;;  %v1006_v51 = vpop.f32.mrb[28].mxu0  ;;  %v6967_v12 = vld [vmem:[#allocation50_spill] sm:$0xff] }
 0x243   : >> { %1120 = vst [vmem:[%s5576_s23 + $0x58] sm:$0xff] %v1099_v26  ;;  %v1079_v50 = vpop.f32.mrb[28].mxu1  ;;  %v1008_v15 = vpop.f32.mrb[29].mxu0  ;;  %v1007_v22 = vadd.f32 %v1006_v51, %v6963_v47  ;;  %v3674_v51 = vld [vmem:[%s5348_s16 + $0x98] sm:$0xff]  ;;  %v6969_v47 = vld [vmem:[#allocation47_spill] sm:$0xff] }
 0x244   : >> { %v1081_v7 = vpop.f32.mrb[29].mxu1  ;;  %v1010_v8 = vpop.f32.mrb[30].mxu0  ;;  %v1080_v9 = vadd.f32 %v1079_v50, %v6965_v4  ;;  %v1009_v26 = vadd.f32 %v1008_v15, %v6966_v11  ;;  %v1145_v50 = vunpack.c.l.bf16 %v3671_v10  ;;  %v5619_v4 = vld [vmem:[%s5348_s16 + $0xa0] sm:$0xff]  ;;  %v5622_v15 = vld [vmem:[%s5348_s16 + $0xa8] sm:$0xff]  ;;  %v1152_v28 = vunpack.c.h.bf16 %v3674_v51 }
 0x245   : >> { %v1011_v58 = vadd.f32 %v1010_v8, %v6964_v49  ;;  %v1083_v23 = vpop.f32.mrb[30].mxu1  ;;  %v1012_v0 = vpop.f32.mrb[31].mxu0  ;;  %v1082_v39 = vadd.f32 %v1081_v7, %v6969_v47  ;;  %v6970_v49 = vld [vmem:[#allocation51_spill] sm:$0xff]  ;;  %v1148_v47 = vunpack.c.h.bf16 %v3672_v25 }
 0x246   : >> { %v1084_v14 = vadd.f32 %v1083_v23, %v6967_v12  ;;  %v1013_v1 = vadd.f32 %v1012_v0, %v6968_v13  ;;  %v1085_v30 = vpop.f32.mrb[31].mxu1  ;;  %v1147_v12 = vunpack.c.l.bf16 %v3672_v25  ;;  %v1146_v0 = vunpack.c.h.bf16 %v3671_v10  ;;  %v5625_v13 = vld [vmem:[%s5348_s16 + $0xb0] sm:$0xff] }
 0x247   : >> { %v1100_v8 = vpack.c.bf16 %v1011_v58, %v1007_v22  ;;  %v1086_v24 = vadd.f32 %v1085_v30, %v6970_v49  ;;  %v1149_v22 = vunpack.c.l.bf16 %v3673_v31  ;;  %v1151_v58 = vunpack.c.l.bf16 %v3674_v51 }
 0x248   : >> { %v1102_v23 = vpack.c.bf16 %v1084_v14, %v1080_v9  ;;  %v1101_v11 = vpack.c.bf16 %v1013_v1, %v1009_v26  ;;  %v1150_v49 = vunpack.c.h.bf16 %v3673_v31  ;;  %v1153_v9 = vunpack.c.l.bf16 %v5619_v4 }
 0x249   : >> { %1121 = vst [vmem:[%s5576_s23 + $0x60] sm:$0xff] %v1100_v8  ;;  %v1103_v7 = vpack.c.bf16 %v1086_v24, %v1082_v39  ;;  %v1155_v26 = vunpack.c.l.bf16 %v5622_v15  ;;  %v1154_v24 = vunpack.c.h.bf16 %v5619_v4  ;;  %v1156_v39 = vunpack.c.h.bf16 %v5622_v15  ;;  %v5643_v15 = vld [vmem:[%s5348_s16 + $0xc0] sm:$0xff] }
 0x24a   : >> { %1123 = vst [vmem:[%s5576_s23 + $0x70] sm:$0xff] %v1102_v23  ;;  %1122 = vst [vmem:[%s5576_s23 + $0x68] sm:$0xff] %v1101_v11  ;;  %v1211_v30 = vpop.f32.mrb[32].mxu0  ;;  %v1157_v25 = vunpack.c.l.bf16 %v5625_v13  ;;  %v1159_v11 = vunpack.c.l.bf16 %v5629_v29  ;;  %v1158_v27 = vunpack.c.h.bf16 %v5625_v13 }
 0x24b   : >> { %1124 = vst [vmem:[%s5576_s23 + $0x78] sm:$0xff] %v1103_v7  ;;  %v1323_v10 = vadd.f32 %v1211_v30, %v1145_v50  ;;  %v1284_v14 = vpop.f32.mrb[32].mxu1  ;;  %v1213_v1 = vpop.f32.mrb[33].mxu0 }
 0x24c   : >> { %v1325_v8 = vadd.f32 %v1284_v14, %v1147_v12  ;;  %v1324_v23 = vadd.f32 %v1213_v1, %v1146_v0  ;;  %v1286_v31 = vpop.f32.mrb[33].mxu1  ;;  %v1215_v51 = vpop.f32.mrb[34].mxu0 }
 0x24d   : >> { %v1355_v7 = vmul.f32 0.5, %v1323_v10  ;;  %v1326_v50 = vadd.f32 %v1286_v31, %v1148_v47  ;;  %v1327_v30 = vadd.f32 %v1215_v51, %v1149_v22  ;;  %v1288_v45 = vpop.f32.mrb[34].mxu1  ;;  %v1217_v4 = vpop.f32.mrb[35].mxu0  ;;  %v5649_v22 = vld [vmem:[%s5348_s16 + $0xd0] sm:$0xff]  ;;  %v5652_v31 = vld [vmem:[%s5348_s16 + $0xd8] sm:$0xff]  ;;  %v1161_v51 = vunpack.c.l.bf16 %v5643_v15 }
 0x24e   : >> { %v1357_v12 = vmul.f32 0.5, %v1325_v8  ;;  %v1356_v0 = vmul.f32 0.5, %v1324_v23  ;;  %v1329_v14 = vadd.f32 %v1288_v45, %v1151_v58  ;;  %v1328_v1 = vadd.f32 %v1217_v4, %v1150_v49  ;;  %v1290_v42 = vpop.f32.mrb[35].mxu1  ;;  %v5659_v58 = vld [vmem:[%s5348_s16 + $0xe0] sm:$0xff]  ;;  %v5667_v49 = vld [vmem:[%s5348_s16 + $0xe8] sm:$0xff] }
 0x24f   : >> { %4177 = vtanh.f32 %v1355_v7  ;;  %v1358_v13 = vmul.f32 0.5, %v1326_v50  ;;  %v1359_v47 = vmul.f32 0.5, %v1327_v30  ;;  %v1330_v10 = vadd.f32 %v1290_v42, %v1152_v28 }
 0x250   : >> { %4179 = vtanh.f32 %v1357_v12  ;;  %v1361_v29 = vmul.f32 0.5, %v1329_v14  ;;  %v1360_v8 = vmul.f32 0.5, %v1328_v1 }
 0x251   : >> { %4181 = vtanh.f32 %v1356_v0  ;;  %v1362_v28 = vmul.f32 0.5, %v1330_v10  ;;  %v5670_v10 = vld [vmem:[%s5348_s16 + $0xf0] sm:$0xff] }
 0x252   : >> { %4183 = vtanh.f32 %v1358_v13  ;;  %v1221_v42 = vpop.f32.mrb[36].mxu0 }
 0x253   : >> { %4185 = vtanh.f32 %v1359_v47  ;;  %v1331_v50 = vadd.f32 %v1221_v42, %v1153_v9  ;;  %v1294_v30 = vpop.f32.mrb[36].mxu1  ;;  %v1223_v4 = vpop.f32.mrb[37].mxu0 }
 0x254   : >> { %4187 = vtanh.f32 %v1361_v29  ;;  %v1333_v14 = vadd.f32 %v1294_v30, %v1155_v26  ;;  %v1332_v1 = vadd.f32 %v1223_v4, %v1154_v24  ;;  %v1296_v45 = vpop.f32.mrb[37].mxu1  ;;  %v1225_v13 = vpop.f32.mrb[38].mxu0 }
 0x255   : >> { %4189 = vtanh.f32 %v1360_v8  ;;  %v1387_v23 = vmul.f32 0.5, %v1331_v50  ;;  %v1334_v7 = vadd.f32 %v1296_v45, %v1156_v39  ;;  %v1335_v47 = vadd.f32 %v1225_v13, %v1157_v25  ;;  %v1298_v9 = vpop.f32.mrb[38].mxu1  ;;  %v1227_v42 = vpop.f32.mrb[39].mxu0  ;;  %v5674_v45 = vld [vmem:[%s5348_s16 + $0xf8] sm:$0xff] }
 0x256   : >> { %4191 = vtanh.f32 %v1362_v28  ;;  %v1389_v12 = vmul.f32 0.5, %v1333_v14  ;;  %v1388_v0 = vmul.f32 0.5, %v1332_v1  ;;  %v1337_v29 = vadd.f32 %v1298_v9, %v1159_v11  ;;  %v1300_v26 = vpop.f32.mrb[39].mxu1 }
 0x257   : >> { %4193 = vtanh.f32 %v1387_v23  ;;  %v1390_v24 = vmul.f32 0.5, %v1334_v7  ;;  %v1391_v30 = vmul.f32 0.5, %v1335_v47  ;;  %v1336_v4 = vadd.f32 %v1227_v42, %v1158_v27 }
 0x258   : >> { %4195 = vtanh.f32 %v1389_v12  ;;  %v1393_v8 = vmul.f32 0.5, %v1337_v29  ;;  %v1338_v39 = vadd.f32 %v1300_v26, %v1160_v17 }
 0x259   : >> { %v4178_v50 = vpop.eup %4177  ;;  %4197 = vtanh.f32 %v1388_v0  ;;  %v1392_v28 = vmul.f32 0.5, %v1336_v4 }
 0x25a   : >> { %v4180_v23 = vpop.eup %4179  ;;  %v1371_v7 = vadd.f32 1.0, %v4178_v50  ;;  %4199 = vtanh.f32 %v1390_v24  ;;  %v1394_v27 = vmul.f32 0.5, %v1338_v39  ;;  %v1231_v1 = vpop.f32.mrb[40].mxu0 }
 0x25b   : >> { %v4182_v13 = vpop.eup %4181  ;;  %v1373_v17 = vadd.f32 1.0, %v4180_v23  ;;  %4201 = vtanh.f32 %v1391_v30  ;;  %v1339_v47 = vadd.f32 %v1231_v1, %v1161_v51  ;;  %v1304_v9 = vpop.f32.mrb[40].mxu1  ;;  %v6971_v30 = vunpack.c.h.bf16 %v5643_v15 }
 0x25c   : >> { %v1233_v42 = vpop.f32.mrb[41].mxu0  ;;  %v4184_v29 = vpop.eup %4183  ;;  %v1372_v26 = vadd.f32 1.0, %v4182_v13  ;;  %4203 = vtanh.f32 %v1393_v8  ;;  %v1341_v4 = vadd.f32 %v1304_v9, %v1163_v37  ;;  %v5686_v13 = vmul.f32 0.5, %v1371_v7 }
 0x25d   : >> { %v1306_v50 = vpop.f32.mrb[41].mxu1  ;;  %v1235_v24 = vpop.f32.mrb[42].mxu0  ;;  %v1374_v12 = vadd.f32 1.0, %v4184_v29  ;;  %4205 = vtanh.f32 %v1392_v28  ;;  %v1340_v51 = vadd.f32 %v1233_v42, %v6971_v30  ;;  %v6972_v37 = vunpack.c.h.bf16 %v5646_v34 }
 0x25e   : >> { %v4186_v11 = vpop.eup %4185  ;;  %v1308_v23 = vpop.f32.mrb[42].mxu1  ;;  %4207 = vtanh.f32 %v1394_v27  ;;  %v5690_v18 = vmul.f32 0.5, %v1373_v17  ;;  %v6973_v15 = vunpack.c.l.bf16 %v5649_v22  ;;  %v5694_v30 = vmul.f32 0.5, %v1372_v26 }
 0x25f   : >> { %v1237_v1 = vpop.f32.mrb[43].mxu0  ;;  %v4188_v14 = vpop.eup %4187  ;;  %v1375_v8 = vadd.f32 1.0, %v4186_v11  ;;  %v1342_v9 = vadd.f32 %v1306_v50, %v6972_v37  ;;  %4209 = vtanh.f32 %v1339_v47  ;;  %v5696_v0 = vmul.f32 0.5, %v1374_v12 }
 0x260   : >> { %v1310_v25 = vpop.f32.mrb[43].mxu1  ;;  %v4190_v39 = vpop.eup %4189  ;;  %v1377_v28 = vadd.f32 1.0, %v4188_v14  ;;  %v1343_v42 = vadd.f32 %v1235_v24, %v6973_v15  ;;  %4211 = vtanh.f32 %v1341_v4  ;;  %v6974_v11 = vunpack.c.l.bf16 %v5652_v31 }
 0x261   : >> { %v4192_v29 = vpop.eup %4191  ;;  %v5700_v27 = vmul.f32 0.5, %v1375_v8  ;;  %v1376_v50 = vadd.f32 1.0, %v4190_v39  ;;  %4213 = vtanh.f32 %v1340_v51  ;;  %v6975_v14 = vunpack.c.h.bf16 %v5649_v22 }
 0x262   : >> { %v1345_v7 = vadd.f32 %v1308_v23, %v6974_v11  ;;  %v4194_v34 = vpop.eup %4193  ;;  %v5704_v37 = vmul.f32 0.5, %v1377_v28  ;;  %4215 = vtanh.f32 %v1342_v9  ;;  %v6976_v12 = vunpack.c.h.bf16 %v5652_v31  ;;  %v1241_v4 = vpop.f32.mrb[44].mxu0 }
 0x263   : >> { %v1344_v17 = vadd.f32 %v1237_v1, %v6975_v14  ;;  %v4196_v47 = vpop.eup %4195  ;;  %v1403_v24 = vadd.f32 1.0, %v4194_v34  ;;  %v1378_v53 = vadd.f32 1.0, %v4192_v29  ;;  %4217 = vtanh.f32 %v1343_v42  ;;  %v1314_v51 = vpop.f32.mrb[44].mxu1 }
 0x264   : >> { %v1346_v26 = vadd.f32 %v1310_v25, %v6976_v12  ;;  %v4198_v15 = vpop.eup %4197  ;;  %v1405_v23 = vadd.f32 1.0, %v4196_v47  ;;  %v6977_v8 = vunpack.c.l.bf16 %v5659_v58  ;;  %v1243_v11 = vpop.f32.mrb[45].mxu0  ;;  %4219 = vtanh.f32 %v1345_v7 }
 0x265   : >> { %v4200_v22 = vpop.eup %4199  ;;  %v1411_v1 = vmul.f32 0.5, %v1403_v24  ;;  %v1404_v14 = vadd.f32 1.0, %v4198_v15  ;;  %v6978_v28 = vunpack.c.l.bf16 %v5667_v49  ;;  %v1316_v34 = vpop.f32.mrb[45].mxu1  ;;  %4221 = vtanh.f32 %v1344_v17 }
 0x266   : >> { %v1347_v39 = vadd.f32 %v1241_v4, %v6977_v8  ;;  %v1245_v31 = vpop.f32.mrb[46].mxu0  ;;  %v4202_v25 = vpop.eup %4201  ;;  %v1413_v12 = vmul.f32 0.5, %v1405_v23  ;;  %v1406_v36 = vadd.f32 1.0, %v4200_v22  ;;  %v1384_v8 = vmul.f32 0.5, %v1376_v50 }
 0x267   : >> { %v1349_v9 = vadd.f32 %v1314_v51, %v6978_v28  ;;  %v1318_v42 = vpop.f32.mrb[46].mxu1  ;;  %v5712_v47 = vpop.f32.mrb[47].mxu0  ;;  %v1412_v48 = vmul.f32 0.5, %v1404_v14  ;;  %v1407_v62 = vadd.f32 1.0, %v4202_v25  ;;  %4223 = vtanh.f32 %v1346_v26 }
 0x268   : >> { %v1427_v29 = vmul.f32 0.5, %v1347_v39  ;;  %v4204_v4 = vpop.eup %4203  ;;  %v1320_v24 = vpop.f32.mrb[47].mxu1  ;;  %v1386_v15 = vmul.f32 0.5, %v1378_v53  ;;  %v1414_v16 = vmul.f32 0.5, %v1406_v36  ;;  %v1459_v23 = vmul.f32 %v1411_v1, %v5462_v40 }
 0x269   : >> { %v4206_v7 = vpop.eup %4205  ;;  %v1409_v51 = vadd.f32 1.0, %v4204_v4  ;;  %v1415_v22 = vmul.f32 0.5, %v1407_v62  ;;  %v1429_v39 = vmul.f32 0.5, %v1349_v9  ;;  %v1461_v59 = vmul.f32 %v1413_v12, %v5466_v54 }
 0x26a   : >> { %4225 = vtanh.f32 %v1427_v29  ;;  %v4208_v28 = vpop.eup %4207  ;;  %v1408_v17 = vadd.f32 1.0, %v4206_v7  ;;  %v6979_v14 = vunpack.c.h.bf16 %v5659_v58  ;;  %v1460_v53 = vmul.f32 %v1412_v48, %v5469_v5 }
 0x26b   : >> { %v4210_v61 = vpop.eup %4209  ;;  %v1417_v46 = vmul.f32 0.5, %v1409_v51  ;;  %v1410_v50 = vadd.f32 1.0, %v4208_v28  ;;  %4227 = vtanh.f32 %v1429_v39  ;;  %v1462_v40 = vmul.f32 %v1414_v16, %v5475_v55 }
 0x26c   : >> { %v1348_v26 = vadd.f32 %v1243_v11, %v6979_v14  ;;  %v4212_v25 = vpop.eup %4211  ;;  %v1416_v36 = vmul.f32 0.5, %v1408_v17  ;;  %v1467_v29 = vmul.f32 %v4210_v61, %v5686_v13  ;;  %v1463_v62 = vmul.f32 %v1415_v22, %v5480_v57 }
 0x26d   : >> { %v4214_v4 = vpop.eup %4213  ;;  %v1469_v1 = vmul.f32 %v4212_v25, %v5690_v18  ;;  %v1465_v12 = vmul.f32 %v1417_v46, %v5486_v35  ;;  %v1418_v58 = vmul.f32 0.5, %v1410_v50  ;;  %v6983_v46 = vunpack.c.h.bf16 %v5667_v49 }
 0x26e   : >> { %v1428_v54 = vmul.f32 0.5, %v1348_v26  ;;  %v4216_v9 = vpop.eup %4215  ;;  %v5724_v11 = vadd.f32 %v1467_v29, %v1459_v23   ;;  %v1468_v5 = vmul.f32 %v4214_v4, %v5694_v30  ;;  %v1464_v61 = vmul.f32 %v1416_v36, %v5489_v60 }
 0x26f   : >> { %v4218_v48 = vpop.eup %4217  ;;  %v5728_v13 = vadd.f32 %v1469_v1, %v1461_v59   ;;  %v1470_v55 = vmul.f32 %v4216_v9, %v5696_v0  ;;  %v1350_v18 = vadd.f32 %v1316_v34, %v6983_v46  ;;  %v6985_v0 = vunpack.c.l.bf16 %v5670_v10 }
 0x270   : >> { %v6980_v51 = vmov %v5724_v11  ;;  %4229 = vtanh.f32 %v1428_v54  ;;  %v4220_v57 = vpop.eup %4219  ;;  %v5732_v9 = vadd.f32 %v1468_v5, %v1460_v53   ;;  %v1471_v35 = vmul.f32 %v4218_v48, %v5700_v27 }
 0x271   : >> { %v6981_v28 = vmov %v5728_v13  ;;  %4231 = vtanh.f32 %v6980_v51  ;;  %v4222_v7 = vpop.eup %4221  ;;  %v5738_v11 = vadd.f32 %v1470_v55, %v1462_v40   ;;  %v1473_v59 = vmul.f32 %v4220_v57, %v5704_v37  ;;  %1693 = vst [vmem:[#allocation4] sm:$0xff] (%p5860_p5), %v6980_v51 }
 0x272   : >> { %v6982_v16 = vmov %v5732_v9  ;;  %4233 = vtanh.f32 %v6981_v28  ;;  %v1351_v30 = vadd.f32 %v1245_v31, %v6985_v0  ;;  %v4224_v23 = vpop.eup %4223  ;;  %v5744_v22 = vadd.f32 %v1471_v35, %v1463_v62   ;;  %1695 = vst [vmem:[#allocation4 + $0x10] sm:$0xff] (%p5860_p5), %v6981_v28 }
 0x273   : >> { %v6984_v60 = vmov %v5738_v11  ;;  %4235 = vtanh.f32 %v6982_v16  ;;  %v1472_v17 = vmul.f32 %v4222_v7, %v1384_v8  ;;  %v6986_v27 = vunpack.c.l.bf16 %v5674_v45  ;;  %1694 = vst [vmem:[#allocation4 + $0x8] sm:$0xff] (%p5860_p5), %v6982_v16 }
 0x274   : >> { %v4226_v34 = vpop.eup %4225  ;;  %v1466_v39 = vmul.f32 %v1418_v58, %v5491_v6  ;;  %v5749_v14 = vadd.f32 %v1473_v59, %v1465_v12   ;;  %v1474_v26 = vmul.f32 %v4224_v23, %v1386_v15  ;;  %4237 = vtanh.f32 %v6984_v60  ;;  %1696 = vst [vmem:[#allocation4 + $0x18] sm:$0xff] (%p5860_p5), %v6984_v60  ;;  %1697 = vst [vmem:[#allocation4 + $0x20] sm:$0xff] (%p5860_p5), %v5744_v22 }
 0x275   : >> { %v1353_v49 = vadd.f32 %v1318_v42, %v6986_v27  ;;  %v5752_v13 = vadd.f32 %v1472_v17, %v1464_v61   ;;  %v1443_v31 = vadd.f32 1.0, %v4226_v34  ;;  %v1430_v25 = vmul.f32 0.5, %v1350_v18  ;;  %v4228_v6 = vpop.eup %4227 }
 0x276   : >> { %v6987_v50 = vmov %v5749_v14  ;;  %v5754_v15 = vadd.f32 %v1474_v26, %v1466_v39   ;;  %v1431_v36 = vmul.f32 0.5, %v1351_v30  ;;  %v6990_v8 = vunpack.c.h.bf16 %v5670_v10 }
 0x277   : >> { %v6988_v37 = vmov %v5752_v13  ;;  %v6991_v42 = vunpack.c.h.bf16 %v5674_v45  ;;  %4239 = vtanh.f32 %v5744_v22  ;;  %v1433_v14 = vmul.f32 0.5, %v1353_v49  ;;  %1699 = vst [vmem:[#allocation4 + $0x30] sm:$0xff] (%p5860_p5), %v6987_v50 }
 0x278   : >> { %v6989_v53 = vmov %v5754_v15  ;;  %v1352_v29 = vadd.f32 %v5712_v47, %v6990_v8  ;;  %4241 = vtanh.f32 %v6987_v50  ;;  %v1451_v40 = vmul.f32 0.5, %v1443_v31  ;;  %1698 = vst [vmem:[#allocation4 + $0x28] sm:$0xff] (%p5860_p5), %v6988_v37 }
 0x279   : >> { %v1354_v4 = vadd.f32 %v1320_v24, %v6991_v42  ;;  %v1445_v62 = vadd.f32 1.0, %v4228_v6  ;;  %4243 = vtanh.f32 %v1430_v25  ;;  %1700 = vst [vmem:[#allocation4 + $0x38] sm:$0xff] (%p5860_p5), %v6989_v53 }
 0x27a   : >> { %v1432_v1 = vmul.f32 0.5, %v1352_v29  ;;  %v4230_v15 = vpop.eup %4229  ;;  %4245 = vtanh.f32 %v1431_v36 }
 0x27b   : >> { %v1434_v54 = vmul.f32 0.5, %v1354_v4  ;;  %v1453_v9 = vmul.f32 0.5, %v1445_v62  ;;  %v4232_v10 = vpop.eup %4231  ;;  %v1444_v12 = vadd.f32 1.0, %v4230_v15  ;;  %4247 = vtanh.f32 %v1433_v14 }
 0x27c   : >> { %v4234_v47 = vpop.eup %4233  ;;  %v5763_v0 = vmul.f32 %v4232_v10, %v1451_v40   ;;  %4249 = vtanh.f32 %v1432_v1 }
 0x27d   : >> { %v4236_v24 = vpop.eup %4235  ;;  %v5765_v58 = vmul.f32 %v4234_v47, %v1453_v9   ;;  %v1452_v11 = vmul.f32 0.5, %v1444_v12  ;;  %4251 = vtanh.f32 %v1434_v54 }
 0x27e   : >> { %v6992_v45 = vmov %v5763_v0  ;;  %4253 = vtanh.f32 %v6988_v37  ;;  %v4238_v5 = vpop.eup %4237 }
 0x27f   : >> { %4255 = vtanh.f32 %v6989_v53  ;;  %v5769_v1 = vmul.f32 %v4236_v24, %v1452_v11   ;;  %1685 = vst [vmem:[#allocation3] sm:$0xff] (%p5860_p5), %v6992_v45  ;;  %1687 = vst [vmem:[#allocation3 + $0x10] sm:$0xff] (%p5860_p5), %v5765_v58 }
 0x281   : >> { %v6993_v48 = vmov %v5769_v1  ;;  %v4240_v61 = vpop.eup %4239 }
 0x282   : >> { %v4242_v13 = vpop.eup %4241  ;;  %1686 = vst [vmem:[#allocation3 + $0x8] sm:$0xff] (%p5860_p5), %v6993_v48 }
 0x283   : >> { %v4244_v55 = vpop.eup %4243 }
 0x284   : >> { %v4246_v57 = vpop.eup %4245  ;;  %v1446_v35 = vadd.f32 1.0, %v4244_v55 }
 0x285   : >> { %v4248_v46 = vpop.eup %4247  ;;  %v1447_v18 = vadd.f32 1.0, %v4246_v57 }
 0x286   : >> { %v4250_v7 = vpop.eup %4249  ;;  %v1454_v59 = vmul.f32 0.5, %v1446_v35  ;;  %v1449_v0 = vadd.f32 1.0, %v4248_v46 }
 0x287   : >> { %v4252_v30 = vpop.eup %4251  ;;  %v1455_v23 = vmul.f32 0.5, %v1447_v18  ;;  %v1448_v17 = vadd.f32 1.0, %v4250_v7 }
 0x288   : >> { %v4254_v27 = vpop.eup %4253  ;;  %v1457_v49 = vmul.f32 0.5, %v1449_v0  ;;  %v1450_v34 = vadd.f32 1.0, %v4252_v30  ;;  %v5771_v39 = vmul.f32 %v4238_v5, %v1454_v59   ;;  %v6998_v30 = vld [vmem:[#allocation32_spill] sm:$0xff] }
 0x289   : >> { %v4256_v26 = vpop.eup %4255  ;;  %v5773_v4 = vmul.f32 %v4240_v61, %v1455_v23   ;;  %v1456_v25 = vmul.f32 0.5, %v1448_v17 }
 0x28a   : >> { %v5775_v6 = vmul.f32 %v4242_v13, %v1457_v49   ;;  %v1458_v8 = vmul.f32 0.5, %v1450_v34  ;;  %v6999_v49 = vld [vmem:[#allocation30_spill] sm:$0xff]  ;;  %1688 = vst [vmem:[#allocation3 + $0x18] sm:$0xff] (%p5860_p5), %v5771_v39 }
 0x28b   : >> { %v6994_v31 = vmov %v5773_v4  ;;  %v5777_v5 = vmul.f32 %v4254_v27, %v1456_v25  }
 0x28c   : >> { %v6995_v36 = vmov %v5775_v6  ;;  %v1499_v42 = vpack.c.bf16 %v6994_v31, %v6992_v45  ;;  %v5781_v7 = vmul.f32 %v4256_v26, %v1458_v8   ;;  %v7000_v26 = vld [vmem:[#allocation29_spill] sm:$0xff]  ;;  %v7001_v8 = vld [vmem:[#allocation34_spill] sm:$0xff]  ;;  %1689 = vst [vmem:[#allocation3 + $0x20] sm:$0xff] (%p5860_p5), %v6994_v31 }
 0x28d   : >> { %v6996_v29 = vmov %v5777_v5  ;;  %v1501_v14 = vpack.c.bf16 %v6995_v36, %v5765_v58  ;;  %1691 = vst [vmem:[#allocation3 + $0x30] sm:$0xff] (%p5860_p5), %v6995_v36 }
 0x28e   : >> { %v6997_v40 = vmov %v5781_v7  ;;  %v1500_v62 = vpack.c.bf16 %v6996_v29, %v6993_v48  ;;  %1690 = vst [vmem:[#allocation3 + $0x28] sm:$0xff] (%p5860_p5), %v6996_v29 }
 0x28f   : >> { %v1502_v4 = vpack.c.bf16 %v6997_v40, %v5771_v39  ;;  %1692 = vst [vmem:[#allocation3 + $0x38] sm:$0xff] (%p5860_p5), %v6997_v40 }
 0x290   : >> { %1503 = vmatprep.subr.bf16.mxu0 %v1500_v62 }
 0x291   : >> { %1576 = vmatprep.subr.bf16.mxu1 %v1502_v4  ;;  %1504 = vmatpush1.bf16.msra.mxu0 %v1499_v42 }
 0x292   : >> { %1577 = vmatpush1.bf16.msra.mxu1 %v1501_v14  ;;  %v7002_v14 = vld [vmem:[#allocation33_spill] sm:$0xff] }
 0x294   : >> { %3695 = vmatmul.mubr.msk.bf16.vlgmr.msra.gmra.mrb[48].mxu0 %vm571_vm0, %v5504_v44 }
 0x295   : >> { %3699 = vmatmul.mubr.msk.bf16.vlgmr.msra.gmra.mrb[48].mxu1 %vm571_vm0, %v5504_v44  ;;  %1545 = vmatprep.mubr.bf16.mxu0 %v6929_v19 }
 0x296   : >> { %1618 = vmatprep.mubr.bf16.mxu1 %v6929_v19 }
 0x29c   : >> { %3696 = vmatmul.mubr.msk.bf16.gmra.mrb[52].mxu0 %vm571_vm0, %v5514_v3 }
 0x29d   : >> { %3700 = vmatmul.mubr.msk.bf16.gmra.mrb[52].mxu1 %vm571_vm0, %v5514_v3  ;;  %1555 = vmatprep.mubr.bf16.mxu0 %v6929_v19 }
 0x29e   : >> { %1628 = vmatprep.mubr.bf16.mxu1 %v6929_v19 }
 0x2a4   : >> { %3697 = vmatmul.mubr.msk.bf16.gmra.mrb[56].mxu0 %vm571_vm0, %v5524_v41 }
 0x2a5   : >> { %3701 = vmatmul.mubr.msk.bf16.gmra.mrb[56].mxu1 %vm571_vm0, %v5524_v41  ;;  %1565 = vmatprep.mubr.bf16.mxu0 %v6929_v19 }
 0x2a6   : >> { %1638 = vmatprep.mubr.bf16.mxu1 %v6929_v19 }
 0x2ac   : >> { %3698 = vmatmul.mubr.msk.bf16.gmra.mrb[60].mxu0 %vm571_vm0, %v5534_v2 }
 0x2ad   : >> { %3702 = vmatmul.mubr.msk.bf16.gmra.mrb[60].mxu1 %vm571_vm0, %v5534_v2 }
 0x367   : >> { %v1537_v44 = vpop.f32.mrb[48].mxu0 }
 0x368   : >> { %v1610_v3 = vpop.f32.mrb[48].mxu1  ;;  %v1539_v6 = vpop.f32.mrb[49].mxu0  ;;  %v1538_v15 = vadd.f32 %v1537_v44, %v5078_v32  ;;  %v7003_v44 = vld [vmem:[#allocation31_spill] sm:$0xff] }
 0x369   : >> { %v1612_v1 = vpop.f32.mrb[49].mxu1  ;;  %v1541_v54 = vpop.f32.mrb[50].mxu0  ;;  %v1611_v10 = vadd.f32 %v1610_v3, %v6938_v38  ;;  %v1540_v12 = vadd.f32 %v1539_v6, %v6939_v63 }
 0x36a   : >> { %v1542_v41 = vadd.f32 %v1541_v54, %v6937_v56  ;;  %v1614_v9 = vpop.f32.mrb[50].mxu1  ;;  %v1543_v19 = vpop.f32.mrb[51].mxu0  ;;  %v1613_v11 = vadd.f32 %v1612_v1, %v6944_v43  ;;  %v7004_v1 = vld [vmem:[#allocation35_spill] sm:$0xff] }
 0x36b   : >> { %v1615_v2 = vadd.f32 %v1614_v9, %v6940_v33  ;;  %v1544_v47 = vadd.f32 %v1543_v19, %v6942_v20  ;;  %v1616_v24 = vpop.f32.mrb[51].mxu1 }
 0x36c   : >> { %v1649_v5 = vpack.c.bf16 %v1542_v41, %v1538_v15  ;;  %v1617_v61 = vadd.f32 %v1616_v24, %v6945_v21  ;;  %v7005_v24 = vld [vmem:[#allocation36_spill] sm:$0xff] }
 0x36d   : >> { %v1651_v13 = vpack.c.bf16 %v1615_v2, %v1611_v10  ;;  %v1650_v55 = vpack.c.bf16 %v1544_v47, %v1540_v12 }
 0x36e   : >> { %3705 = vst [vmem:[%s5576_s23 + $0x80] sm:$0xff] %v1649_v5  ;;  %v1652_v57 = vpack.c.bf16 %v1617_v61, %v1613_v11  ;;  %v7006_v5 = vld [vmem:[#allocation40_spill] sm:$0xff] }
 0x36f   : >> { %3707 = vst [vmem:[%s5576_s23 + $0x90] sm:$0xff] %v1651_v13  ;;  %3706 = vst [vmem:[%s5576_s23 + $0x88] sm:$0xff] %v1650_v55  ;;  %v1547_v35 = vpop.f32.mrb[52].mxu0 }
 0x370   : >> { %3708 = vst [vmem:[%s5576_s23 + $0x98] sm:$0xff] %v1652_v57  ;;  %v1620_v46 = vpop.f32.mrb[52].mxu1  ;;  %v1549_v18 = vpop.f32.mrb[53].mxu0  ;;  %v1548_v0 = vadd.f32 %v1547_v35, %v6947_v52  ;;  %v7007_v57 = vld [vmem:[#allocation38_spill] sm:$0xff] }
 0x371   : >> { %v1622_v7 = vpop.f32.mrb[53].mxu1  ;;  %v1551_v59 = vpop.f32.mrb[54].mxu0  ;;  %v1621_v34 = vadd.f32 %v1620_v46, %v6999_v49  ;;  %v1550_v25 = vadd.f32 %v1549_v18, %v7000_v26  ;;  %v7008_v46 = vld [vmem:[#allocation37_spill] sm:$0xff] }
 0x372   : >> { %v1552_v23 = vadd.f32 %v1551_v59, %v6998_v30  ;;  %v1624_v17 = vpop.f32.mrb[54].mxu1  ;;  %v1553_v27 = vpop.f32.mrb[55].mxu0  ;;  %v1623_v3 = vadd.f32 %v1622_v7, %v7003_v44  ;;  %v7009_v7 = vld [vmem:[#allocation42_spill] sm:$0xff] }
 0x373   : >> { %v1625_v42 = vadd.f32 %v1624_v17, %v7001_v8  ;;  %v1554_v62 = vadd.f32 %v1553_v27, %v7002_v14  ;;  %v1626_v4 = vpop.f32.mrb[55].mxu1  ;;  %v7011_v17 = vld [vmem:[#allocation39_spill] sm:$0xff] }
 0x374   : >> { %v1653_v6 = vpack.c.bf16 %v1552_v23, %v1548_v0  ;;  %v1627_v54 = vadd.f32 %v1626_v4, %v7004_v1  ;;  %v7010_v0 = vld [vmem:[#allocation41_spill] sm:$0xff] }
 0x375   : >> { %v1655_v15 = vpack.c.bf16 %v1625_v42, %v1621_v34  ;;  %v1654_v41 = vpack.c.bf16 %v1554_v62, %v1550_v25  ;;  %v7012_v34 = vld [vmem:[#allocation43_spill] sm:$0xff] }
 0x376   : >> { %3709 = vst [vmem:[%s5576_s23 + $0xa0] sm:$0xff] %v1653_v6  ;;  %v1656_v9 = vpack.c.bf16 %v1627_v54, %v1623_v3  ;;  %v7013_v6 = vld [vmem:[#allocation44_spill] sm:$0xff] }
 0x377   : >> { %3711 = vst [vmem:[%s5576_s23 + $0xb0] sm:$0xff] %v1655_v15  ;;  %3710 = vst [vmem:[%s5576_s23 + $0xa8] sm:$0xff] %v1654_v41  ;;  %v1557_v19 = vpop.f32.mrb[56].mxu0  ;;  %v7014_v54 = vld [vmem:[#allocation48_spill] sm:$0xff] }
 0x378   : >> { %3712 = vst [vmem:[%s5576_s23 + $0xb8] sm:$0xff] %v1656_v9  ;;  %v1630_v10 = vpop.f32.mrb[56].mxu1  ;;  %v1559_v12 = vpop.f32.mrb[57].mxu0  ;;  %v1558_v11 = vadd.f32 %v1557_v19, %v7005_v24  ;;  %v7015_v19 = vld [vmem:[#allocation46_spill] sm:$0xff] }
 0x379   : >> { %v1632_v2 = vpop.f32.mrb[57].mxu1  ;;  %v1561_v47 = vpop.f32.mrb[58].mxu0  ;;  %v1631_v35 = vadd.f32 %v1630_v10, %v7007_v57  ;;  %v1560_v18 = vadd.f32 %v1559_v12, %v7008_v46  ;;  %v7016_v12 = vld [vmem:[#allocation45_spill] sm:$0xff] }
 0x37a   : >> { %v1562_v61 = vadd.f32 %v1561_v47, %v7006_v5  ;;  %v1634_v13 = vpop.f32.mrb[58].mxu1  ;;  %v1563_v55 = vpop.f32.mrb[59].mxu0  ;;  %v1633_v27 = vadd.f32 %v1632_v2, %v7011_v17  ;;  %v7017_v47 = vld [vmem:[#allocation50_spill] sm:$0xff] }
 0x37b   : >> { %v1635_v59 = vadd.f32 %v1634_v13, %v7009_v7  ;;  %v1564_v30 = vadd.f32 %v1563_v55, %v7010_v0  ;;  %v1636_v23 = vpop.f32.mrb[59].mxu1  ;;  %v7019_v13 = vld [vmem:[#allocation47_spill] sm:$0xff]  ;;  %v7037_v0 = vmov %v6992_v45 }
 0x37c   : >> { %v1657_v49 = vpack.c.bf16 %v1562_v61, %v1558_v11  ;;  %v1637_v26 = vadd.f32 %v1636_v23, %v7012_v34  ;;  %v7018_v11 = vld [vmem:[#allocation49_spill] sm:$0xff] }
 0x37d   : >> { %v1659_v25 = vpack.c.bf16 %v1635_v59, %v1631_v35  ;;  %v1658_v8 = vpack.c.bf16 %v1564_v30, %v1560_v18  ;;  %v7020_v35 = vld [vmem:[#allocation51_spill] sm:$0xff] }
 0x37e   : >> { %3713 = vst [vmem:[%s5576_s23 + $0xc0] sm:$0xff] %v1657_v49  ;;  %v1660_v42 = vpack.c.bf16 %v1637_v26, %v1633_v27 }
 0x37f   : >> { %3715 = vst [vmem:[%s5576_s23 + $0xd0] sm:$0xff] %v1659_v25  ;;  %3714 = vst [vmem:[%s5576_s23 + $0xc8] sm:$0xff] %v1658_v8  ;;  %v1567_v14 = vpop.f32.mrb[60].mxu0  ;;  %v7029_v8 = vmov %v6980_v51 }
 0x380   : >> { %3716 = vst [vmem:[%s5576_s23 + $0xd8] sm:$0xff] %v1660_v42  ;;  %v1640_v62 = vpop.f32.mrb[60].mxu1  ;;  %v1569_v4 = vpop.f32.mrb[61].mxu0  ;;  %v1568_v1 = vadd.f32 %v1567_v14, %v7013_v6  ;;  %v7023_v14 = vmov %v6987_v50  ;;  %v7031_v6 = vmov %v6995_v36 }
 0x381   : >> { %v1642_v44 = vpop.f32.mrb[61].mxu1  ;;  %v1571_v3 = vpop.f32.mrb[62].mxu0  ;;  %v1641_v10 = vadd.f32 %v1640_v62, %v7015_v19  ;;  %v1570_v2 = vadd.f32 %v1569_v4, %v7016_v12  ;;  %v7025_v12 = vmov %v5744_v22  ;;  %v7033_v4 = vmov %v6994_v31 }
 0x382   : >> { %v1572_v15 = vadd.f32 %v1571_v3, %v7014_v54  ;;  %v1644_v41 = vpop.f32.mrb[62].mxu1  ;;  %v1573_v9 = vpop.f32.mrb[63].mxu0  ;;  %v1643_v55 = vadd.f32 %v1642_v44, %v7019_v13  ;;  %v7024_v13 = vmov %v6988_v37  ;;  %v7034_v3 = vmov %v5771_v39  ;;  %477 = sbr.rel (!%p5860_p5) target bundleno = 53 (0x35), region = 127 }
 0x383   : >> { %v1645_v24 = vadd.f32 %v1644_v41, %v7017_v47  ;;  %v1574_v5 = vadd.f32 %v1573_v9, %v7018_v11  ;;  %v1646_v61 = vpop.f32.mrb[63].mxu1  ;;  %v7026_v11 = vmov %v6984_v60  ;;  %v7028_v9 = vmov %v6982_v16 }
 0x384   : >> { %v1661_v57 = vpack.c.bf16 %v1572_v15, %v1568_v1  ;;  %v1647_v46 = vadd.f32 %v1646_v61, %v7020_v35  ;;  %v7022_v15 = vmov %v6989_v53  ;;  %v7036_v1 = vmov %v6993_v48 }
 0x385   : >> { %v1663_v18 = vpack.c.bf16 %v1645_v24, %v1641_v10  ;;  %v1662_v7 = vpack.c.bf16 %v1574_v5, %v1570_v2  ;;  %v7027_v10 = vmov %v6981_v28  ;;  %v7032_v5 = vmov %v6996_v29 }
 0x386   : >> { %3717 = vst [vmem:[%s5576_s23 + $0xe0] sm:$0xff] %v1661_v57  ;;  %v1664_v59 = vpack.c.bf16 %v1647_v46, %v1643_v55  ;;  %v7035_v2 = vmov %v5765_v58 }
 0x387   : >> { %3719 = vst [vmem:[%s5576_s23 + $0xf0] sm:$0xff] %v1663_v18  ;;  %3718 = vst [vmem:[%s5576_s23 + $0xe8] sm:$0xff] %v1662_v7  ;;  %v7030_v7 = vmov %v6997_v40 }
 0x388   : >> { %3720 = vst [vmem:[%s5576_s23 + $0xf8] sm:$0xff] %v1664_v59 }
 0x389   : > { %1704 = sbr.rel (%p3721_p6) target bundleno = 2260 (0x8d4), region = 71  ;;  %v1714_v32 = vld [vmem:[#allocation3 + $0x8] sm:$0xff] (!%p3721_p6)  ;;  %v1716_v38 = vld [vmem:[#allocation3 + $0x18] sm:$0xff] (!%p3721_p6)  ;;  %v1713_v20 = vld [vmem:[#allocation3] sm:$0xff] (!%p3721_p6)  ;;  %v4863_v21 = vmov (!%p3721_p6), 0   ;;  %v4864_v45 = vmov (!%p3721_p6), 0.0  }
 0x38a   : > { %v1718_v56 = vld [vmem:[#allocation3 + $0x28] sm:$0xff] (!%p3721_p6)  ;;  %v1720_v33 = vld [vmem:[#allocation3 + $0x38] sm:$0xff] (!%p3721_p6)  ;;  %v1717_v43 = vld [vmem:[#allocation3 + $0x20] sm:$0xff] (!%p3721_p6)  ;;  %1846 = vmatprep.mubr.bf16.mxu0 (!%p3721_p6), %v4863_v21  ;;  %1919 = vmatprep.mubr.bf16.mxu1 (!%p3721_p6), %v4863_v21  ;;  %s6180_s24 = smov (!%p3721_p6), 0  }
 0x38b   : > { %v1778_v63 = vpack.c.bf16 (!%p3721_p6), %v1718_v56, %v1714_v32  ;;  %v1780_v52 = vpack.c.bf16 (!%p3721_p6), %v1720_v33, %v1716_v38  ;;  %v1777_v51 = vpack.c.bf16 (!%p3721_p6), %v1717_v43, %v1713_v20  ;;  %v1715_v28 = vld [vmem:[#allocation3 + $0x10] sm:$0xff] (!%p3721_p6)  ;;  %4257 = vset.pattern.permute.xlu0 (!%p3721_p6), %v4863_v21  ;;  %v5939_v22 = vld [vmem:[%s6815_s5] sm:$0xff] (!%p3721_p6)   ;;  %v5950_v50 = vld [vmem:[%s6815_s5 + $0x8] sm:$0xff] (!%p3721_p6)  }
 0x38c   : > { %v1719_v16 = vld [vmem:[#allocation3 + $0x30] sm:$0xff] (!%p3721_p6)  ;;  %v5972_v53 = vld [vmem:[%s6815_s5 + $0x18] sm:$0xff] (!%p3721_p6)   ;;  %v2137_v58 = vld [vmem:[%s6818_s8] sm:$0xff] (!%p3721_p6) }
 0x38d   : > { %1814 = vmatprep.subr.bf16.mxu0 (!%p3721_p6), %v1778_v63  ;;  %v1779_v60 = vpack.c.bf16 (!%p3721_p6), %v1719_v16, %v1715_v28  ;;  %1887 = vmatprep.subr.bf16.mxu1 (!%p3721_p6), %v1780_v52  ;;  %v5961_v37 = vld [vmem:[%s6815_s5 + $0x10] sm:$0xff] (!%p3721_p6)  }
 0x38e   : > { %1815 = vmatpush1.bf16.msra.mxu0 (!%p3721_p6), %v1777_v51  ;;  %2140 = vperm.xlu0 (!%p3721_p6), %4257, %v2137_v58  }
 0x38f   : > { %1888 = vmatpush1.bf16.msra.mxu1 (!%p3721_p6), %v1779_v60  ;;  %v1729_v48 = vld [vmem:[#allocation2] sm:$0xff] (!%p3721_p6)  ;;  %v1731_v39 = vld [vmem:[#allocation2 + $0x10] sm:$0xff] (!%p3721_p6)  ;;  %v1730_v31 = vld [vmem:[#allocation2 + $0x8] sm:$0xff] (!%p3721_p6) }
 0x390   : > { %v1732_v36 = vld [vmem:[#allocation2 + $0x18] sm:$0xff]  ;;  %v1745_v29 = vunpack.c.l.bf16 %v1729_v48  ;;  %v5981_v40 = vld [vmem:[#allocation2 + $0x20] sm:$0xff]  ;;  %v5983_v0 = vld [vmem:[#allocation2 + $0x30] sm:$0xff]  ;;  %v1747_v30 = vunpack.c.l.bf16 %v1731_v39  ;;  %v1746_v23 = vunpack.c.l.bf16 %v1730_v31  ;;  %v1749_v34 = vunpack.c.h.bf16 %v1729_v48 }
 0x391   : > { %3726 = vmatmul.mubr.msk.bf16.vlgmr.msra.gmra.mrb[0].mxu0 %vm571_vm0, %v5939_v22  ;;  %v5985_v17 = vld [vmem:[#allocation2 + $0x28] sm:$0xff]  ;;  %v5987_v27 = vld [vmem:[#allocation2 + $0x38] sm:$0xff]  ;;  %v1748_v49 = vunpack.c.l.bf16 %v1732_v36  ;;  %v1751_v26 = vunpack.c.h.bf16 %v1731_v39  ;;  %v1750_v8 = vunpack.c.h.bf16 %v1730_v31  ;;  %v1752_v42 = vunpack.c.h.bf16 %v1732_v36  ;;  %v5997_v13 = vld [vmem:[#allocation2 + $0x40] sm:$0xff] }
 0x392   : > { %3730 = vmatmul.mubr.msk.bf16.vlgmr.msra.gmra.mrb[0].mxu1 %vm571_vm0, %v5939_v22  ;;  %1856 = vmatprep.mubr.bf16.mxu0 %v4863_v21  ;;  %v1753_v14 = vunpack.c.l.bf16 %v5981_v40  ;;  %v1755_v62 = vunpack.c.l.bf16 %v5983_v0  ;;  %v1754_v6 = vunpack.c.l.bf16 %v5985_v17  ;;  %v1756_v1 = vunpack.c.l.bf16 %v5987_v27  ;;  %v5999_v55 = vld [vmem:[#allocation2 + $0x50] sm:$0xff]  ;;  %v6001_v59 = vld [vmem:[#allocation2 + $0x48] sm:$0xff]  ;;  %v6003_v32 = vld [vmem:[#allocation2 + $0x58] sm:$0xff] }
 0x393   : > { %1929 = vmatprep.mubr.bf16.mxu1 %v4863_v21  ;;  %v1757_v54 = vunpack.c.h.bf16 %v5981_v40  ;;  %v1759_v10 = vunpack.c.h.bf16 %v5983_v0  ;;  %v1758_v12 = vunpack.c.h.bf16 %v5985_v17  ;;  %v1760_v61 = vunpack.c.h.bf16 %v5987_v27  ;;  %v6009_v16 = vld [vmem:[#allocation2 + $0x60] sm:$0xff] }
 0x394   : > { %v1761_v20 = vunpack.c.l.bf16 %v5997_v13  ;;  %v1763_v43 = vunpack.c.l.bf16 %v5999_v55  ;;  %v1762_v51 = vunpack.c.l.bf16 %v6001_v59  ;;  %v1764_v28 = vunpack.c.l.bf16 %v6003_v32 }
 0x395   : > { %v1765_v58 = vunpack.c.h.bf16 %v5997_v13  ;;  %v1767_v48 = vunpack.c.h.bf16 %v5999_v55  ;;  %v1768_v40 = vunpack.c.h.bf16 %v6003_v32  ;;  %v1773_v17 = vunpack.c.h.bf16 %v6009_v16 }
 0x399   : > { %3727 = vmatmul.mubr.msk.bf16.gmra.mrb[4].mxu0 %vm571_vm0, %v5950_v50 }
 0x39a   : > { %3731 = vmatmul.mubr.msk.bf16.gmra.mrb[4].mxu1 %vm571_vm0, %v5950_v50  ;;  %1866 = vmatprep.mubr.bf16.mxu0 %v4863_v21 }
 0x39b   : > { %1939 = vmatprep.mubr.bf16.mxu1 %v4863_v21 }
 0x3a1   : > { %3728 = vmatmul.mubr.msk.bf16.gmra.mrb[8].mxu0 %vm571_vm0, %v5961_v37 }
 0x3a2   : > { %3732 = vmatmul.mubr.msk.bf16.gmra.mrb[8].mxu1 %vm571_vm0, %v5961_v37  ;;  %1876 = vmatprep.mubr.bf16.mxu0 %v4863_v21 }
 0x3a3   : > { %1949 = vmatprep.mubr.bf16.mxu1 %v4863_v21 }
 0x3a9   : > { %3729 = vmatmul.mubr.msk.bf16.gmra.mrb[12].mxu0 %vm571_vm0, %v5972_v53 }
 0x3aa   : > { %3733 = vmatmul.mubr.msk.bf16.gmra.mrb[12].mxu1 %vm571_vm0, %v5972_v53  ;;  %2210 = vmatprep.mubr.f32.mxu0 %v4864_v45 }
 0x3ab   : > { %2281 = vmatprep.mubr.f32.mxu1 %v4864_v45 }
 0x464   : > { %v1848_v25 = vpop.f32.mrb[0].mxu0 }
 0x465   : > { %v1960_v4 = vadd.f32 %v1848_v25, %v1745_v29  ;;  %v1921_v44 = vpop.f32.mrb[0].mxu1  ;;  %v1850_v3 = vpop.f32.mrb[1].mxu0  ;;  %v1766_v29 = vunpack.c.h.bf16 %v6001_v59 }
 0x466   : > { %v1962_v15 = vadd.f32 %v1921_v44, %v1747_v30  ;;  %v1961_v41 = vadd.f32 %v1850_v3, %v1746_v23  ;;  %v1923_v9 = vpop.f32.mrb[1].mxu1  ;;  %v1852_v19 = vpop.f32.mrb[2].mxu0 }
 0x467   : > { %v1992_v2 = vmul.f32 0.5, %v1960_v4  ;;  %v1963_v47 = vadd.f32 %v1923_v9, %v1748_v49  ;;  %v1964_v24 = vadd.f32 %v1852_v19, %v1749_v34  ;;  %v1925_v11 = vpop.f32.mrb[2].mxu1  ;;  %v1854_v5 = vpop.f32.mrb[3].mxu0  ;;  %v1769_v49 = vunpack.c.l.bf16 %v6009_v16 }
 0x468   : > { %v1994_v57 = vmul.f32 0.5, %v1962_v15  ;;  %v1993_v35 = vmul.f32 0.5, %v1961_v41  ;;  %v1966_v46 = vadd.f32 %v1925_v11, %v1751_v26  ;;  %v1965_v18 = vadd.f32 %v1854_v5, %v1750_v8  ;;  %v1927_v7 = vpop.f32.mrb[3].mxu1  ;;  %v6018_v41 = vld [vmem:[#allocation2 + $0x68] sm:$0xff] }
 0x469   : > { %4262 = vtanh.f32 %v1992_v2  ;;  %v1995_v56 = vmul.f32 0.5, %v1963_v47  ;;  %v1996_v38 = vmul.f32 0.5, %v1964_v24  ;;  %v1967_v63 = vadd.f32 %v1927_v7, %v1752_v42 }
 0x46a   : > { %4264 = vtanh.f32 %v1994_v57  ;;  %v1998_v33 = vmul.f32 0.5, %v1966_v46  ;;  %v1997_v52 = vmul.f32 0.5, %v1965_v18 }
 0x46b   : > { %4266 = vtanh.f32 %v1993_v35  ;;  %v1999_v60 = vmul.f32 0.5, %v1967_v63 }
 0x46c   : > { %4268 = vtanh.f32 %v1995_v56  ;;  %v1858_v45 = vpop.f32.mrb[4].mxu0 }
 0x46d   : > { %4270 = vtanh.f32 %v1996_v38  ;;  %v1968_v39 = vadd.f32 %v1858_v45, %v1753_v14  ;;  %v1931_v31 = vpop.f32.mrb[4].mxu1  ;;  %v1860_v36 = vpop.f32.mrb[5].mxu0  ;;  %v6016_v14 = vld [vmem:[#allocation2 + $0x70] sm:$0xff] }
 0x46e   : > { %4272 = vtanh.f32 %v1998_v33  ;;  %v1970_v0 = vadd.f32 %v1931_v31, %v1755_v62  ;;  %v1969_v30 = vadd.f32 %v1860_v36, %v1754_v6  ;;  %v1933_v23 = vpop.f32.mrb[5].mxu1  ;;  %v1862_v27 = vpop.f32.mrb[6].mxu0  ;;  %v6020_v62 = vld [vmem:[#allocation2 + $0x78] sm:$0xff]  ;;  %v1771_v2 = vunpack.c.l.bf16 %v6016_v14 }
 0x46f   : > { %4274 = vtanh.f32 %v1997_v52  ;;  %v2024_v34 = vmul.f32 0.5, %v1968_v39  ;;  %v1971_v26 = vadd.f32 %v1933_v23, %v1756_v1  ;;  %v1972_v25 = vadd.f32 %v1862_v27, %v1757_v54  ;;  %v1935_v8 = vpop.f32.mrb[6].mxu1  ;;  %v1864_v42 = vpop.f32.mrb[7].mxu0 }
 0x470   : > { %4276 = vtanh.f32 %v1999_v60  ;;  %v2026_v4 = vmul.f32 0.5, %v1970_v0  ;;  %v2025_v44 = vmul.f32 0.5, %v1969_v30  ;;  %v1974_v3 = vadd.f32 %v1935_v8, %v1759_v10  ;;  %v1937_v15 = vpop.f32.mrb[7].mxu1 }
 0x471   : > { %4278 = vtanh.f32 %v2024_v34  ;;  %v2027_v6 = vmul.f32 0.5, %v1971_v26  ;;  %v2028_v9 = vmul.f32 0.5, %v1972_v25  ;;  %v1973_v1 = vadd.f32 %v1864_v42, %v1758_v12 }
 0x472   : > { %4280 = vtanh.f32 %v2026_v4  ;;  %v2030_v54 = vmul.f32 0.5, %v1974_v3  ;;  %v1975_v19 = vadd.f32 %v1937_v15, %v1760_v61  ;;  %v1770_v10 = vunpack.c.l.bf16 %v6018_v41 }
 0x473   : > { %v4263_v47 = vpop.eup %4262  ;;  %4282 = vtanh.f32 %v2025_v44  ;;  %v2029_v24 = vmul.f32 0.5, %v1973_v1  ;;  %v1772_v11 = vunpack.c.l.bf16 %v6020_v62  ;;  %v1775_v38 = vunpack.c.h.bf16 %v6016_v14 }
 0x474   : > { %v4265_v5 = vpop.eup %4264  ;;  %v2008_v57 = vadd.f32 1.0, %v4263_v47  ;;  %4284 = vtanh.f32 %v2027_v6  ;;  %v2031_v35 = vmul.f32 0.5, %v1975_v19  ;;  %v1868_v46 = vpop.f32.mrb[8].mxu0  ;;  %v1774_v39 = vunpack.c.h.bf16 %v6018_v41 }
 0x475   : > { %v4267_v12 = vpop.eup %4266  ;;  %v2010_v18 = vadd.f32 1.0, %v4265_v5  ;;  %4286 = vtanh.f32 %v2028_v9  ;;  %v1976_v61 = vadd.f32 %v1868_v46, %v1761_v20  ;;  %v1941_v7 = vpop.f32.mrb[8].mxu1  ;;  %v1776_v23 = vunpack.c.h.bf16 %v6020_v62 }
 0x476   : > { %v1870_v56 = vpop.f32.mrb[9].mxu0  ;;  %v4269_v63 = vpop.eup %4268  ;;  %v2009_v33 = vadd.f32 1.0, %v4267_v12  ;;  %4288 = vtanh.f32 %v2030_v54  ;;  %v1978_v52 = vadd.f32 %v1941_v7, %v1763_v43  ;;  %v6035_v34 = vmul.f32 0.5, %v2008_v57  ;;  %v1721_v7 = vld [vmem:[#allocation4] sm:$0xff] }
 0x477   : > { %v1943_v60 = vpop.f32.mrb[9].mxu1  ;;  %v1872_v45 = vpop.f32.mrb[10].mxu0  ;;  %v2011_v36 = vadd.f32 1.0, %v4269_v63  ;;  %4290 = vtanh.f32 %v2029_v24  ;;  %v1977_v20 = vadd.f32 %v1870_v56, %v1762_v51  ;;  %v6039_v42 = vmul.f32 0.5, %v2010_v18 }
 0x478   : > { %v4271_v31 = vpop.eup %4270  ;;  %v1945_v0 = vpop.f32.mrb[10].mxu1  ;;  %4292 = vtanh.f32 %v2031_v35  ;;  %v1979_v43 = vadd.f32 %v1943_v60, %v1764_v28  ;;  %v1980_v51 = vadd.f32 %v1872_v45, %v1765_v58  ;;  %v6043_v3 = vmul.f32 0.5, %v2009_v33 }
 0x479   : > { %v1874_v30 = vpop.f32.mrb[11].mxu0  ;;  %v4273_v27 = vpop.eup %4272  ;;  %v2012_v26 = vadd.f32 1.0, %v4271_v31  ;;  %4294 = vtanh.f32 %v1976_v61  ;;  %v6045_v15 = vmul.f32 0.5, %v2011_v36  ;;  %v1982_v6 = vadd.f32 %v1945_v0, %v1767_v48  ;;  %v1723_v31 = vld [vmem:[#allocation4 + $0x10] sm:$0xff] }
 0x47a   : > { %v1947_v25 = vpop.f32.mrb[11].mxu1  ;;  %v4275_v8 = vpop.eup %4274  ;;  %v2014_v4 = vadd.f32 1.0, %v4273_v27  ;;  %4296 = vtanh.f32 %v1978_v52  ;;  %v1981_v54 = vadd.f32 %v1874_v30, %v1766_v29  ;;  %v1722_v27 = vld [vmem:[#allocation4 + $0x8] sm:$0xff] }
 0x47b   : > { %v4277_v44 = vpop.eup %4276  ;;  %v6049_v28 = vmul.f32 0.5, %v2012_v26  ;;  %v2013_v1 = vadd.f32 1.0, %v4275_v8  ;;  %4298 = vtanh.f32 %v1977_v20  ;;  %v1983_v47 = vadd.f32 %v1947_v25, %v1768_v40 }
 0x47c   : > { %v4279_v9 = vpop.eup %4278  ;;  %v6053_v13 = vmul.f32 0.5, %v2014_v4  ;;  %4300 = vtanh.f32 %v1979_v43  ;;  %v1878_v24 = vpop.f32.mrb[12].mxu0  ;;  %v2015_v55 = vadd.f32 1.0, %v4277_v44  ;;  %v1724_v4 = vld [vmem:[#allocation4 + $0x18] sm:$0xff] }
 0x47d   : > { %v4281_v19 = vpop.eup %4280  ;;  %v2040_v58 = vadd.f32 1.0, %v4279_v9  ;;  %4302 = vtanh.f32 %v1980_v51  ;;  %v1984_v57 = vadd.f32 %v1878_v24, %v1769_v49  ;;  %v1951_v35 = vpop.f32.mrb[12].mxu1  ;;  %v2021_v45 = vmul.f32 0.5, %v2013_v1  ;;  %v1725_v51 = vld [vmem:[#allocation4 + $0x20] sm:$0xff] }
 0x47e   : > { %v4283_v5 = vpop.eup %4282  ;;  %v2042_v48 = vadd.f32 1.0, %v4281_v19  ;;  %v1880_v46 = vpop.f32.mrb[13].mxu0  ;;  %4304 = vtanh.f32 %v1982_v6  ;;  %v1986_v18 = vadd.f32 %v1951_v35, %v1771_v2  ;;  %v2023_v30 = vmul.f32 0.5, %v2015_v55  ;;  %v1727_v19 = vld [vmem:[#allocation4 + $0x30] sm:$0xff] }
 0x47f   : > { %v4285_v59 = vpop.eup %4284  ;;  %v2048_v29 = vmul.f32 0.5, %v2040_v58  ;;  %v2041_v12 = vadd.f32 1.0, %v4283_v5  ;;  %v1953_v61 = vpop.f32.mrb[13].mxu1  ;;  %4306 = vtanh.f32 %v1981_v54  ;;  %v2064_v33 = vmul.f32 0.5, %v1984_v57 }
 0x480   : > { %v6061_v32 = vpop.f32.mrb[14].mxu0  ;;  %v4287_v40 = vpop.eup %4286  ;;  %v2050_v56 = vmul.f32 0.5, %v2042_v48  ;;  %v2043_v63 = vadd.f32 1.0, %v4285_v59  ;;  %4308 = vtanh.f32 %v1983_v47  ;;  %v2066_v9 = vmul.f32 0.5, %v1986_v18  ;;  %v1726_v48 = vld [vmem:[#allocation4 + $0x28] sm:$0xff] }
 0x481   : > { %v6063_v52 = vpop.f32.mrb[14].mxu1  ;;  %v6065_v49 = vpop.f32.mrb[15].mxu0  ;;  %v2049_v36 = vmul.f32 0.5, %v2041_v12  ;;  %v2044_v20 = vadd.f32 1.0, %v4287_v40  ;;  %4310 = vtanh.f32 %v2064_v33  ;;  %v2096_v8 = vmul.f32 %v2048_v29, %v1721_v7 }
 0x482   : > { %v4289_v60 = vpop.eup %4288  ;;  %v6067_v2 = vpop.f32.mrb[15].mxu1  ;;  %v2051_v26 = vmul.f32 0.5, %v2043_v63  ;;  %v2098_v54 = vmul.f32 %v2050_v56, %v1723_v31  ;;  %v1985_v24 = vadd.f32 %v1880_v46, %v1770_v10  ;;  %4312 = vtanh.f32 %v2066_v9 }
 0x483   : > { %v4291_v0 = vpop.eup %4290  ;;  %v2046_v43 = vadd.f32 1.0, %v4289_v60  ;;  %v2052_v44 = vmul.f32 0.5, %v2044_v20  ;;  %v2097_v55 = vmul.f32 %v2049_v36, %v1722_v27  ;;  %v1728_v20 = vld [vmem:[#allocation4 + $0x38] sm:$0xff]  ;;  %v1987_v27 = vadd.f32 %v1953_v61, %v1772_v11 }
 0x484   : > { %v4293_v25 = vpop.eup %4292  ;;  %v2045_v6 = vadd.f32 1.0, %v4291_v0  ;;  %v2099_v29 = vmul.f32 %v2051_v26, %v1724_v4  ;;  %v2065_v40 = vmul.f32 0.5, %v1985_v24  ;;  %v1990_v11 = vadd.f32 %v6063_v52, %v1775_v38 }
 0x485   : > { %v4295_v1 = vpop.eup %4294  ;;  %v2054_v58 = vmul.f32 0.5, %v2046_v43  ;;  %v2047_v47 = vadd.f32 1.0, %v4293_v25  ;;  %v2100_v12 = vmul.f32 %v2052_v44, %v1725_v51  ;;  %v1989_v14 = vadd.f32 %v6065_v49, %v1774_v39 }
 0x486   : > { %v4297_v5 = vpop.eup %4296  ;;  %v2053_v57 = vmul.f32 0.5, %v2045_v6  ;;  %v2104_v35 = vmul.f32 %v4295_v1, %v6035_v34  ;;  %4314 = vtanh.f32 %v2065_v40  ;;  %v1991_v38 = vadd.f32 %v6067_v2, %v1776_v23 }
 0x487   : > { %v4299_v59 = vpop.eup %4298  ;;  %v2106_v18 = vmul.f32 %v4297_v5, %v6039_v42  ;;  %v2102_v56 = vmul.f32 %v2054_v58, %v1727_v19  ;;  %v2055_v63 = vmul.f32 0.5, %v2047_v47  ;;  %v2069_v1 = vmul.f32 0.5, %v1989_v14 }
 0x488   : > { %v4301_v7 = vpop.eup %4300  ;;  %v6073_v33 = vadd.f32 %v2104_v35, %v2096_v8   ;;  %v2105_v10 = vmul.f32 %v4299_v59, %v6043_v3  ;;  %v2101_v60 = vmul.f32 %v2053_v57, %v1726_v48 }
 0x489   : > { %v4303_v46 = vpop.eup %4302  ;;  %v6076_v31 = vadd.f32 %v2106_v18, %v2098_v54   ;;  %v2107_v34 = vmul.f32 %v4301_v7, %v6045_v15  ;;  %v1988_v15 = vadd.f32 %v6061_v32, %v1773_v17  ;;  %v2103_v4 = vmul.f32 %v2055_v63, %v1728_v20 }
 0x48a   : > { %v4305_v36 = vpop.eup %4304  ;;  %4316 = vtanh.f32 %v6073_v33  ;;  %v6080_v42 = vadd.f32 %v2105_v10, %v2097_v55   ;;  %v2108_v0 = vmul.f32 %v4303_v46, %v6049_v28  ;;  %v2071_v54 = vmul.f32 0.5, %v1991_v38 }
 0x48b   : > { %v4307_v26 = vpop.eup %4306  ;;  %4318 = vtanh.f32 %v6076_v31  ;;  %v6086_v3 = vadd.f32 %v2107_v34, %v2099_v29   ;;  %v2110_v43 = vmul.f32 %v4305_v36, %v6053_v13  ;;  %v2067_v13 = vmul.f32 0.5, %v1987_v27 }
 0x48c   : > { %v4309_v25 = vpop.eup %4308  ;;  %4320 = vtanh.f32 %v6080_v42  ;;  %v6093_v8 = vadd.f32 %v2108_v0, %v2100_v12   ;;  %v2109_v28 = vmul.f32 %v4307_v26, %v2021_v45  ;;  %v2068_v6 = vmul.f32 0.5, %v1988_v15 }
 0x48d   : > { %v4311_v61 = vpop.eup %4310  ;;  %v6098_v51 = vadd.f32 %v2110_v43, %v2102_v56   ;;  %v2111_v44 = vmul.f32 %v4309_v25, %v2023_v30  ;;  %4322 = vtanh.f32 %v6086_v3  ;;  %v2070_v45 = vmul.f32 0.5, %v1990_v11 }
 0x48e   : > { %v6101_v16 = vadd.f32 %v2109_v28, %v2101_v60   ;;  %v2080_v17 = vadd.f32 1.0, %v4311_v61  ;;  %v4313_v52 = vpop.eup %4312  ;;  %4324 = vtanh.f32 %v6093_v8 }
 0x48f   : > { %v6103_v32 = vadd.f32 %v2111_v44, %v2103_v4   ;;  %4326 = vtanh.f32 %v6098_v51  ;;  %v2082_v9 = vadd.f32 1.0, %v4313_v52  ;;  %v2136_v44 = vld [vmem:[%s6817_s7] sm:$0xff] }
 0x490   : > { %v2088_v30 = vmul.f32 0.5, %v2080_v17  ;;  %4328 = vtanh.f32 %v2067_v13  ;;  %v4315_v19 = vpop.eup %4314  ;;  %v2141_v17 = vpop.permute.xlu0 %2140 }
 0x491   : > { %v2090_v58 = vmul.f32 0.5, %v2082_v9  ;;  %4330 = vtanh.f32 %v2068_v6  ;;  %v2081_v39 = vadd.f32 1.0, %v4315_v19 }
 0x492   : > { %4332 = vtanh.f32 %v2070_v45 }
 0x493   : > { %4334 = vtanh.f32 %v2069_v1  ;;  %v2089_v47 = vmul.f32 0.5, %v2081_v39 }
 0x494   : > { %v4317_v41 = vpop.eup %4316  ;;  %4336 = vtanh.f32 %v2071_v54 }
 0x495   : > { %v4319_v62 = vpop.eup %4318  ;;  %v6113_v49 = vmul.f32 %v4317_v41, %v2088_v30   ;;  %4338 = vtanh.f32 %v6101_v16 }
 0x496   : > { %v4321_v23 = vpop.eup %4320  ;;  %v6115_v2 = vmul.f32 %v4319_v62, %v2090_v58   ;;  %4340 = vtanh.f32 %v6103_v32 }
 0x497   : > { %v4323_v24 = vpop.eup %4322  ;;  %v2129_v5 = vmul.f32 %v4321_v23, %v2089_v47  }
 0x498   : > { %v4325_v55 = vpop.eup %4324 }
 0x499   : > { %v4327_v48 = vpop.eup %4326 }
 0x49a   : > { %v4329_v57 = vpop.eup %4328 }
 0x49b   : > { %v4331_v35 = vpop.eup %4330  ;;  %v2083_v59 = vadd.f32 1.0, %v4329_v57 }
 0x49c   : > { %v4333_v29 = vpop.eup %4332  ;;  %v2084_v12 = vadd.f32 1.0, %v4331_v35 }
 0x49d   : > { %v4335_v18 = vpop.eup %4334  ;;  %v2091_v40 = vmul.f32 0.5, %v2083_v59  ;;  %v2086_v7 = vadd.f32 1.0, %v4333_v29 }
 0x49e   : > { %v4337_v56 = vpop.eup %4336  ;;  %v2092_v63 = vmul.f32 0.5, %v2084_v12  ;;  %v2085_v10 = vadd.f32 1.0, %v4335_v18 }
 0x49f   : > { %v4339_v46 = vpop.eup %4338  ;;  %v2094_v60 = vmul.f32 0.5, %v2086_v7  ;;  %v2087_v34 = vadd.f32 1.0, %v4337_v56  ;;  %v2131_v36 = vmul.f32 %v4323_v24, %v2091_v40  }
 0x4a0   : > { %v4341_v20 = vpop.eup %4340  ;;  %v2132_v0 = vmul.f32 %v4325_v55, %v2092_v63   ;;  %v2093_v27 = vmul.f32 0.5, %v2085_v10 }
 0x4a1   : > { %v2134_v26 = vmul.f32 %v4327_v48, %v2094_v60   ;;  %v2095_v43 = vmul.f32 0.5, %v2087_v34 }
 0x4a2   : > { %v2133_v15 = vmul.f32 %v4339_v46, %v2093_v27   ;;  %v3807_v25 = vpack.c.bf16 %v2132_v0, %v6113_v49 }
 0x4a3   : > { %v2135_v28 = vmul.f32 %v4341_v20, %v2095_v43   ;;  %v3811_v11 = vpack.c.bf16 %v2134_v26, %v6115_v2 }
 0x4a4   : > { %v3805_v61 = vpack.c.bf16 %v2133_v15, %v2129_v5 }
 0x4a5   : > { %v3809_v4 = vpack.c.bf16 %v2135_v28, %v2131_v36 }
 0x4a6   : > { %3806 = vmatprep.subr.bf16.mxu0 %v3805_v61 }
 0x4a7   : > { %3810 = vmatprep.subr.bf16.mxu1 %v3809_v4  ;;  %3808 = vmatpush1.bf16.msra.mxu0 %v3807_v25 }
 0x4a8   : > { %3812 = vmatpush1.bf16.msra.mxu1 %v3811_v11 }
 0x4aa   : > { %3734 = vmatmul.mubr.msk.f32.vlgmr.msra.gmra.mrb[16].mxu0 %vm571_vm0, %v2136_v44 }
 0x4ab   : > { %3735 = vmatmul.mubr.msk.f32.vlgmr.msra.gmra.mrb[16].mxu1 %vm571_vm0, %v2136_v44 }
 0x57d   : > { %v2212_v13 = vpop.f32.mrb[16].mxu0 }
 0x57e   : > { %v2283_v6 = vpop.f32.mrb[16].mxu1  ;;  %v2213_v14 = vadd.f32 %v2212_v13, %v2141_v17  ;;  %v2214_v38 = vpop.f32.mrb[17].mxu0 }
 0x57f   : > { %v2284_v52 = vadd.f32 %v2283_v6, %v2141_v17  ;;  %v2215_v45 = vadd.f32 %v2214_v38, %v2141_v17  ;;  %v2285_v30 = vpop.f32.mrb[17].mxu1 }
 0x580   : > { %2288 = vst [vmem:[%s6819_s9] sm:$0xff] %v2213_v14  ;;  %v2286_v9 = vadd.f32 %v2285_v30, %v2141_v17 }
 0x581   : > { %2290 = vst [vmem:[%s6819_s9 + $0x10] sm:$0xff] %v2284_v52  ;;  %2289 = vst [vmem:[%s6819_s9 + $0x8] sm:$0xff] %v2215_v45 }
 0x582   : > { %2291 = vst [vmem:[%s6819_s9 + $0x18] sm:$0xff] %v2286_v9 }
 0x583 LB: >> { %v2368_v1 = vpack.c.bf16 %v4836_v15, %v4852_v5  ;;  %v2370_v54 = vpack.c.bf16 %v4828_v28, %v4844_v36  ;;  %v2367_v19 = vpack.c.bf16 %v4840_v0, %v4856_v49  ;;  %v2369_v58 = vpack.c.bf16 %v4832_v26, %v4848_v2  ;;  %s3803_s26 = sshll.u32 %s4860_s24, 8  ;;  %s2297_s24 = sadd.s32 1, %s4860_s24   ;;  %s4860_s24 = sphi %s6180_s24, %s2297_s24   ;;  %v4856_v49 = vphi %v6113_v49, %v7060_v49   ;;  %v4852_v5 = vphi %v2129_v5, %v7059_v5   ;;  %v4848_v2 = vphi %v6115_v2, %v7058_v2   ;;  %v4844_v36 = vphi %v2131_v36, %v7057_v36   ;;  %v4840_v0 = vphi %v2132_v0, %v7056_v0   ;;  %v4836_v15 = vphi %v2133_v15, %v7055_v15   ;;  %v4832_v26 = vphi %v2134_v26, %v7054_v26   ;;  %v4828_v28 = vphi %v2135_v28, %v7053_v28   ;;  %v4824_v33 = vphi %v6073_v33, %v7052_v33   ;;  %v4820_v42 = vphi %v6080_v42, %v7051_v42   ;;  %v4816_v31 = vphi %v6076_v31, %v7050_v31   ;;  %v4812_v3 = vphi %v6086_v3, %v7049_v3   ;;  %v4808_v8 = vphi %v6093_v8, %v7048_v8   ;;  %v4804_v16 = vphi %v6101_v16, %v7047_v16   ;;  %v4800_v51 = vphi %v6098_v51, %v7046_v51   ;;  %v4796_v32 = vphi %v6103_v32, %v7045_v32  }
 0x584   : >> { %v4865_v41 = vmov 0   ;;  %s6244_s27 = scalar_lea.vmem [#allocation2], %s3803_s26  ;;  %p6574_p7 = scmp.ge.s32.totalorder %s2297_s24, 34  }
 0x585   : >> { %2371 = vmatprep.subr.bf16.mxu0 %v2368_v1  ;;  %2444 = vmatprep.subr.bf16.mxu1 %v2370_v54  ;;  %v3738_v39 = vld [vmem:[%s6244_s27 + $0x80] sm:$0xff]  ;;  %v3740_v62 = vld [vmem:[%s6244_s27 + $0x90] sm:$0xff]  ;;  %v3739_v49 = vld [vmem:[%s6244_s27 + $0x88] sm:$0xff] }
 0x586   : >> { %2403 = vmatprep.mubr.bf16.mxu0 %v4865_v41  ;;  %2476 = vmatprep.mubr.bf16.mxu1 %v4865_v41  ;;  %v3741_v23 = vld [vmem:[%s6244_s27 + $0x98] sm:$0xff]  ;;  %v6251_v2 = vld [vmem:[%s6244_s27 + $0xa0] sm:$0xff]  ;;  %v2335_v47 = vunpack.c.l.bf16 %v3738_v39  ;;  %v6254_v24 = vld [vmem:[%s6244_s27 + $0xb0] sm:$0xff]  ;;  %v2337_v48 = vunpack.c.l.bf16 %v3740_v62  ;;  %v2336_v57 = vunpack.c.l.bf16 %v3739_v49  ;;  %v2339_v59 = vunpack.c.h.bf16 %v3738_v39 }
 0x587   : >> { %2372 = vmatpush1.bf16.msra.mxu0 %v2367_v19  ;;  %2445 = vmatpush1.bf16.msra.mxu1 %v2369_v58  ;;  %v6257_v5 = vld [vmem:[%s6244_s27 + $0xa8] sm:$0xff]  ;;  %v6260_v55 = vld [vmem:[%s6244_s27 + $0xb8] sm:$0xff]  ;;  %v2338_v35 = vunpack.c.l.bf16 %v3741_v23  ;;  %v2341_v29 = vunpack.c.h.bf16 %v3740_v62  ;;  %v2340_v12 = vunpack.c.h.bf16 %v3739_v49  ;;  %v2342_v18 = vunpack.c.h.bf16 %v3741_v23  ;;  %v6264_v7 = vld [vmem:[%s6244_s27 + $0xc0] sm:$0xff] }
 0x588   : >> { %v2343_v40 = vunpack.c.l.bf16 %v6251_v2  ;;  %v6267_v56 = vld [vmem:[%s6244_s27 + $0xd0] sm:$0xff]  ;;  %v2345_v63 = vunpack.c.l.bf16 %v6254_v24  ;;  %v2344_v10 = vunpack.c.l.bf16 %v6257_v5  ;;  %v2346_v46 = vunpack.c.l.bf16 %v6260_v55  ;;  %v6274_v34 = vld [vmem:[%s6244_s27 + $0xc8] sm:$0xff]  ;;  %v6277_v36 = vld [vmem:[%s6244_s27 + $0xd8] sm:$0xff] }
 0x589   : >> { %v2347_v60 = vunpack.c.h.bf16 %v6251_v2  ;;  %v2349_v20 = vunpack.c.h.bf16 %v6254_v24  ;;  %v2348_v0 = vunpack.c.h.bf16 %v6257_v5  ;;  %v2350_v27 = vunpack.c.h.bf16 %v6260_v55  ;;  %v6291_v58 = vld [vmem:[%s6244_s27 + $0xe0] sm:$0xff]  ;;  %v6294_v39 = vld [vmem:[%s6244_s27 + $0xf0] sm:$0xff] }
 0x58a   : >> { %3754 = vmatmul.mubr.msk.bf16.vlgmr.msra.gmra.mrb[0].mxu0 %vm571_vm0, %v5939_v22  ;;  %3758 = vmatmul.mubr.msk.bf16.vlgmr.msra.gmra.mrb[0].mxu1 %vm571_vm0, %v5939_v22  ;;  %v2351_v26 = vunpack.c.l.bf16 %v6264_v7  ;;  %v2353_v43 = vunpack.c.l.bf16 %v6267_v56  ;;  %v2352_v25 = vunpack.c.l.bf16 %v6274_v34  ;;  %v2354_v28 = vunpack.c.l.bf16 %v6277_v36 }
 0x58b   : >> { %2413 = vmatprep.mubr.bf16.mxu0 %v4865_v41  ;;  %2486 = vmatprep.mubr.bf16.mxu1 %v4865_v41  ;;  %v2355_v11 = vunpack.c.h.bf16 %v6264_v7  ;;  %v2357_v61 = vunpack.c.h.bf16 %v6267_v56  ;;  %v2356_v13 = vunpack.c.h.bf16 %v6274_v34  ;;  %v2358_v6 = vunpack.c.h.bf16 %v6277_v36 }
 0x592   : >> { %3755 = vmatmul.mubr.msk.bf16.gmra.mrb[4].mxu0 %vm571_vm0, %v5950_v50  ;;  %3759 = vmatmul.mubr.msk.bf16.gmra.mrb[4].mxu1 %vm571_vm0, %v5950_v50 }
 0x593   : >> { %2423 = vmatprep.mubr.bf16.mxu0 %v4865_v41  ;;  %2496 = vmatprep.mubr.bf16.mxu1 %v4865_v41 }
 0x59a   : >> { %3756 = vmatmul.mubr.msk.bf16.gmra.mrb[8].mxu0 %vm571_vm0, %v5961_v37  ;;  %3760 = vmatmul.mubr.msk.bf16.gmra.mrb[8].mxu1 %vm571_vm0, %v5961_v37 }
 0x59b   : >> { %2433 = vmatprep.mubr.bf16.mxu0 %v4865_v41  ;;  %2506 = vmatprep.mubr.bf16.mxu1 %v4865_v41 }
 0x5a2   : >> { %3757 = vmatmul.mubr.msk.bf16.gmra.mrb[12].mxu0 %vm571_vm0, %v5972_v53  ;;  %3761 = vmatmul.mubr.msk.bf16.gmra.mrb[12].mxu1 %vm571_vm0, %v5972_v53 }
 0x5a3   : >> { %2781 = vmatprep.mubr.bf16.mxu0 %v4865_v41  ;;  %2854 = vmatprep.mubr.bf16.mxu1 %v4865_v41 }
 0x65d   : >> { %v2405_v15 = vpop.f32.mrb[0].mxu0  ;;  %v2478_v44 = vpop.f32.mrb[0].mxu1 }
 0x65e   : >> { %v2517_v4 = vadd.f32 %v2405_v15, %v2335_v47  ;;  %v2407_v17 = vpop.f32.mrb[1].mxu0  ;;  %v2519_v14 = vadd.f32 %v2478_v44, %v2337_v48  ;;  %v2480_v52 = vpop.f32.mrb[1].mxu1 }
 0x65f   : >> { %v2518_v38 = vadd.f32 %v2407_v17, %v2336_v57  ;;  %v2409_v45 = vpop.f32.mrb[2].mxu0  ;;  %v2520_v9 = vadd.f32 %v2480_v52, %v2338_v35  ;;  %v2482_v54 = vpop.f32.mrb[2].mxu1  ;;  %v6300_v35 = vld [vmem:[%s6244_s27 + $0xf8] sm:$0xff]  ;;  %v2359_v17 = vunpack.c.l.bf16 %v6291_v58  ;;  %v2361_v52 = vunpack.c.l.bf16 %v6294_v39 }
 0x660   : >> { %v2549_v30 = vmul.f32 0.5, %v2517_v4  ;;  %v2521_v1 = vadd.f32 %v2409_v45, %v2339_v59  ;;  %v2411_v19 = vpop.f32.mrb[3].mxu0  ;;  %v2551_v62 = vmul.f32 0.5, %v2519_v14  ;;  %v2523_v23 = vadd.f32 %v2482_v54, %v2341_v29  ;;  %v2484_v15 = vpop.f32.mrb[3].mxu1  ;;  %v6297_v4 = vld [vmem:[%s6244_s27 + $0xe8] sm:$0xff] }
 0x661   : >> { %v2550_v49 = vmul.f32 0.5, %v2518_v38  ;;  %v2522_v47 = vadd.f32 %v2411_v19, %v2340_v12  ;;  %v2552_v48 = vmul.f32 0.5, %v2520_v9  ;;  %v2524_v44 = vadd.f32 %v2484_v15, %v2342_v18 }
 0x662   : >> { %4342 = vtanh.f32 %v2549_v30  ;;  %v2553_v57 = vmul.f32 0.5, %v2521_v1  ;;  %v2555_v59 = vmul.f32 0.5, %v2523_v23  ;;  %v2360_v38 = vunpack.c.l.bf16 %v6297_v4 }
 0x663   : >> { %4344 = vtanh.f32 %v2551_v62  ;;  %v2554_v14 = vmul.f32 0.5, %v2522_v47  ;;  %v2556_v29 = vmul.f32 0.5, %v2524_v44  ;;  %v2362_v45 = vunpack.c.l.bf16 %v6300_v35 }
 0x664   : >> { %4346 = vtanh.f32 %v2550_v49 }
 0x665   : >> { %4348 = vtanh.f32 %v2552_v48  ;;  %v2415_v12 = vpop.f32.mrb[4].mxu0  ;;  %v2488_v30 = vpop.f32.mrb[4].mxu1 }
 0x666   : >> { %4350 = vtanh.f32 %v2553_v57  ;;  %v2525_v18 = vadd.f32 %v2415_v12, %v2343_v40  ;;  %v2417_v9 = vpop.f32.mrb[5].mxu0  ;;  %v2527_v1 = vadd.f32 %v2488_v30, %v2345_v63  ;;  %v2490_v19 = vpop.f32.mrb[5].mxu1 }
 0x667   : >> { %4352 = vtanh.f32 %v2555_v59  ;;  %v2526_v54 = vadd.f32 %v2417_v9, %v2344_v10  ;;  %v2419_v62 = vpop.f32.mrb[6].mxu0  ;;  %v2528_v49 = vadd.f32 %v2490_v19, %v2346_v46  ;;  %v2492_v15 = vpop.f32.mrb[6].mxu1 }
 0x668   : >> { %4354 = vtanh.f32 %v2554_v14  ;;  %v2581_v23 = vmul.f32 0.5, %v2525_v18  ;;  %v2529_v47 = vadd.f32 %v2419_v62, %v2347_v60  ;;  %v2421_v48 = vpop.f32.mrb[7].mxu0  ;;  %v2583_v57 = vmul.f32 0.5, %v2527_v1  ;;  %v2494_v63 = vpop.f32.mrb[7].mxu1 }
 0x669   : >> { %4356 = vtanh.f32 %v2556_v29  ;;  %v2582_v40 = vmul.f32 0.5, %v2526_v54  ;;  %v2531_v44 = vadd.f32 %v2492_v15, %v2349_v20  ;;  %v2584_v10 = vmul.f32 0.5, %v2528_v49 }
 0x66a   : >> { %4358 = vtanh.f32 %v2581_v23  ;;  %v2585_v59 = vmul.f32 0.5, %v2529_v47  ;;  %v2530_v14 = vadd.f32 %v2421_v48, %v2348_v0  ;;  %v2532_v2 = vadd.f32 %v2494_v63, %v2350_v27 }
 0x66b   : >> { %4360 = vtanh.f32 %v2583_v57  ;;  %v2587_v46 = vmul.f32 0.5, %v2531_v44  ;;  %v2363_v20 = vunpack.c.h.bf16 %v6291_v58  ;;  %v2365_v49 = vunpack.c.h.bf16 %v6294_v39 }
 0x66c   : >> { %v4343_v60 = vpop.eup %4342  ;;  %4362 = vtanh.f32 %v2582_v40  ;;  %v2586_v29 = vmul.f32 0.5, %v2530_v14  ;;  %v2588_v18 = vmul.f32 0.5, %v2532_v2  ;;  %v2364_v40 = vunpack.c.h.bf16 %v6297_v4 }
 0x66d   : >> { %v4345_v12 = vpop.eup %4344  ;;  %4364 = vtanh.f32 %v2584_v10  ;;  %v2425_v24 = vpop.f32.mrb[8].mxu0  ;;  %v2565_v9 = vadd.f32 1.0, %v4343_v60 }
 0x66e   : >> { %v4347_v30 = vpop.eup %4346  ;;  %v2567_v1 = vadd.f32 1.0, %v4345_v12  ;;  %4366 = vtanh.f32 %v2585_v59  ;;  %v2533_v5 = vadd.f32 %v2425_v24, %v2351_v26  ;;  %v2498_v0 = vpop.f32.mrb[8].mxu1  ;;  %v2366_v59 = vunpack.c.h.bf16 %v6300_v35 }
 0x66f   : >> { %v2427_v54 = vpop.f32.mrb[9].mxu0  ;;  %v4349_v55 = vpop.eup %4348  ;;  %v2566_v27 = vadd.f32 1.0, %v4347_v30  ;;  %4368 = vtanh.f32 %v2587_v46  ;;  %v2535_v19 = vadd.f32 %v2498_v0, %v2353_v43  ;;  %v6328_v46 = vmul.f32 0.5, %v2565_v9 }
 0x670   : >> { %v2500_v62 = vpop.f32.mrb[9].mxu1  ;;  %v2429_v23 = vpop.f32.mrb[10].mxu0  ;;  %v2568_v15 = vadd.f32 1.0, %v4349_v55  ;;  %4370 = vtanh.f32 %v2586_v29  ;;  %v2534_v48 = vadd.f32 %v2427_v54, %v2352_v25  ;;  %v6330_v2 = vmul.f32 0.5, %v2567_v1 }
 0x671   : >> { %v4351_v47 = vpop.eup %4350  ;;  %v2502_v57 = vpop.f32.mrb[10].mxu1  ;;  %4372 = vtanh.f32 %v2588_v18  ;;  %v2536_v43 = vadd.f32 %v2500_v62, %v2354_v28  ;;  %v2537_v25 = vadd.f32 %v2429_v23, %v2355_v11  ;;  %v6334_v29 = vmul.f32 0.5, %v2566_v27 }
 0x672   : >> { %v2431_v26 = vpop.f32.mrb[11].mxu0  ;;  %v4353_v44 = vpop.eup %4352  ;;  %v2569_v63 = vadd.f32 1.0, %v4351_v47  ;;  %4374 = vtanh.f32 %v2533_v5  ;;  %v6336_v12 = vmul.f32 0.5, %v2568_v15  ;;  %v2539_v28 = vadd.f32 %v2502_v57, %v2357_v61 }
 0x673   : >> { %v2504_v10 = vpop.f32.mrb[11].mxu1  ;;  %v4355_v14 = vpop.eup %4354  ;;  %4376 = vtanh.f32 %v2535_v19  ;;  %v2571_v30 = vadd.f32 1.0, %v4353_v44  ;;  %v2538_v9 = vadd.f32 %v2431_v26, %v2356_v13 }
 0x674   : >> { %v4357_v60 = vpop.eup %4356  ;;  %v6340_v24 = vmul.f32 0.5, %v2569_v63  ;;  %4378 = vtanh.f32 %v2534_v48  ;;  %v2570_v7 = vadd.f32 1.0, %v4355_v14  ;;  %v2540_v5 = vadd.f32 %v2504_v10, %v2358_v6 }
 0x675   : >> { %v4359_v18 = vpop.eup %4358  ;;  %4380 = vtanh.f32 %v2536_v43  ;;  %v2435_v0 = vpop.f32.mrb[12].mxu0  ;;  %v2572_v55 = vadd.f32 1.0, %v4357_v60  ;;  %v2579_v15 = vmul.f32 0.5, %v2571_v30 }
 0x676   : >> { %v4361_v1 = vpop.eup %4360  ;;  %v2597_v11 = vadd.f32 1.0, %v4359_v18  ;;  %4382 = vtanh.f32 %v2537_v25  ;;  %v2541_v61 = vadd.f32 %v2435_v0, %v2359_v17  ;;  %v2508_v27 = vpop.f32.mrb[12].mxu1  ;;  %v2578_v60 = vmul.f32 0.5, %v2570_v7 }
 0x677   : >> { %v4363_v54 = vpop.eup %4362  ;;  %v2599_v56 = vadd.f32 1.0, %v4361_v1  ;;  %v2437_v19 = vpop.f32.mrb[13].mxu0  ;;  %4384 = vtanh.f32 %v2539_v28  ;;  %v2543_v23 = vadd.f32 %v2508_v27, %v2361_v52  ;;  %v2580_v28 = vmul.f32 0.5, %v2572_v55 }
 0x678   : >> { %v4365_v62 = vpop.eup %4364  ;;  %v2605_v34 = vmul.f32 0.5, %v2597_v11  ;;  %v2598_v13 = vadd.f32 1.0, %v4363_v54  ;;  %v2510_v47 = vpop.f32.mrb[13].mxu1  ;;  %4386 = vtanh.f32 %v2538_v9  ;;  %v2621_v10 = vmul.f32 0.5, %v2541_v61 }
 0x679   : >> { %v2439_v36 = vpop.f32.mrb[14].mxu0  ;;  %v4367_v6 = vpop.eup %4366  ;;  %v2607_v48 = vmul.f32 0.5, %v2599_v56  ;;  %v2600_v57 = vadd.f32 1.0, %v4365_v62  ;;  %4388 = vtanh.f32 %v2540_v5  ;;  %v2623_v9 = vmul.f32 0.5, %v2543_v23 }
 0x67a   : >> { %v2512_v26 = vpop.f32.mrb[14].mxu1  ;;  %v6350_v44 = vpop.f32.mrb[15].mxu0  ;;  %v2606_v63 = vmul.f32 0.5, %v2598_v13  ;;  %v2601_v43 = vadd.f32 1.0, %v4367_v6  ;;  %v2653_v30 = vmul.f32 %v4824_v33, %v2605_v34  ;;  %v2542_v5 = vadd.f32 %v2437_v19, %v2360_v38 }
 0x67b   : >> { %v4369_v17 = vpop.eup %4368  ;;  %v2514_v14 = vpop.f32.mrb[15].mxu1  ;;  %v2608_v52 = vmul.f32 0.5, %v2600_v57  ;;  %v2655_v56 = vmul.f32 %v4816_v31, %v2607_v48  ;;  %4390 = vtanh.f32 %v2621_v10  ;;  %v2546_v39 = vadd.f32 %v6350_v44, %v2364_v40 }
 0x67c   : >> { %v4371_v25 = vpop.eup %4370  ;;  %v2603_v18 = vadd.f32 1.0, %v4369_v17  ;;  %v2609_v11 = vmul.f32 0.5, %v2601_v43  ;;  %v2654_v7 = vmul.f32 %v4820_v42, %v2606_v63  ;;  %v2622_v31 = vmul.f32 0.5, %v2542_v5 }
 0x67d   : >> { %v4373_v1 = vpop.eup %4372  ;;  %v2602_v0 = vadd.f32 1.0, %v4371_v25  ;;  %v2656_v33 = vmul.f32 %v4812_v3, %v2608_v52  ;;  %4392 = vtanh.f32 %v2623_v9  ;;  %v2545_v25 = vadd.f32 %v2439_v36, %v2363_v20 }
 0x67e   : >> { %v4375_v54 = vpop.eup %4374  ;;  %v2611_v27 = vmul.f32 0.5, %v2603_v18  ;;  %v2604_v62 = vadd.f32 1.0, %v4373_v1  ;;  %v2657_v34 = vmul.f32 %v4808_v8, %v2609_v11  ;;  %4394 = vtanh.f32 %v2622_v31 }
 0x67f   : >> { %v4377_v61 = vpop.eup %4376  ;;  %v2610_v55 = vmul.f32 0.5, %v2602_v0  ;;  %v2661_v13 = vmul.f32 %v4375_v54, %v6328_v46 }
 0x680   : >> { %v4379_v6 = vpop.eup %4378  ;;  %v2663_v23 = vmul.f32 %v4377_v61, %v6330_v2  ;;  %v2659_v57 = vmul.f32 %v4800_v51, %v2611_v27  ;;  %v2612_v19 = vmul.f32 0.5, %v2604_v62  ;;  %v2544_v51 = vadd.f32 %v2510_v47, %v2362_v45 }
 0x681   : >> { %v4381_v48 = vpop.eup %4380  ;;  %v6362_v17 = vadd.f32 %v2661_v13, %v2653_v30  ;;  %v2662_v38 = vmul.f32 %v4379_v6, %v6334_v29  ;;  %v2658_v46 = vmul.f32 %v4804_v16, %v2610_v55 }
 0x682   : >> { %v4383_v42 = vpop.eup %4382  ;;  %v6366_v63 = vadd.f32 %v2663_v23, %v2655_v56  ;;  %v2664_v3 = vmul.f32 %v4381_v48, %v6336_v12  ;;  %v2660_v45 = vmul.f32 %v4796_v32, %v2612_v19  ;;  %v2624_v20 = vmul.f32 0.5, %v2544_v51 }
 0x683   : >> { %v4385_v8 = vpop.eup %4384  ;;  %v6369_v43 = vadd.f32 %v2662_v38, %v2654_v7  ;;  %v2665_v2 = vmul.f32 %v4383_v42, %v6340_v24  ;;  %4396 = vtanh.f32 %v6362_v17  ;;  %v2547_v24 = vadd.f32 %v2512_v26, %v2365_v49 }
 0x684   : >> { %v4387_v10 = vpop.eup %4386  ;;  %v6375_v29 = vadd.f32 %v2664_v3, %v2656_v33  ;;  %v2667_v16 = vmul.f32 %v4385_v8, %v2579_v15  ;;  %4398 = vtanh.f32 %v6366_v63  ;;  %v2625_v15 = vmul.f32 0.5, %v2545_v25 }
 0x685   : >> { %v4389_v52 = vpop.eup %4388  ;;  %v6380_v12 = vadd.f32 %v2665_v2, %v2657_v34  ;;  %v2666_v18 = vmul.f32 %v4387_v10, %v2578_v60  ;;  %4400 = vtanh.f32 %v6369_v43  ;;  %v2548_v32 = vadd.f32 %v2514_v14, %v2366_v59 }
 0x686   : >> { %v6386_v47 = vadd.f32 %v2667_v16, %v2659_v57  ;;  %v2668_v1 = vmul.f32 %v4389_v52, %v2580_v28  ;;  %4402 = vtanh.f32 %v6375_v29  ;;  %v4391_v49 = vpop.eup %4390  ;;  %v2627_v26 = vmul.f32 0.5, %v2547_v24 }
 0x687   : >> { %v6389_v58 = vadd.f32 %v2666_v18, %v2658_v46  ;;  %4404 = vtanh.f32 %v6380_v12  ;;  %v2626_v60 = vmul.f32 0.5, %v2546_v39  ;;  %v4393_v28 = vpop.eup %4392  ;;  %v2628_v30 = vmul.f32 0.5, %v2548_v32  ;;  %v3766_v39 = vld [vmem:[%s6244_s27 + $0x110] sm:$0xff]  ;;  %v3765_v32 = vld [vmem:[%s6244_s27 + $0x108] sm:$0xff] }
 0x688   : >> { %v6391_v36 = vadd.f32 %v2668_v1, %v2660_v45  ;;  %4406 = vtanh.f32 %v6386_v47  ;;  %v4395_v11 = vpop.eup %4394  ;;  %v2637_v44 = vadd.f32 1.0, %v4391_v49  ;;  %v2639_v9 = vadd.f32 1.0, %v4393_v28  ;;  %v3767_v49 = vld [vmem:[%s6244_s27 + $0x118] sm:$0xff]  ;;  %v6432_v28 = vld [vmem:[%s6244_s27 + $0x130] sm:$0xff] }
 0x689   : >> { %4408 = vtanh.f32 %v2624_v20  ;;  %v2638_v56 = vadd.f32 1.0, %v4395_v11  ;;  %v2714_v11 = vunpack.c.l.bf16 %v3765_v32 }
 0x68a   : >> { %4410 = vtanh.f32 %v2625_v15  ;;  %v2645_v61 = vmul.f32 0.5, %v2637_v44  ;;  %v2647_v13 = vmul.f32 0.5, %v2639_v9  ;;  %v3764_v15 = vld [vmem:[%s6244_s27 + $0x100] sm:$0xff]  ;;  %v2718_v44 = vunpack.c.h.bf16 %v3765_v32 }
 0x68b   : >> { %4412 = vtanh.f32 %v2627_v26  ;;  %v2646_v34 = vmul.f32 0.5, %v2638_v56  ;;  %v2713_v26 = vunpack.c.l.bf16 %v3764_v15 }
 0x68c   : >> { %4414 = vtanh.f32 %v2626_v60  ;;  %v6429_v60 = vld [vmem:[%s6244_s27 + $0x120] sm:$0xff] }
 0x68d   : >> { %v4397_v0 = vpop.eup %4396  ;;  %4416 = vtanh.f32 %v2628_v30  ;;  %v2715_v30 = vunpack.c.l.bf16 %v3766_v39  ;;  %v2721_v9 = vunpack.c.l.bf16 %v6429_v60 }
 0x68e   : >> { %v4399_v4 = vpop.eup %4398  ;;  %4418 = vtanh.f32 %v6389_v58  ;;  %v2685_v19 = vmul.f32 %v4397_v0, %v2645_v61  ;;  %v6435_v0 = vld [vmem:[%s6244_s27 + $0x128] sm:$0xff] }
 0x68f   : >> { %v4401_v40 = vpop.eup %4400  ;;  %4420 = vtanh.f32 %v6391_v36  ;;  %v2687_v2 = vmul.f32 %v4399_v4, %v2647_v13  ;;  %v2716_v4 = vunpack.c.l.bf16 %v3767_v49 }
 0x690   : >> { %v4403_v35 = vpop.eup %4402  ;;  %v2686_v16 = vmul.f32 %v4401_v40, %v2646_v34  ;;  %v2717_v40 = vunpack.c.h.bf16 %v3764_v15  ;;  %v2727_v34 = vunpack.c.h.bf16 %v6432_v28 }
 0x691   : >> { %v4405_v59 = vpop.eup %4404 }
 0x692   : >> { %v4407_v14 = vpop.eup %4406 }
 0x693   : >> { %v4409_v54 = vpop.eup %4408 }
 0x694   : >> { %v4411_v27 = vpop.eup %4410  ;;  %v2640_v62 = vadd.f32 1.0, %v4409_v54  ;;  %v2723_v54 = vunpack.c.l.bf16 %v6432_v28 }
 0x695   : >> { %v4413_v5 = vpop.eup %4412  ;;  %v2641_v7 = vadd.f32 1.0, %v4411_v27 }
 0x696   : >> { %v4415_v55 = vpop.eup %4414  ;;  %v2643_v6 = vadd.f32 1.0, %v4413_v5  ;;  %v2648_v57 = vmul.f32 0.5, %v2640_v62  ;;  %v2722_v5 = vunpack.c.l.bf16 %v6435_v0 }
 0x697   : >> { %v4417_v33 = vpop.eup %4416  ;;  %v2649_v23 = vmul.f32 0.5, %v2641_v7  ;;  %v2642_v31 = vadd.f32 1.0, %v4415_v55  ;;  %v2725_v7 = vunpack.c.h.bf16 %v6429_v60 }
 0x698   : >> { %v4419_v48 = vpop.eup %4418  ;;  %v2651_v38 = vmul.f32 0.5, %v2643_v6  ;;  %v2644_v42 = vadd.f32 1.0, %v4417_v33  ;;  %v2688_v18 = vmul.f32 %v4403_v35, %v2648_v57  ;;  %v2719_v35 = vunpack.c.h.bf16 %v3766_v39 }
 0x699   : >> { %v4421_v46 = vpop.eup %4420  ;;  %v2689_v3 = vmul.f32 %v4405_v59, %v2649_v23  ;;  %v2650_v8 = vmul.f32 0.5, %v2642_v31  ;;  %v2726_v23 = vunpack.c.h.bf16 %v6435_v0 }
 0x69a   : >> { %v2691_v51 = vmul.f32 %v4407_v14, %v2651_v38  ;;  %v2652_v10 = vmul.f32 0.5, %v2644_v42  ;;  %v2720_v14 = vunpack.c.h.bf16 %v3767_v49 }
 0x69b   : >> { %v2690_v25 = vmul.f32 %v4419_v48, %v2650_v8  ;;  %v2745_v52 = vpack.c.bf16 %v2689_v3, %v2685_v19  ;;  %v6449_v19 = vld [vmem:[%s6244_s27 + $0x140] sm:$0xff]  ;;  %v6452_v3 = vld [vmem:[%s6244_s27 + $0x150] sm:$0xff] }
 0x69c   : >> { %v2692_v24 = vmul.f32 %v4421_v46, %v2652_v10  ;;  %v2747_v45 = vpack.c.bf16 %v2691_v51, %v2687_v2  ;;  %v2731_v15 = vunpack.c.l.bf16 %v6452_v3 }
 0x69d   : >> { %v2746_v1 = vpack.c.bf16 %v2690_v25, %v2686_v16  ;;  %v6455_v25 = vld [vmem:[%s6244_s27 + $0x148] sm:$0xff] }
 0x69e   : >> { %v2748_v20 = vpack.c.bf16 %v2692_v24, %v2688_v18  ;;  %v2730_v32 = vunpack.c.l.bf16 %v6455_v25 }
 0x69f   : >> { %2749 = vmatprep.subr.bf16.mxu0 %v2746_v1 }
 0x6a0   : >> { %2822 = vmatprep.subr.bf16.mxu1 %v2748_v20  ;;  %2750 = vmatpush1.bf16.msra.mxu0 %v2745_v52  ;;  %v6458_v52 = vld [vmem:[%s6244_s27 + $0x158] sm:$0xff]  ;;  %v2729_v20 = vunpack.c.l.bf16 %v6449_v19 }
 0x6a1   : >> { %2823 = vmatpush1.bf16.msra.mxu1 %v2747_v45  ;;  %v2732_v49 = vunpack.c.l.bf16 %v6458_v52 }
 0x6a3   : >> { %3780 = vmatmul.mubr.msk.bf16.vlgmr.msra.gmra.mrb[16].mxu0 %vm571_vm0, %v5939_v22 }
 0x6a4   : >> { %3784 = vmatmul.mubr.msk.bf16.vlgmr.msra.gmra.mrb[16].mxu1 %vm571_vm0, %v5939_v22  ;;  %2791 = vmatprep.mubr.bf16.mxu0 %v4865_v41 }
 0x6a5   : >> { %2864 = vmatprep.mubr.bf16.mxu1 %v4865_v41 }
 0x6ab   : >> { %3781 = vmatmul.mubr.msk.bf16.gmra.mrb[20].mxu0 %vm571_vm0, %v5950_v50 }
 0x6ac   : >> { %3785 = vmatmul.mubr.msk.bf16.gmra.mrb[20].mxu1 %vm571_vm0, %v5950_v50  ;;  %2801 = vmatprep.mubr.bf16.mxu0 %v4865_v41 }
 0x6ad   : >> { %2874 = vmatprep.mubr.bf16.mxu1 %v4865_v41 }
 0x6b3   : >> { %3782 = vmatmul.mubr.msk.bf16.gmra.mrb[24].mxu0 %vm571_vm0, %v5961_v37 }
 0x6b4   : >> { %3786 = vmatmul.mubr.msk.bf16.gmra.mrb[24].mxu1 %vm571_vm0, %v5961_v37  ;;  %2811 = vmatprep.mubr.bf16.mxu0 %v4865_v41 }
 0x6b5   : >> { %2884 = vmatprep.mubr.bf16.mxu1 %v4865_v41  ;;  %v6438_v41 = vld [vmem:[%s6244_s27 + $0x138] sm:$0xff] }
 0x6b6   : >> { %v2724_v61 = vunpack.c.l.bf16 %v6438_v41  ;;  %v2728_v46 = vunpack.c.h.bf16 %v6438_v41 }
 0x6bb   : >> { %3783 = vmatmul.mubr.msk.bf16.gmra.mrb[28].mxu0 %vm571_vm0, %v5972_v53 }
 0x6bc   : >> { %3787 = vmatmul.mubr.msk.bf16.gmra.mrb[28].mxu1 %vm571_vm0, %v5972_v53  ;;  %3156 = vmatprep.mubr.bf16.mxu0 (%p6574_p7), %v4863_v21 }
 0x6bd   : > { %3229 = vmatprep.mubr.bf16.mxu1 (%p6574_p7), %v4863_v21 }
 0x776   : >> { %v2783_v59 = vpop.f32.mrb[16].mxu0 }
 0x777   : >> { %v2895_v56 = vadd.f32 %v2783_v59, %v2713_v26  ;;  %v2856_v27 = vpop.f32.mrb[16].mxu1  ;;  %v2785_v62 = vpop.f32.mrb[17].mxu0  ;;  %v6465_v26 = vld [vmem:[%s6244_s27 + $0x160] sm:$0xff]  ;;  %v2736_v59 = vunpack.c.h.bf16 %v6458_v52 }
 0x778   : >> { %v2897_v55 = vadd.f32 %v2856_v27, %v2715_v30  ;;  %v2896_v13 = vadd.f32 %v2785_v62, %v2714_v11  ;;  %v2858_v6 = vpop.f32.mrb[17].mxu1  ;;  %v2787_v33 = vpop.f32.mrb[18].mxu0  ;;  %v2733_v30 = vunpack.c.h.bf16 %v6449_v19  ;;  %v2735_v11 = vunpack.c.h.bf16 %v6452_v3 }
 0x779   : >> { %v2927_v31 = vmul.f32 0.5, %v2895_v56  ;;  %v2898_v48 = vadd.f32 %v2858_v6, %v2716_v4  ;;  %v2899_v57 = vadd.f32 %v2787_v33, %v2717_v40  ;;  %v2860_v38 = vpop.f32.mrb[18].mxu1  ;;  %v2789_v42 = vpop.f32.mrb[19].mxu0  ;;  %v2737_v62 = vunpack.c.l.bf16 %v6465_v26 }
 0x77a   : >> { %v2929_v8 = vmul.f32 0.5, %v2897_v55  ;;  %v2928_v2 = vmul.f32 0.5, %v2896_v13  ;;  %v2901_v51 = vadd.f32 %v2860_v38, %v2719_v35  ;;  %v2900_v10 = vadd.f32 %v2789_v42, %v2718_v44  ;;  %v2862_v16 = vpop.f32.mrb[19].mxu1  ;;  %v6479_v42 = vld [vmem:[%s6244_s27 + $0x178] sm:$0xff] }
 0x77b   : >> { %4422 = vtanh.f32 %v2927_v31  ;;  %v2930_v18 = vmul.f32 0.5, %v2898_v48  ;;  %v2931_v24 = vmul.f32 0.5, %v2899_v57  ;;  %v2902_v45 = vadd.f32 %v2862_v16, %v2720_v14  ;;  %v6473_v31 = vld [vmem:[%s6244_s27 + $0x170] sm:$0xff] }
 0x77c   : >> { %4424 = vtanh.f32 %v2929_v8  ;;  %v2933_v1 = vmul.f32 0.5, %v2901_v51  ;;  %v2932_v39 = vmul.f32 0.5, %v2900_v10  ;;  %v2734_v35 = vunpack.c.h.bf16 %v6455_v25 }
 0x77d   : >> { %4426 = vtanh.f32 %v2928_v2  ;;  %v2934_v60 = vmul.f32 0.5, %v2902_v45  ;;  %v2739_v10 = vunpack.c.l.bf16 %v6473_v31  ;;  %v2741_v0 = vunpack.c.h.bf16 %v6465_v26 }
 0x77e   : >> { %4428 = vtanh.f32 %v2930_v18  ;;  %v2793_v28 = vpop.f32.mrb[20].mxu0 }
 0x77f   : >> { %4430 = vtanh.f32 %v2931_v24  ;;  %v2903_v41 = vadd.f32 %v2793_v28, %v2721_v9  ;;  %v2866_v4 = vpop.f32.mrb[20].mxu1  ;;  %v2795_v40 = vpop.f32.mrb[21].mxu0  ;;  %v2740_v24 = vunpack.c.l.bf16 %v6479_v42 }
 0x780   : >> { %4432 = vtanh.f32 %v2933_v1  ;;  %v2905_v44 = vadd.f32 %v2866_v4, %v2723_v54  ;;  %v2904_v14 = vadd.f32 %v2795_v40, %v2722_v5  ;;  %v2868_v56 = vpop.f32.mrb[21].mxu1  ;;  %v2797_v27 = vpop.f32.mrb[22].mxu0  ;;  %v6476_v5 = vld [vmem:[%s6244_s27 + $0x168] sm:$0xff]  ;;  %v2743_v40 = vunpack.c.h.bf16 %v6473_v31 }
 0x781   : >> { %4434 = vtanh.f32 %v2932_v39  ;;  %v2959_v55 = vmul.f32 0.5, %v2903_v41  ;;  %v2906_v13 = vadd.f32 %v2868_v56, %v2724_v61  ;;  %v2907_v9 = vadd.f32 %v2797_v27, %v2725_v7  ;;  %v2870_v6 = vpop.f32.mrb[22].mxu1  ;;  %v2799_v33 = vpop.f32.mrb[23].mxu0 }
 0x782   : >> { %4436 = vtanh.f32 %v2934_v60  ;;  %v2961_v48 = vmul.f32 0.5, %v2905_v44  ;;  %v2960_v57 = vmul.f32 0.5, %v2904_v14  ;;  %v2909_v38 = vadd.f32 %v2870_v6, %v2727_v34  ;;  %v2872_v54 = vpop.f32.mrb[23].mxu1 }
 0x783   : >> { %4438 = vtanh.f32 %v2959_v55  ;;  %v2962_v8 = vmul.f32 0.5, %v2906_v13  ;;  %v2963_v2 = vmul.f32 0.5, %v2907_v9  ;;  %v2908_v61 = vadd.f32 %v2799_v33, %v2726_v23 }
 0x784   : >> { %4440 = vtanh.f32 %v2961_v48  ;;  %v2965_v7 = vmul.f32 0.5, %v2909_v38  ;;  %v2910_v51 = vadd.f32 %v2872_v54, %v2728_v46  ;;  %v2738_v34 = vunpack.c.l.bf16 %v6476_v5 }
 0x785   : >> { %v4423_v16 = vpop.eup %4422  ;;  %4442 = vtanh.f32 %v2960_v57  ;;  %v2964_v18 = vmul.f32 0.5, %v2908_v61  ;;  %v2742_v13 = vunpack.c.h.bf16 %v6476_v5  ;;  %v2744_v57 = vunpack.c.h.bf16 %v6479_v42 }
 0x786   : >> { %v4425_v45 = vpop.eup %4424  ;;  %v2943_v1 = vadd.f32 1.0, %v4423_v16  ;;  %4444 = vtanh.f32 %v2962_v8  ;;  %v2966_v39 = vmul.f32 0.5, %v2910_v51  ;;  %v2803_v60 = vpop.f32.mrb[24].mxu0 }
 0x787   : >> { %v4427_v23 = vpop.eup %4426  ;;  %v2945_v28 = vadd.f32 1.0, %v4425_v45  ;;  %4446 = vtanh.f32 %v2963_v2  ;;  %v2911_v46 = vadd.f32 %v2803_v60, %v2729_v20  ;;  %v2876_v41 = vpop.f32.mrb[24].mxu1 }
 0x788   : >> { %v2805_v4 = vpop.f32.mrb[25].mxu0  ;;  %v4429_v44 = vpop.eup %4428  ;;  %v2944_v14 = vadd.f32 1.0, %v4427_v23  ;;  %4448 = vtanh.f32 %v2965_v7  ;;  %v2913_v56 = vadd.f32 %v2876_v41, %v2731_v15  ;;  %v6494_v54 = vmul.f32 0.5, %v2943_v1 }
 0x789   : >> { %v2878_v27 = vpop.f32.mrb[25].mxu1  ;;  %v2807_v55 = vpop.f32.mrb[26].mxu0  ;;  %v2946_v6 = vadd.f32 1.0, %v4429_v44  ;;  %4450 = vtanh.f32 %v2964_v18  ;;  %v2912_v20 = vadd.f32 %v2805_v4, %v2730_v32  ;;  %v6498_v7 = vmul.f32 0.5, %v2945_v28 }
 0x78a   : >> { %v4431_v9 = vpop.eup %4430  ;;  %v2880_v33 = vpop.f32.mrb[26].mxu1  ;;  %4452 = vtanh.f32 %v2966_v39  ;;  %v2914_v15 = vadd.f32 %v2878_v27, %v2732_v49  ;;  %v2915_v32 = vadd.f32 %v2807_v55, %v2733_v30  ;;  %v6502_v18 = vmul.f32 0.5, %v2944_v14 }
 0x78b   : >> { %v2809_v48 = vpop.f32.mrb[27].mxu0  ;;  %v4433_v38 = vpop.eup %4432  ;;  %v2947_v8 = vadd.f32 1.0, %v4431_v9  ;;  %4454 = vtanh.f32 %v2911_v46  ;;  %v6504_v45 = vmul.f32 0.5, %v2946_v6  ;;  %v2917_v1 = vadd.f32 %v2880_v33, %v2735_v11 }
 0x78c   : >> { %v2882_v2 = vpop.f32.mrb[27].mxu1  ;;  %v4435_v61 = vpop.eup %4434  ;;  %v2949_v51 = vadd.f32 1.0, %v4433_v38  ;;  %4456 = vtanh.f32 %v2913_v56  ;;  %v2916_v23 = vadd.f32 %v2809_v48, %v2734_v35 }
 0x78d   : >> { %v4437_v16 = vpop.eup %4436  ;;  %v6508_v49 = vmul.f32 0.5, %v2947_v8  ;;  %v2948_v60 = vadd.f32 1.0, %v4435_v61  ;;  %4458 = vtanh.f32 %v2912_v20  ;;  %v2918_v46 = vadd.f32 %v2882_v2, %v2736_v59 }
 0x78e   : >> { %v4439_v39 = vpop.eup %4438  ;;  %v6512_v19 = vmul.f32 0.5, %v2949_v51  ;;  %4460 = vtanh.f32 %v2914_v15  ;;  %v2813_v41 = vpop.f32.mrb[28].mxu0  ;;  %v2950_v3 = vadd.f32 1.0, %v4437_v16 }
 0x78f   : >> { %v4441_v28 = vpop.eup %4440  ;;  %v2975_v30 = vadd.f32 1.0, %v4439_v39  ;;  %4462 = vtanh.f32 %v2915_v32  ;;  %v2919_v44 = vadd.f32 %v2813_v41, %v2737_v62  ;;  %v2886_v14 = vpop.f32.mrb[28].mxu1  ;;  %v2956_v8 = vmul.f32 0.5, %v2948_v60 }
 0x790   : >> { %v4443_v4 = vpop.eup %4442  ;;  %v2977_v11 = vadd.f32 1.0, %v4441_v28  ;;  %v2815_v56 = vpop.f32.mrb[29].mxu0  ;;  %4464 = vtanh.f32 %v2917_v1  ;;  %v2921_v55 = vadd.f32 %v2886_v14, %v2739_v10  ;;  %v2958_v32 = vmul.f32 0.5, %v2950_v3 }
 0x791   : >> { %v4445_v25 = vpop.eup %4444  ;;  %v2983_v35 = vmul.f32 0.5, %v2975_v30  ;;  %v2976_v27 = vadd.f32 1.0, %v4443_v4  ;;  %v2888_v9 = vpop.f32.mrb[29].mxu1  ;;  %4466 = vtanh.f32 %v2916_v23  ;;  %v2999_v33 = vmul.f32 0.5, %v2919_v44 }
 0x792   : >> { %v2817_v52 = vpop.f32.mrb[30].mxu0  ;;  %v4447_v59 = vpop.eup %4446  ;;  %v2985_v6 = vmul.f32 0.5, %v2977_v11  ;;  %v2978_v20 = vadd.f32 1.0, %v4445_v25  ;;  %4468 = vtanh.f32 %v2918_v46  ;;  %v3001_v30 = vmul.f32 0.5, %v2921_v55 }
 0x793   : >> { %v2890_v48 = vpop.f32.mrb[30].mxu1  ;;  %v6520_v38 = vpop.f32.mrb[31].mxu0  ;;  %v2984_v15 = vmul.f32 0.5, %v2976_v27  ;;  %v2979_v2 = vadd.f32 1.0, %v4447_v59  ;;  %4470 = vtanh.f32 %v2999_v33  ;;  %v3031_v39 = vmul.f32 %v2983_v35, %v6362_v17 }
 0x794   : >> { %v4449_v62 = vpop.eup %4448  ;;  %v2892_v61 = vpop.f32.mrb[31].mxu1  ;;  %v2986_v16 = vmul.f32 0.5, %v2978_v20  ;;  %v3033_v4 = vmul.f32 %v2985_v6, %v6366_v63  ;;  %v2920_v46 = vadd.f32 %v2815_v56, %v2738_v34  ;;  %4472 = vtanh.f32 %v3001_v30 }
 0x795   : >> { %v4451_v51 = vpop.eup %4450  ;;  %v2981_v10 = vadd.f32 1.0, %v4449_v62  ;;  %v2987_v28 = vmul.f32 0.5, %v2979_v2  ;;  %v3032_v3 = vmul.f32 %v2984_v15, %v6369_v43  ;;  %v2924_v31 = vadd.f32 %v6520_v38, %v2742_v13 }
 0x796   : >> { %v4453_v1 = vpop.eup %4452  ;;  %v2980_v23 = vadd.f32 1.0, %v4451_v51  ;;  %v3034_v17 = vmul.f32 %v2986_v16, %v6375_v29  ;;  %v3000_v63 = vmul.f32 0.5, %v2920_v46 }
 0x797   : >> { %v4455_v41 = vpop.eup %4454  ;;  %v2989_v11 = vmul.f32 0.5, %v2981_v10  ;;  %v2982_v60 = vadd.f32 1.0, %v4453_v1  ;;  %v3035_v35 = vmul.f32 %v2987_v28, %v6380_v12  ;;  %v3004_v30 = vmul.f32 0.5, %v2924_v31 }
 0x798   : >> { %v4457_v44 = vpop.eup %4456  ;;  %v2988_v14 = vmul.f32 0.5, %v2980_v23  ;;  %v3039_v25 = vmul.f32 %v4455_v41, %v6494_v54  ;;  %4474 = vtanh.f32 %v3000_v63 }
 0x799   : >> { %v4459_v27 = vpop.eup %4458  ;;  %v3041_v55 = vmul.f32 %v4457_v44, %v6498_v7  ;;  %v3037_v6 = vmul.f32 %v2989_v11, %v6386_v47  ;;  %v2990_v20 = vmul.f32 0.5, %v2982_v60 }
 0x79a   : >> { %v4461_v59 = vpop.eup %4460  ;;  %v6532_v33 = vadd.f32 %v3039_v25, %v3031_v39   ;;  %v3040_v43 = vmul.f32 %v4459_v27, %v6502_v18  ;;  %v3036_v54 = vmul.f32 %v2988_v14, %v6389_v58 }
 0x79b   : >> { %v4463_v56 = vpop.eup %4462  ;;  %v6536_v62 = vadd.f32 %v3041_v55, %v3033_v4   ;;  %v3042_v29 = vmul.f32 %v4461_v59, %v6504_v45  ;;  %v2923_v45 = vadd.f32 %v2817_v52, %v2741_v0 }
 0x79c   : >> { %v7038_v34 = vmov %v6532_v33  ;;  %v4465_v12 = vpop.eup %4464  ;;  %v6540_v7 = vadd.f32 %v3040_v43, %v3032_v3   ;;  %v3043_v47 = vmul.f32 %v4463_v56, %v6508_v49  ;;  %v2922_v33 = vadd.f32 %v2888_v9, %v2740_v24 }
 0x79d   : >> { %4476 = vtanh.f32 %v7038_v34  ;;  %v4467_v15 = vpop.eup %4466  ;;  %v6546_v3 = vadd.f32 %v3042_v29, %v3034_v17   ;;  %v3045_v18 = vmul.f32 %v4465_v12, %v6512_v19  ;;  %v2925_v49 = vadd.f32 %v2890_v48, %v2743_v40 }
 0x79e   : >> { %4478 = vtanh.f32 %v6536_v62  ;;  %v4469_v2 = vpop.eup %4468  ;;  %v6552_v51 = vadd.f32 %v3043_v47, %v3035_v35   ;;  %v3044_v16 = vmul.f32 %v4467_v15, %v2956_v8  ;;  %v3038_v9 = vmul.f32 %v2990_v20, %v6391_v36 }
 0x79f   : >> { %v7039_v58 = vmov %v6546_v3  ;;  %4480 = vtanh.f32 %v6540_v7  ;;  %v4471_v24 = vpop.eup %4470  ;;  %v3046_v39 = vmul.f32 %v4469_v2, %v2958_v32  ;;  %v3002_v0 = vmul.f32 0.5, %v2922_v33 }
 0x7a0   : >> { %v7040_v10 = vmov %v6552_v51  ;;  %v6557_v51 = vadd.f32 %v3045_v18, %v3037_v6   ;;  %4482 = vtanh.f32 %v7039_v58  ;;  %v6560_v16 = vadd.f32 %v3044_v16, %v3036_v54   ;;  %v4473_v36 = vpop.eup %4472 }
 0x7a1   : >> { %v3015_v26 = vadd.f32 1.0, %v4471_v24  ;;  %v6562_v32 = vadd.f32 %v3046_v39, %v3038_v9   ;;  %v3003_v28 = vmul.f32 0.5, %v2923_v45  ;;  %v2926_v40 = vadd.f32 %v2892_v61, %v2744_v57 }
 0x7a2   : >> { %v7041_v1 = vmov %v6557_v51  ;;  %v7042_v19 = vmov %v6560_v16  ;;  %4484 = vtanh.f32 %v7040_v10  ;;  %v3005_v48 = vmul.f32 0.5, %v2925_v49 }
 0x7a3   : >> { %v7043_v52 = vmov %v6562_v32  ;;  %4486 = vtanh.f32 %v7041_v1  ;;  %v3023_v8 = vmul.f32 0.5, %v3015_v26  ;;  %v3017_v23 = vadd.f32 1.0, %v4473_v36  ;;  %v4475_v32 = vpop.eup %4474 }
 0x7a4   : >> { %4488 = vtanh.f32 %v3002_v0  ;;  %v3006_v41 = vmul.f32 0.5, %v2926_v40  ;;  %v3016_v11 = vadd.f32 1.0, %v4475_v32  ;;  %v7045_v32 = vmov %v7043_v52 }
 0x7a5   : >> { %v3025_v4 = vmul.f32 0.5, %v3017_v23  ;;  %4490 = vtanh.f32 %v3003_v28  ;;  %v7046_v51 = vmov %v7041_v1  ;;  %v7047_v16 = vmov %v7042_v19 }
 0x7a6   : >> { %4492 = vtanh.f32 %v3005_v48  ;;  %v3024_v61 = vmul.f32 0.5, %v3016_v11  ;;  %v7050_v31 = vmov %v6536_v62  ;;  %v3075_v51 = vld [vmem:[#allocation2 + $0x2298] sm:$0xff] (%p6574_p7) }
 0x7a7   : >> { %v4477_v5 = vpop.eup %4476  ;;  %4494 = vtanh.f32 %v3004_v30  ;;  %v3091_v31 = vunpack.c.l.bf16 (%p6574_p7), %v3075_v51  ;;  %v3095_v32 = vunpack.c.h.bf16 (%p6574_p7), %v3075_v51 }
 0x7a8   : >> { %v4479_v13 = vpop.eup %4478  ;;  %v3063_v38 = vmul.f32 %v4477_v5, %v3023_v8   ;;  %4496 = vtanh.f32 %v3006_v41  ;;  %v7048_v8 = vmov %v7040_v10 }
 0x7a9   : >> { %v4481_v42 = vpop.eup %4480  ;;  %v3065_v57 = vmul.f32 %v4479_v13, %v3025_v4   ;;  %4498 = vtanh.f32 %v7042_v19 }
 0x7aa   : >> { %v4483_v60 = vpop.eup %4482  ;;  %4500 = vtanh.f32 %v7043_v52  ;;  %v3064_v46 = vmul.f32 %v4481_v42, %v3024_v61   ;;  %v7051_v42 = vmov %v6540_v7  ;;  %v7060_v49 = vmov %v3063_v38 }
 0x7ab   : >> { %v7058_v2 = vmov %v3065_v57 }
 0x7ac   : >> { %v4485_v44 = vpop.eup %4484  ;;  %v7059_v5 = vmov %v3064_v46  ;;  %v3073_v2 = vld [vmem:[#allocation2 + $0x2288] sm:$0xff] (%p6574_p7) }
 0x7ad   : >> { %v4487_v3 = vpop.eup %4486  ;;  %v3093_v41 = vunpack.c.h.bf16 (%p6574_p7), %v3073_v2 }
 0x7ae   : >> { %v4489_v14 = vpop.eup %4488 }
 0x7af   : >> { %v4491_v25 = vpop.eup %4490  ;;  %v3018_v27 = vadd.f32 1.0, %v4489_v14 }
 0x7b0   : >> { %v4493_v17 = vpop.eup %4492  ;;  %v3019_v35 = vadd.f32 1.0, %v4491_v25 }
 0x7b1   : >> { %v4495_v55 = vpop.eup %4494  ;;  %v3026_v63 = vmul.f32 0.5, %v3018_v27  ;;  %v3021_v59 = vadd.f32 1.0, %v4493_v17 }
 0x7b2   : >> { %v4497_v6 = vpop.eup %4496  ;;  %v3027_v20 = vmul.f32 0.5, %v3019_v35  ;;  %v3020_v43 = vadd.f32 1.0, %v4495_v55 }
 0x7b3   : >> { %v4499_v56 = vpop.eup %4498  ;;  %v3066_v54 = vmul.f32 %v4483_v60, %v3026_v63   ;;  %v3029_v29 = vmul.f32 0.5, %v3021_v59  ;;  %v3022_v12 = vadd.f32 1.0, %v4497_v6  ;;  %2296 = sbr.rel (!%p6574_p7) target bundleno = 1411 (0x583), region = 138  ;;  %v6660_v6 = vld [vmem:[#allocation2 + $0x22c0] sm:$0xff] (%p6574_p7) }
 0x7b4   : >> { %v4501_v47 = vpop.eup %4500  ;;  %v3067_v18 = vmul.f32 %v4485_v44, %v3027_v20   ;;  %v3028_v33 = vmul.f32 0.5, %v3020_v43  ;;  %v6662_v20 = vld [vmem:[#allocation2 + $0x22d0] sm:$0xff] (%p6574_p7) }
 0x7b5   : >> { %v3069_v45 = vmul.f32 %v4487_v3, %v3029_v29   ;;  %v3030_v15 = vmul.f32 0.5, %v3022_v12  ;;  %v7049_v3 = vmov %v7039_v58  ;;  %v7057_v36 = vmov %v3066_v54  ;;  %v6664_v12 = vld [vmem:[#allocation2 + $0x22c8] sm:$0xff] (%p6574_p7) }
 0x7b6   : >> { %v3068_v24 = vmul.f32 %v4499_v56, %v3028_v33   ;;  %v7052_v33 = vmov %v7038_v34  ;;  %v7056_v0 = vmov %v3067_v18  ;;  %v3120_v40 = vpack.c.bf16 (%p6574_p7), %v3067_v18, %v3063_v38  ;;  %v6650_v36 = vld [vmem:[#allocation2 + $0x22a8] sm:$0xff] (%p6574_p7) }
 0x7b7   : >> { %v3070_v9 = vmul.f32 %v4501_v47, %v3030_v15   ;;  %v7054_v26 = vmov %v3069_v45  ;;  %v3122_v48 = vpack.c.bf16 (%p6574_p7), %v3069_v45, %v3065_v57  ;;  %v6646_v0 = vld [vmem:[#allocation2 + $0x22a0] sm:$0xff] (%p6574_p7)  ;;  %v3097_v57 = vunpack.c.l.bf16 (%p6574_p7), %v6650_v36  ;;  %v6666_v47 = vld [vmem:[#allocation2 + $0x22d8] sm:$0xff] (%p6574_p7) }
 0x7b8   : >> { %v7055_v15 = vmov %v3068_v24  ;;  %v3121_v49 = vpack.c.bf16 (%p6574_p7), %v3068_v24, %v3064_v46  ;;  %v3096_v4 = vunpack.c.l.bf16 (%p6574_p7), %v6646_v0  ;;  %v3100_v14 = vunpack.c.h.bf16 (%p6574_p7), %v6646_v0 }
 0x7b9   : >> { %v7053_v28 = vmov %v3070_v9  ;;  %v3123_v39 = vpack.c.bf16 (%p6574_p7), %v3070_v9, %v3066_v54  ;;  %v3101_v33 = vunpack.c.h.bf16 (%p6574_p7), %v6650_v36  ;;  %v3104_v24 = vunpack.c.l.bf16 (%p6574_p7), %v6660_v6 }
 0x7ba   : > { %3124 = vmatprep.subr.bf16.mxu0 %v3121_v49  ;;  %v6648_v28 = vld [vmem:[#allocation2 + $0x22b0] sm:$0xff]  ;;  %v3106_v9 = vunpack.c.l.bf16 %v6662_v20  ;;  %v3110_v51 = vunpack.c.h.bf16 %v6662_v20 }
 0x7bb   : > { %3197 = vmatprep.subr.bf16.mxu1 %v3123_v39  ;;  %3125 = vmatpush1.bf16.msra.mxu0 %v3120_v40  ;;  %v3098_v5 = vunpack.c.l.bf16 %v6648_v28  ;;  %v3102_v25 = vunpack.c.h.bf16 %v6648_v28  ;;  %v3105_v39 = vunpack.c.l.bf16 %v6664_v12  ;;  %v3107_v40 = vunpack.c.l.bf16 %v6666_v47 }
 0x7bc   : > { %3198 = vmatpush1.bf16.msra.mxu1 %v3122_v48 }
 0x7be   : > { %3788 = vmatmul.mubr.msk.bf16.vlgmr.msra.gmra.mrb[0].mxu0 %vm571_vm0, %v5939_v22 }
 0x7bf   : > { %3792 = vmatmul.mubr.msk.bf16.vlgmr.msra.gmra.mrb[0].mxu1 %vm571_vm0, %v5939_v22  ;;  %3166 = vmatprep.mubr.bf16.mxu0 %v4863_v21  ;;  %v3072_v22 = vld [vmem:[#allocation2 + $0x2280] sm:$0xff] }
 0x7c0   : > { %3239 = vmatprep.mubr.bf16.mxu1 %v4863_v21  ;;  %v3088_v16 = vunpack.c.l.bf16 %v3072_v22  ;;  %v3092_v8 = vunpack.c.h.bf16 %v3072_v22 }
 0x7c6   : > { %3789 = vmatmul.mubr.msk.bf16.gmra.mrb[4].mxu0 %vm571_vm0, %v5950_v50 }
 0x7c7   : > { %3793 = vmatmul.mubr.msk.bf16.gmra.mrb[4].mxu1 %vm571_vm0, %v5950_v50  ;;  %3176 = vmatprep.mubr.bf16.mxu0 %v4863_v21  ;;  %v3074_v50 = vld [vmem:[#allocation2 + $0x2290] sm:$0xff] }
 0x7c8   : > { %3249 = vmatprep.mubr.bf16.mxu1 %v4863_v21  ;;  %v3090_v26 = vunpack.c.l.bf16 %v3074_v50  ;;  %v3094_v23 = vunpack.c.h.bf16 %v3074_v50 }
 0x7ce   : > { %3790 = vmatmul.mubr.msk.bf16.gmra.mrb[8].mxu0 %vm571_vm0, %v5961_v37 }
 0x7cf   : > { %3794 = vmatmul.mubr.msk.bf16.gmra.mrb[8].mxu1 %vm571_vm0, %v5961_v37  ;;  %3186 = vmatprep.mubr.bf16.mxu0 %v4863_v21  ;;  %v3089_v37 = vunpack.c.l.bf16 %v3073_v2  ;;  %v3108_v2 = vunpack.c.h.bf16 %v6660_v6 }
 0x7d0   : > { %3259 = vmatprep.mubr.bf16.mxu1 %v4863_v21  ;;  %v6652_v21 = vld [vmem:[#allocation2 + $0x22b8] sm:$0xff] }
 0x7d1   : > { %v3099_v61 = vunpack.c.l.bf16 %v6652_v21  ;;  %v3103_v45 = vunpack.c.h.bf16 %v6652_v21 }
 0x7d6   : > { %3791 = vmatmul.mubr.msk.bf16.gmra.mrb[12].mxu0 %vm571_vm0, %v5972_v53 }
 0x7d7   : > { %3795 = vmatmul.mubr.msk.bf16.gmra.mrb[12].mxu1 %vm571_vm0, %v5972_v53 }
 0x891   : > { %v3158_v30 = vpop.f32.mrb[0].mxu0 }
 0x892   : > { %v3231_v53 = vpop.f32.mrb[0].mxu1  ;;  %v3270_v11 = vadd.f32 %v3158_v30, %v3088_v16  ;;  %v3160_v38 = vpop.f32.mrb[1].mxu0 }
 0x893   : > { %v3272_v13 = vadd.f32 %v3231_v53, %v3090_v26  ;;  %v3233_v42 = vpop.f32.mrb[1].mxu1  ;;  %v3271_v60 = vadd.f32 %v3160_v38, %v3089_v37  ;;  %v3162_v44 = vpop.f32.mrb[2].mxu0  ;;  %v3109_v37 = vunpack.c.h.bf16 %v6664_v12 }
 0x894   : > { %v3273_v46 = vadd.f32 %v3233_v42, %v3091_v31  ;;  %v3235_v3 = vpop.f32.mrb[2].mxu1  ;;  %v3302_v27 = vmul.f32 0.5, %v3270_v11  ;;  %v3274_v35 = vadd.f32 %v3162_v44, %v3092_v8  ;;  %v3164_v63 = vpop.f32.mrb[3].mxu0 }
 0x895   : > { %v3304_v17 = vmul.f32 0.5, %v3272_v13  ;;  %v3276_v55 = vadd.f32 %v3235_v3, %v3094_v23  ;;  %v3237_v59 = vpop.f32.mrb[3].mxu1  ;;  %v3303_v43 = vmul.f32 0.5, %v3271_v60  ;;  %v3275_v54 = vadd.f32 %v3164_v63, %v3093_v41  ;;  %v6678_v13 = vld [vmem:[#allocation2 + $0x22e0] sm:$0xff] }
 0x896   : > { %v3305_v56 = vmul.f32 0.5, %v3273_v46  ;;  %v3277_v29 = vadd.f32 %v3237_v59, %v3095_v32  ;;  %4502 = vtanh.f32 %v3302_v27  ;;  %v3306_v18 = vmul.f32 0.5, %v3274_v35 }
 0x897   : > { %4504 = vtanh.f32 %v3304_v17  ;;  %v3308_v15 = vmul.f32 0.5, %v3276_v55  ;;  %v3307_v49 = vmul.f32 0.5, %v3275_v54  ;;  %v3111_v23 = vunpack.c.h.bf16 %v6666_v47 }
 0x898   : > { %4506 = vtanh.f32 %v3303_v43  ;;  %v3309_v48 = vmul.f32 0.5, %v3277_v29  ;;  %v3116_v29 = vunpack.c.h.bf16 %v6678_v13 }
 0x899   : > { %4508 = vtanh.f32 %v3305_v56  ;;  %v3168_v22 = vpop.f32.mrb[4].mxu0 }
 0x89a   : > { %v3241_v50 = vpop.f32.mrb[4].mxu1  ;;  %4510 = vtanh.f32 %v3306_v18  ;;  %v3278_v16 = vadd.f32 %v3168_v22, %v3096_v4  ;;  %v3170_v0 = vpop.f32.mrb[5].mxu0  ;;  %v6680_v4 = vld [vmem:[#allocation2 + $0x22f0] sm:$0xff] }
 0x89b   : > { %v3280_v26 = vadd.f32 %v3241_v50, %v3098_v5  ;;  %v3243_v28 = vpop.f32.mrb[5].mxu1  ;;  %4512 = vtanh.f32 %v3308_v15  ;;  %v3279_v31 = vadd.f32 %v3170_v0, %v3097_v57  ;;  %v3172_v21 = vpop.f32.mrb[6].mxu0  ;;  %v6682_v57 = vld [vmem:[#allocation2 + $0x22e8] sm:$0xff]  ;;  %v3114_v27 = vunpack.c.l.bf16 %v6680_v4 }
 0x89c   : > { %v3281_v36 = vadd.f32 %v3243_v28, %v3099_v61  ;;  %v3245_v8 = vpop.f32.mrb[6].mxu1  ;;  %4514 = vtanh.f32 %v3307_v49  ;;  %v3334_v30 = vmul.f32 0.5, %v3278_v16  ;;  %v3282_v41 = vadd.f32 %v3172_v21, %v3100_v14  ;;  %v3174_v32 = vpop.f32.mrb[7].mxu0  ;;  %v6684_v61 = vld [vmem:[#allocation2 + $0x22f8] sm:$0xff] }
 0x89d   : > { %v3336_v53 = vmul.f32 0.5, %v3280_v26  ;;  %v3247_v11 = vpop.f32.mrb[7].mxu1  ;;  %4516 = vtanh.f32 %v3309_v48  ;;  %v3335_v5 = vmul.f32 0.5, %v3279_v31  ;;  %v3284_v42 = vadd.f32 %v3245_v8, %v3102_v25 }
 0x89e   : > { %v3337_v38 = vmul.f32 0.5, %v3281_v36  ;;  %4518 = vtanh.f32 %v3334_v30  ;;  %v3338_v60 = vmul.f32 0.5, %v3282_v41  ;;  %v3283_v46 = vadd.f32 %v3174_v32, %v3101_v33 }
 0x89f   : > { %v3285_v44 = vadd.f32 %v3247_v11, %v3103_v45  ;;  %4520 = vtanh.f32 %v3336_v53  ;;  %v3340_v3 = vmul.f32 0.5, %v3284_v42  ;;  %v3112_v14 = vunpack.c.l.bf16 %v6678_v13 }
 0x8a0   : > { %v4503_v17 = vpop.eup %4502  ;;  %4522 = vtanh.f32 %v3335_v5  ;;  %v3339_v35 = vmul.f32 0.5, %v3283_v46  ;;  %v3113_v55 = vunpack.c.l.bf16 %v6682_v57  ;;  %v3115_v25 = vunpack.c.l.bf16 %v6684_v61 }
 0x8a1   : > { %v4505_v63 = vpop.eup %4504  ;;  %v3318_v59 = vadd.f32 1.0, %v4503_v17  ;;  %4524 = vtanh.f32 %v3337_v38  ;;  %v3341_v43 = vmul.f32 0.5, %v3285_v44  ;;  %v3178_v56 = vpop.f32.mrb[8].mxu0  ;;  %v3118_v48 = vunpack.c.h.bf16 %v6680_v4 }
 0x8a2   : > { %v3251_v54 = vpop.f32.mrb[8].mxu1  ;;  %v4507_v18 = vpop.eup %4506  ;;  %v3320_v33 = vadd.f32 1.0, %v4505_v63  ;;  %4526 = vtanh.f32 %v3338_v60  ;;  %v3286_v45 = vadd.f32 %v3178_v56, %v3104_v24  ;;  %v3117_v28 = vunpack.c.h.bf16 %v6682_v57 }
 0x8a3   : > { %v3180_v15 = vpop.f32.mrb[9].mxu0  ;;  %v3253_v49 = vpop.f32.mrb[9].mxu1  ;;  %v3319_v50 = vadd.f32 1.0, %v4507_v18  ;;  %4528 = vtanh.f32 %v3340_v3  ;;  %v3288_v16 = vadd.f32 %v3251_v54, %v3106_v9  ;;  %v3119_v30 = vunpack.c.h.bf16 %v6684_v61 }
 0x8a4   : > { %v4509_v22 = vpop.eup %4508  ;;  %v3182_v26 = vpop.f32.mrb[10].mxu0  ;;  %4530 = vtanh.f32 %v3339_v35  ;;  %v3287_v24 = vadd.f32 %v3180_v15, %v3105_v39  ;;  %v6698_v41 = vmul.f32 0.5, %v3318_v59  ;;  %v3289_v9 = vadd.f32 %v3253_v49, %v3107_v40 }
 0x8a5   : > { %v3255_v0 = vpop.f32.mrb[10].mxu1  ;;  %v4511_v31 = vpop.eup %4510  ;;  %v3321_v36 = vadd.f32 1.0, %v4509_v22  ;;  %4532 = vtanh.f32 %v3341_v43  ;;  %v6702_v5 = vmul.f32 0.5, %v3320_v33  ;;  %v3290_v39 = vadd.f32 %v3182_v26, %v3108_v2 }
 0x8a6   : > { %v3184_v21 = vpop.f32.mrb[11].mxu0  ;;  %v3257_v8 = vpop.f32.mrb[11].mxu1  ;;  %v3322_v32 = vadd.f32 1.0, %v4511_v31  ;;  %4534 = vtanh.f32 %v3286_v45  ;;  %v6706_v60 = vmul.f32 0.5, %v3319_v50  ;;  %v3292_v44 = vadd.f32 %v3255_v0, %v3110_v51 }
 0x8a7   : > { %v4513_v53 = vpop.eup %4512  ;;  %v6708_v46 = vmul.f32 0.5, %v3321_v36  ;;  %4536 = vtanh.f32 %v3288_v16  ;;  %v3291_v35 = vadd.f32 %v3184_v21, %v3109_v37  ;;  %v3293_v59 = vadd.f32 %v3257_v8, %v3111_v23 }
 0x8a8   : > { %v4515_v11 = vpop.eup %4514  ;;  %v3324_v38 = vadd.f32 1.0, %v4513_v53  ;;  %v6712_v17 = vmul.f32 0.5, %v3322_v32  ;;  %4538 = vtanh.f32 %v3287_v24 }
 0x8a9   : > { %v4517_v42 = vpop.eup %4516  ;;  %v3323_v40 = vadd.f32 1.0, %v4515_v11  ;;  %4540 = vtanh.f32 %v3289_v9  ;;  %v3188_v43 = vpop.f32.mrb[12].mxu0 }
 0x8aa   : > { %v4519_v3 = vpop.eup %4518  ;;  %v6716_v6 = vmul.f32 0.5, %v3324_v38  ;;  %v3261_v56 = vpop.f32.mrb[12].mxu1  ;;  %v3325_v51 = vadd.f32 1.0, %v4517_v42  ;;  %4542 = vtanh.f32 %v3290_v39  ;;  %v3294_v18 = vadd.f32 %v3188_v43, %v3112_v14 }
 0x8ab   : > { %v4521_v63 = vpop.eup %4520  ;;  %v3350_v2 = vadd.f32 1.0, %v4519_v3  ;;  %v3190_v33 = vpop.f32.mrb[13].mxu0  ;;  %4544 = vtanh.f32 %v3292_v44  ;;  %v3296_v49 = vadd.f32 %v3261_v56, %v3114_v27  ;;  %v3331_v36 = vmul.f32 0.5, %v3323_v40 }
 0x8ac   : > { %v4523_v20 = vpop.eup %4522  ;;  %v3352_v54 = vadd.f32 1.0, %v4521_v63  ;;  %v3263_v12 = vpop.f32.mrb[13].mxu1  ;;  %4546 = vtanh.f32 %v3291_v35  ;;  %v3374_v26 = vmul.f32 0.5, %v3294_v18  ;;  %v3333_v53 = vmul.f32 0.5, %v3325_v51 }
 0x8ad   : > { %v4525_v37 = vpop.eup %4524  ;;  %v3358_v45 = vmul.f32 0.5, %v3350_v2  ;;  %v3351_v15 = vadd.f32 1.0, %v4523_v20  ;;  %v3192_v47 = vpop.f32.mrb[14].mxu0  ;;  %4548 = vtanh.f32 %v3293_v59  ;;  %v3376_v42 = vmul.f32 0.5, %v3296_v49 }
 0x8ae   : > { %v6724_v23 = vpop.f32.mrb[14].mxu1  ;;  %v4527_v22 = vpop.eup %4526  ;;  %v3360_v50 = vmul.f32 0.5, %v3352_v54  ;;  %v3353_v16 = vadd.f32 1.0, %v4525_v37  ;;  %4550 = vtanh.f32 %v3374_v26  ;;  %v3295_v40 = vadd.f32 %v3190_v33, %v3113_v55 }
 0x8af   : > { %v6726_v0 = vpop.f32.mrb[15].mxu0  ;;  %v6728_v14 = vpop.f32.mrb[15].mxu1  ;;  %v3359_v24 = vmul.f32 0.5, %v3351_v15  ;;  %v3354_v21 = vadd.f32 1.0, %v4527_v22  ;;  %v3406_v11 = vmul.f32 %v3358_v45, %v7038_v34  ;;  %4552 = vtanh.f32 %v3376_v42 }
 0x8b0   : > { %v4529_v31 = vpop.eup %4528  ;;  %v3361_v27 = vmul.f32 0.5, %v3353_v16  ;;  %v3408_v3 = vmul.f32 %v3360_v50, %v6536_v62  ;;  %v3375_v62 = vmul.f32 0.5, %v3295_v40  ;;  %v3298_v22 = vadd.f32 %v3192_v47, %v3116_v29 }
 0x8b1   : > { %v4531_v8 = vpop.eup %4530  ;;  %v3356_v32 = vadd.f32 1.0, %v4529_v31  ;;  %v3362_v38 = vmul.f32 0.5, %v3354_v21  ;;  %v3407_v59 = vmul.f32 %v3359_v24, %v6540_v7 }
 0x8b2   : > { %v4533_v9 = vpop.eup %4532  ;;  %v3355_v39 = vadd.f32 1.0, %v4531_v8  ;;  %v3409_v34 = vmul.f32 %v3361_v27, %v7039_v58  ;;  %4554 = vtanh.f32 %v3375_v62 }
 0x8b3   : > { %v4535_v44 = vpop.eup %4534  ;;  %v3364_v35 = vmul.f32 0.5, %v3356_v32  ;;  %v3357_v63 = vadd.f32 1.0, %v4533_v9  ;;  %v3410_v51 = vmul.f32 %v3362_v38, %v7040_v10 }
 0x8b4   : > { %v4537_v2 = vpop.eup %4536  ;;  %v3363_v43 = vmul.f32 0.5, %v3355_v39  ;;  %v3414_v56 = vmul.f32 %v4535_v44, %v6698_v41 }
 0x8b5   : > { %v4539_v20 = vpop.eup %4538  ;;  %v3416_v54 = vmul.f32 %v4537_v2, %v6702_v5  ;;  %v3412_v37 = vmul.f32 %v3364_v35, %v7041_v1  ;;  %v3365_v45 = vmul.f32 0.5, %v3357_v63  ;;  %v3297_v5 = vadd.f32 %v3263_v12, %v3115_v25 }
 0x8b6   : > { %v4541_v18 = vpop.eup %4540  ;;  %v3422_v55 = vadd.f32 %v3414_v56, %v3406_v11  ;;  %v3415_v33 = vmul.f32 %v4539_v20, %v6706_v60  ;;  %v3411_v15 = vmul.f32 %v3363_v43, %v7042_v19  ;;  %v3300_v12 = vadd.f32 %v6724_v23, %v3118_v48 }
 0x8b7   : > { %v4543_v7 = vpop.eup %4542  ;;  %v3424_v41 = vadd.f32 %v3416_v54, %v3408_v3  ;;  %v3417_v49 = vmul.f32 %v4541_v18, %v6708_v46  ;;  %v3413_v26 = vmul.f32 %v3365_v45, %v7043_v52  ;;  %v3377_v31 = vmul.f32 0.5, %v3297_v5 }
 0x8b8   : > { %v4545_v58 = vpop.eup %4544  ;;  %4556 = vtanh.f32 %v3422_v55  ;;  %3454 = vst [vmem:[%s6821_s11] sm:$0xff] %v3422_v55  ;;  %v3423_v10 = vadd.f32 %v3415_v33, %v3407_v59  ;;  %v3418_v1 = vmul.f32 %v4543_v7, %v6712_v17  ;;  %v3378_v52 = vmul.f32 0.5, %v3298_v22 }
 0x8b9   : > { %v4547_v60 = vpop.eup %4546  ;;  %4558 = vtanh.f32 %v3424_v41  ;;  %3456 = vst [vmem:[%s6821_s11 + $0x10] sm:$0xff] %v3424_v41  ;;  %v3425_v19 = vadd.f32 %v3417_v49, %v3409_v34  ;;  %v3420_v46 = vmul.f32 %v4545_v58, %v6716_v6  ;;  %v3299_v48 = vadd.f32 %v6726_v0, %v3117_v28 }
 0x8ba   : > { %v4549_v50 = vpop.eup %4548  ;;  %4560 = vtanh.f32 %v3423_v10  ;;  %3455 = vst [vmem:[%s6821_s11 + $0x8] sm:$0xff] %v3423_v10  ;;  %v3426_v17 = vadd.f32 %v3418_v1, %v3410_v51  ;;  %v3419_v25 = vmul.f32 %v4547_v60, %v3331_v36  ;;  %v3301_v23 = vadd.f32 %v6728_v14, %v3119_v30 }
 0x8bb   : > { %v4551_v16 = vpop.eup %4550  ;;  %3457 = vst [vmem:[%s6821_s11 + $0x18] sm:$0xff] %v3425_v19  ;;  %v3428_v13 = vadd.f32 %v3420_v46, %v3412_v37  ;;  %v3421_v29 = vmul.f32 %v4549_v50, %v3333_v53  ;;  %4562 = vtanh.f32 %v3425_v19  ;;  %v3380_v24 = vmul.f32 0.5, %v3300_v12 }
 0x8bc   : > { %3458 = vst [vmem:[%s6821_s11 + $0x20] sm:$0xff] %v3426_v17  ;;  %v3427_v6 = vadd.f32 %v3419_v25, %v3411_v15  ;;  %v3390_v47 = vadd.f32 1.0, %v4551_v16  ;;  %v4553_v36 = vpop.eup %4552  ;;  %4564 = vtanh.f32 %v3426_v17  ;;  %v3379_v8 = vmul.f32 0.5, %v3299_v48 }
 0x8bd   : > { %3460 = vst [vmem:[%s6821_s11 + $0x30] sm:$0xff] %v3428_v13  ;;  %v3429_v4 = vadd.f32 %v3421_v29, %v3413_v26  ;;  %4566 = vtanh.f32 %v3428_v13  ;;  %v3392_v57 = vadd.f32 1.0, %v4553_v36  ;;  %v3381_v28 = vmul.f32 0.5, %v3301_v23  ;;  %v4555_v61 = vpop.eup %4554 }
 0x8be   : > { %3459 = vst [vmem:[%s6821_s11 + $0x28] sm:$0xff] %v3427_v6  ;;  %v3398_v21 = vmul.f32 0.5, %v3390_v47  ;;  %4568 = vtanh.f32 %v3377_v31  ;;  %v3391_v14 = vadd.f32 1.0, %v4555_v61 }
 0x8bf   : > { %3461 = vst [vmem:[%s6821_s11 + $0x38] sm:$0xff] %v3429_v4  ;;  %v3400_v0 = vmul.f32 0.5, %v3392_v57  ;;  %4570 = vtanh.f32 %v3378_v52 }
 0x8c0   : > { %4572 = vtanh.f32 %v3380_v24  ;;  %v3399_v11 = vmul.f32 0.5, %v3391_v14 }
 0x8c1   : > { %4574 = vtanh.f32 %v3379_v8 }
 0x8c2   : > { %v4557_v30 = vpop.eup %4556  ;;  %4576 = vtanh.f32 %v3381_v28 }
 0x8c3   : > { %v4559_v53 = vpop.eup %4558  ;;  %v3438_v27 = vmul.f32 %v4557_v30, %v3398_v21  ;;  %4578 = vtanh.f32 %v3427_v6 }
 0x8c4   : > { %v4561_v32 = vpop.eup %4560  ;;  %v3440_v9 = vmul.f32 %v4559_v53, %v3400_v0  ;;  %4580 = vtanh.f32 %v3429_v4 }
 0x8c5   : > { %3446 = vst [vmem:[%s6820_s10] sm:$0xff] %v3438_v27  ;;  %v4563_v38 = vpop.eup %4562  ;;  %v3439_v39 = vmul.f32 %v4561_v32, %v3399_v11 }
 0x8c6   : > { %3448 = vst [vmem:[%s6820_s10 + $0x10] sm:$0xff] %v3440_v9  ;;  %v4565_v42 = vpop.eup %4564 }
 0x8c7   : > { %3447 = vst [vmem:[%s6820_s10 + $0x8] sm:$0xff] %v3439_v39  ;;  %v4567_v44 = vpop.eup %4566 }
 0x8c8   : > { %v4569_v3 = vpop.eup %4568 }
 0x8c9   : > { %v4571_v35 = vpop.eup %4570  ;;  %v3393_v63 = vadd.f32 1.0, %v4569_v3 }
 0x8ca   : > { %v4573_v40 = vpop.eup %4572  ;;  %v3394_v2 = vadd.f32 1.0, %v4571_v35 }
 0x8cb   : > { %v4575_v59 = vpop.eup %4574  ;;  %v3401_v43 = vmul.f32 0.5, %v3393_v63  ;;  %v3396_v56 = vadd.f32 1.0, %v4573_v40 }
 0x8cc   : > { %v4577_v20 = vpop.eup %4576  ;;  %v3402_v34 = vmul.f32 0.5, %v3394_v2  ;;  %v3395_v51 = vadd.f32 1.0, %v4575_v59 }
 0x8cd   : > { %v4579_v54 = vpop.eup %4578  ;;  %v3441_v62 = vmul.f32 %v4563_v38, %v3401_v43  ;;  %v3404_v18 = vmul.f32 0.5, %v3396_v56  ;;  %v3397_v37 = vadd.f32 1.0, %v4577_v20 }
 0x8ce   : > { %v4581_v45 = vpop.eup %4580  ;;  %v3442_v55 = vmul.f32 %v4565_v42, %v3402_v34  ;;  %v3403_v33 = vmul.f32 0.5, %v3395_v51 }
 0x8cf   : > { %3449 = vst [vmem:[%s6820_s10 + $0x18] sm:$0xff] %v3441_v62  ;;  %v3444_v7 = vmul.f32 %v4567_v44, %v3404_v18  ;;  %v3405_v15 = vmul.f32 0.5, %v3397_v37 }
 0x8d0   : > { %3450 = vst [vmem:[%s6820_s10 + $0x20] sm:$0xff] %v3442_v55  ;;  %v3443_v41 = vmul.f32 %v4579_v54, %v3403_v33 }
 0x8d1   : > { %3452 = vst [vmem:[%s6820_s10 + $0x30] sm:$0xff] %v3444_v7  ;;  %v3445_v49 = vmul.f32 %v4581_v45, %v3405_v15 }
 0x8d2   : > { %3451 = vst [vmem:[%s6820_s10 + $0x28] sm:$0xff] %v3443_v41 }
 0x8d3   : > { %3453 = vst [vmem:[%s6820_s10 + $0x38] sm:$0xff] %v3445_v49 }
 0x8d4 PF: > { %s22_s17 = sadd.s32 1, %s4724_s17  }
 0x8d5   : > { %p19_p8 = scmp.ge.s32.totalorder %s22_s17, 7  }
 0x8d7   :  { %21 = sbr.rel (!%p19_p8) target bundleno = 1 (0x1), region = 149 }

</bundles_post_ra>
